<compile_context>
chip_gen: v7x
topology: tpu7x:2x2x1
jax: 0.10.0
libtpu: 0.0.40
codegen_flags: <defaults>
</compile_context>

<pallas_src>
import functools

import jax
import jax.numpy as jnp
from jax.experimental import pallas as pl
from jax.experimental.pallas import tpu as pltpu


# ---------------------------------------------------------------------------
# Small helpers
# ---------------------------------------------------------------------------
def _round_up(x, m):
    return ((x + m - 1) // m) * m


def _vmem_budget_bytes():
    """~80% of this chip's VMEM (v5e/v6e 128 MiB, v7x 64 MiB).  Falls back to
    a v7x-safe budget if the hardware query is unavailable."""
    try:
        cap = int(pltpu.get_tpu_info().vmem_capacity_bytes)
    except Exception:
        cap = 64 * 1024 * 1024
    return int(cap * 0.8)


def _largest_aligned_divisor(n, align, cap):
    """Largest divisor of n that is a multiple of `align` and <= cap.
    Assumes align divides n."""
    best = align
    d = align
    limit = min(n, cap)
    while d <= limit:
        if n % d == 0:
            best = d
        d += align
    return best


def _pad_gate_cols(a, H, H_pad):
    """Pad the last dim (4H, PyTorch gate order [i,f,g,o]) to 4*H_pad,
    zero-padding each gate block independently so gate slices stay aligned."""
    if H_pad == H:
        return a
    parts = []
    for g in range(4):
        p = a[..., g * H:(g + 1) * H]
        pad = [(0, 0)] * (a.ndim - 1) + [(0, H_pad - H)]
        parts.append(jnp.pad(p, pad))
    return jnp.concatenate(parts, axis=-1)


# ---------------------------------------------------------------------------
# Kernel 1: LSTM recurrence over precomputed (bf16) input gates.
# ---------------------------------------------------------------------------
def _lstm_recurrence_kernel(pregates_ref, whh_ref, h_out_ref, h_scr, c_scr,
                            *, hidden_size, ts):
    """One grid step = one batch block x TS consecutive time steps.

    pregates_ref: (TS, bb, 4H) bf16, time-major, = x_t @ W_ih^T + b_ih + b_hh
    whh_ref:      (H, 4H)      bf16, grid-invariant W_hh^T
    h_out_ref:    (bb, TS, H)  bf16, BATCH-MAJOR hidden states for this block
    h_scr, c_scr: (bb, H)      f32 carried LSTM state (persists across time)
    """
    @pl.when(pl.program_id(1) == 0)          # first time block: reset state
    def _():
        h_scr[...] = jnp.zeros_like(h_scr)
        c_scr[...] = jnp.zeros_like(c_scr)

    H = hidden_size
    whh = whh_ref[...]                        # hoisted: loaded once per block
    h = h_scr[...]
    c = c_scr[...]

    # Static (compile-time) unroll over the TS steps in this block: all Ref
    # indices are static (always lowers cleanly); the serial dependence is
    # only on (h, c).  The recurrent matmul is bf16 on the MXU with f32
    # accumulation; gate math stays f32 (v5e-friendly).
    for s in range(ts):
        gates = pregates_ref[s] + jnp.dot(
            h.astype(jnp.bfloat16), whh, preferred_element_type=jnp.float32)
        i_g = jax.nn.sigmoid(gates[:, 0 * H:1 * H])
        f_g = jax.nn.sigmoid(gates[:, 1 * H:2 * H])
        g_g = jnp.tanh(gates[:, 2 * H:3 * H])
        o_g = jax.nn.sigmoid(gates[:, 3 * H:4 * H])
        c = f_g * c + i_g * g_g
        h = o_g * jnp.tanh(c)
        h_out_ref[:, s, :] = h.astype(h_out_ref.dtype)   # batch-major store

    h_scr[...] = h
    c_scr[...] = c


def _pick_ts(T_pad, bb, H, vmem_budget):
    """Largest time-block (multiple of 8, divides T_pad, <= 64 for bounded
    unroll) whose double-buffered streams fit in the VMEM budget."""
    per_step = 2 * (bb * 4 * H * 2) + 2 * (bb * H * 2)   # bf16 in + bf16 out
    fixed = 2 * (H * 4 * H * 2) + 2 * (bb * H * 4)       # W_hh^T (worst 2x) + h/c
    avail = vmem_budget - fixed
    ts = avail // per_step if avail > per_step else 8
    ts = max(8, min(int(ts), T_pad, 64))
    ts = (ts // 8) * 8
    while T_pad % ts != 0:
        ts -= 8
    return max(ts, 8)


def lstm_recurrence_pallas(pregates, w_hh_t, hidden_pad):
    """pregates: (T, B, 4*H_pad) bf16, time-major (gate-padded).
    w_hh_t: (H_pad, 4*H_pad) bf16.  Returns hidden states (B, T_pad, H_pad)
    bf16, BATCH-MAJOR (T_pad = T rounded up to a multiple of 8)."""
    T, B, G = pregates.shape
    H = hidden_pad
    assert G == 4 * H
    budget = _vmem_budget_bytes()

    # Pad time so the batch-major output block's sublane dim is 8-aligned.
    T_pad = _round_up(T, 8)
    if T_pad != T:
        pregates = jnp.pad(pregates, ((0, T_pad - T), (0, 0), (0, 0)))

    # v7x megacore: split the batch into 2 parallel blocks when large enough
    # (keeps >= 8 sublanes per core and 8-aligned batch blocks).
    bb = B // 2 if (B >= 16 and B % 16 == 0) else B
    ts = _pick_ts(T_pad, bb, H, budget)
    grid = (B // bb, T_pad // ts)

    kernel = functools.partial(_lstm_recurrence_kernel, hidden_size=H, ts=ts)
    flops = 2 * T_pad * B * H * 4 * H + 10 * T_pad * B * H
    bytes_accessed = (2 * T_pad * B * 4 * H          # bf16 pregates
                      + 2 * B * T_pad * H            # bf16 h out
                      + 2 * H * 4 * H)               # bf16 W_hh^T

    def build(whh_spec):
        return pl.pallas_call(
            kernel,
            out_shape=jax.ShapeDtypeStruct((B, T_pad, H), jnp.bfloat16),
            grid_spec=pltpu.PrefetchScalarGridSpec(
                num_scalar_prefetch=0,
                grid=grid,
                in_specs=[
                    pl.BlockSpec((ts, bb, G), lambda b, t: (t, b, 0)),
                    whh_spec,
                ],
                out_specs=pl.BlockSpec((bb, ts, H), lambda b, t: (b, t, 0)),
                scratch_shapes=[
                    pltpu.VMEM((bb, H), jnp.float32),   # h carry
                    pltpu.VMEM((bb, H), jnp.float32),   # c carry
                ],
            ),
            compiler_params=pltpu.CompilerParams(
                dimension_semantics=("parallel", "arbitrary"),
                vmem_limit_bytes=budget),
            cost_estimate=pl.CostEstimate(
                flops=flops,
                transcendentals=5 * T_pad * B * H,
                bytes_accessed=bytes_accessed),
        )

    # W_hh^T is grid-invariant: request a single buffer (saves one full
    # H x 4H VMEM copy).  Fall back to the default double-buffered spec if
    # this jax build rejects pipeline_mode here.
    try:
        spec = pl.BlockSpec((H, G), lambda b, t: (0, 0),
                            pipeline_mode=pl.Buffered(1))
        return build(spec)(pregates, w_hh_t)
    except Exception:
        return build(pl.BlockSpec((H, G), lambda b, t: (0, 0)))(
            pregates, w_hh_t)


# ---------------------------------------------------------------------------
# Kernel 2: batched vocab projection  logits = H_all @ W_lin^T + b_lin
# ---------------------------------------------------------------------------
def _linear_kernel(x_ref, w_ref, b_ref, out_ref):
    out_ref[...] = (jnp.dot(x_ref[...], w_ref[...],
                            preferred_element_type=jnp.float32)
                    + b_ref[...]).astype(out_ref.dtype)


def linear_pallas(x, w, b):
    """x: (M, K) bf16 activations (K already 128-padded), w: (V, K) f32,
    b: (V,) f32.  Returns (M, V_pad) f32 logits (caller slices V)."""
    M, K = x.shape
    V = w.shape[0]
    budget = _vmem_budget_bytes()

    V_pad = _round_up(V, 128)
    M_pad = _round_up(M, 8)

    w_t = jnp.transpose(w).astype(jnp.bfloat16)        # (K, V) bf16 once
    if V_pad != V:
        w_t = jnp.pad(w_t, ((0, 0), (0, V_pad - V)))
        b = jnp.pad(b, (0, V_pad - V))
    if M_pad != M:
        x = jnp.pad(x, ((0, M_pad - M), (0, 0)))
    b2 = b[None, :].astype(jnp.float32)                # (1, V_pad)

    # Big, lane-dense, VMEM-aware tiles (no full-dim fallback).
    tm_cap, tv_cap = 512, 512
    while True:
        tm = _largest_aligned_divisor(M_pad, 8, tm_cap)
        tv = _largest_aligned_divisor(V_pad, 128, tv_cap)
        need = (2 * tm * K * 2 + 2 * K * tv * 2        # bf16 x / w tiles
                + 2 * tv * 4 + 2 * tm * tv * 4)        # f32 bias / out tiles
        if need <= budget or (tm == 8 and tv == 128):
            break
        if tm > 8:
            tm_cap = max(8, tm // 2)
        else:
            tv_cap = max(128, tv // 2)

    # Grid ordered (V blocks, M blocks): the W block index only changes on the
    # outer axis, so the dominant (K, V) weight is streamed from HBM once.
    grid = (V_pad // tv, M_pad // tm)

    out = pl.pallas_call(
        _linear_kernel,
        out_shape=jax.ShapeDtypeStruct((M_pad, V_pad), jnp.float32),
        grid_spec=pltpu.PrefetchScalarGridSpec(
            num_scalar_prefetch=0,
            grid=grid,
            in_specs=[
                pl.BlockSpec((tm, K), lambda i, j: (j, 0)),
                pl.BlockSpec((K, tv), lambda i, j: (0, i)),
                pl.BlockSpec((1, tv), lambda i, j: (0, i)),
            ],
            out_specs=pl.BlockSpec((tm, tv), lambda i, j: (j, i)),
        ),
        compiler_params=pltpu.CompilerParams(
            dimension_semantics=("parallel", "parallel"),   # megacore-friendly
            vmem_limit_bytes=budget),
        cost_estimate=pl.CostEstimate(
            flops=2 * M_pad * K * V_pad,
            transcendentals=0,
            bytes_accessed=2 * (M_pad * K + K * V_pad)
                           + 4 * (M_pad * V_pad + V_pad)),
    )(x, w_t, b2)
    return out[:M]


# ---------------------------------------------------------------------------
# Parameters / forward / reference
# ---------------------------------------------------------------------------
def init_params(key, embed_size, hidden_size, vocab_size):
    ks = jax.random.split(key, 7)
    s = 0.1
    return {
        "embedding": s * jax.random.normal(ks[0], (vocab_size, embed_size),
                                           jnp.float32),
        "w_ih": s * jax.random.normal(ks[1], (4 * hidden_size, embed_size),
                                      jnp.float32),
        "w_hh": s * jax.random.normal(ks[2], (4 * hidden_size, hidden_size),
                                      jnp.float32),
        "b_ih": s * jax.random.normal(ks[3], (4 * hidden_size,), jnp.float32),
        "b_hh": s * jax.random.normal(ks[4], (4 * hidden_size,), jnp.float32),
        "w_lin": s * jax.random.normal(ks[5], (vocab_size, hidden_size),
                                       jnp.float32),
        "b_lin": s * jax.random.normal(ks[6], (vocab_size,), jnp.float32),
    }


def decoder_rnn_forward(params, features, captions, hidden_size):
    """Matches DecoderRNN.forward: returns (B, T, vocab),
    T = 1 + (captions.shape[1] - 1)."""
    H = hidden_size
    B, E = features.shape
    V = params["w_lin"].shape[0]
    H_pad = _round_up(H, 128)

    # Glue (XLA): embedding gather directly in time-major layout + concat.
    cap = captions[:, :-1]                               # (B, Tc-1)
    embed_tm = params["embedding"][cap.T]                # (Tc-1, B, E)
    inputs_tm = jnp.concatenate(
        [features[None, :, :], embed_tm], axis=0).astype(jnp.float32)
    T = inputs_tm.shape[0]

    # Hoisted input projection: one big (T*B, E) x (E, 4H) matmul + bias,
    # then gate-padded to 4*H_pad and streamed to the kernel in bf16.
    bias = params["b_ih"] + params["b_hh"]               # (4H,)
    pregates = (inputs_tm.reshape(T * B, E) @ params["w_ih"].T
                + bias).reshape(T, B, 4 * H)             # (T, B, 4H) f32
    pregates = _pad_gate_cols(pregates, H, H_pad).astype(jnp.bfloat16)

    # Recurrent weights: (4H, H) -> (H_pad, 4*H_pad) bf16 (zero-padded).
    w_hh_t = jnp.transpose(params["w_hh"])               # (H, 4H)
    w_hh_t = jnp.pad(w_hh_t, ((0, H_pad - H), (0, 0)))
    w_hh_t = _pad_gate_cols(w_hh_t, H, H_pad).astype(jnp.bfloat16)

    # Sequential LSTM recurrence (Pallas kernel #1): batch-major bf16 h.
    h_all = lstm_recurrence_pallas(pregates, w_hh_t, H_pad)   # (B, T_pad, H_pad)
    T_pad = h_all.shape[1]

    # Parallel tiled vocab projection (Pallas kernel #2) — no HBM transpose:
    # (B, T_pad, H_pad) reshapes contiguously to (B*T_pad, H_pad).
    w_lin = params["w_lin"]
    if H_pad != H:
        w_lin = jnp.pad(w_lin, ((0, 0), (0, H_pad - H)))
    logits = linear_pallas(h_all.reshape(B * T_pad, H_pad),
                           w_lin, params["b_lin"])            # (B*T_pad, V_pad)
    return logits.reshape(B, T_pad, -1)[:, :T, :V]            # (B, T, V)


def decoder_rnn_reference(params, features, captions, hidden_size):
    """Pure-JAX f32 reference for correctness checking."""
    embed = params["embedding"][captions[:, :-1]]
    inputs = jnp.concatenate([features[:, None, :], embed], axis=1)
    B, T, _ = inputs.shape
    H = hidden_size

    def step(carry, x_t):
        h, c = carry
        gates = (x_t @ params["w_ih"].T + h @ params["w_hh"].T
                 + params["b_ih"] + params["b_hh"])
        i = jax.nn.sigmoid(gates[:, 0 * H:1 * H])
        f = jax.nn.sigmoid(gates[:, 1 * H:2 * H])
        g = jnp.tanh(gates[:, 2 * H:3 * H])
        o = jax.nn.sigmoid(gates[:, 3 * H:4 * H])
        c = f * c + i * g
        h = o * jnp.tanh(c)
        return (h, c), h

    h0 = jnp.zeros((B, H), jnp.float32)
    c0 = jnp.zeros((B, H), jnp.float32)
    _, hs = jax.lax.scan(step, (h0, c0), jnp.transpose(inputs, (1, 0, 2)))
    hs = jnp.transpose(hs, (1, 0, 2))                    # (B, T, H)
    return hs @ params["w_lin"].T + params["b_lin"]


if __name__ == "__main__":
    embed_size = 32
    hidden_size = 32
    vocab_size = 128
    batch = 2
    caption_len = 8     # -> T = 1 + 7 = 8

    key = jax.random.PRNGKey(0)
    k_params, k_feat, k_cap = jax.random.split(key, 3)
    params = init_params(k_params, embed_size, hidden_size, vocab_size)

    features = jax.random.normal(k_feat, (batch, embed_size), jnp.float32)
    captions = jax.random.randint(k_cap, (batch, caption_len), 0, vocab_size,
                                  dtype=jnp.int32)

    out = decoder_rnn_forward(params, features, captions, hidden_size)
    out = jax.block_until_ready(out)

    ref = decoder_rnn_reference(params, features, captions, hidden_size)
    assert out.shape == (batch, caption_len, vocab_size), out.shape
    # bf16 streams (pregates / W_hh / h / W_lin) with f32 accumulation:
    # loosen tolerance accordingly.
    err = float(jnp.max(jnp.abs(out - ref)))
    assert err < 6e-2, err

    print("KERNEL_OK")
</pallas_src>

<mosaic_0001>
module attributes {stable_mosaic.version = 11 : i64} {
  func.func @_lstm_recurrence_kernel(%arg0: i32, %arg1: i32, %arg2: memref<8x2x512xbf16, #tpu.memory_space<vmem>>, %arg3: memref<128x512xbf16, #tpu.memory_space<vmem>>, %arg4: memref<2x8x128xbf16, #tpu.memory_space<vmem>>, %arg5: memref<2x128xf32, #tpu.memory_space<vmem>>, %arg6: memref<2x128xf32, #tpu.memory_space<vmem>>) attributes {dimension_semantics = [#tpu.dimension_semantics<parallel>, #tpu.dimension_semantics<arbitrary>], iteration_bounds = array<i64: 1, 1>, scalar_prefetch = 0 : i64, scratch_operands = 2 : i64, tpu.core_type = #tpu.core_type<tc>, window_params = [{transform_indices = @transform_0, window_bounds = array<i64: 8, 2, 512>}, {pipeline_mode = #tpu.pipeline_mode<synchronous>, transform_indices = @transform_1, window_bounds = array<i64: 128, 512>}, {transform_indices = @transform_2, window_bounds = array<i64: 2, 8, 128>}]} {
    %c0_i32 = arith.constant 0 : i32
    %0 = arith.cmpi eq, %arg1, %c0_i32 : i32
    %1 = arith.extui %0 : i1 to i32
    %c0_i32_0 = arith.constant 0 : i32
    %2 = arith.cmpi ne, %1, %c0_i32_0 : i32
    scf.if %2 {
      %cst_82 = arith.constant 0.000000e+00 : f32
      %288 = vector.broadcast %cst_82 : f32 to vector<2x128xf32>
      %c0_83 = arith.constant 0 : index
      %c0_84 = arith.constant 0 : index
      %289 = vector.load %arg5[%c0_83, %c0_84] : memref<2x128xf32, #tpu.memory_space<vmem>>, vector<2x128xf32>
      tpu.vector_store %arg5[%c0_83, %c0_84], %288 {strides = array<i32>} : memref<2x128xf32, #tpu.memory_space<vmem>>, vector<2x128xf32>,
      %cst_85 = arith.constant 0.000000e+00 : f32
      %290 = vector.broadcast %cst_85 : f32 to vector<2x128xf32>
      %c0_86 = arith.constant 0 : index
      %c0_87 = arith.constant 0 : index
      %291 = vector.load %arg6[%c0_86, %c0_87] : memref<2x128xf32, #tpu.memory_space<vmem>>, vector<2x128xf32>
      tpu.vector_store %arg6[%c0_86, %c0_87], %290 {strides = array<i32>} : memref<2x128xf32, #tpu.memory_space<vmem>>, vector<2x128xf32>,
    } else {
    }
    %c0 = arith.constant 0 : index
    %c0_1 = arith.constant 0 : index
    %3 = vector.load %arg3[%c0, %c0_1] : memref<128x512xbf16, #tpu.memory_space<vmem>>, vector<128x512xbf16>
    %c0_2 = arith.constant 0 : index
    %c0_3 = arith.constant 0 : index
    %4 = vector.load %arg5[%c0_2, %c0_3] : memref<2x128xf32, #tpu.memory_space<vmem>>, vector<2x128xf32>
    %c0_4 = arith.constant 0 : index
    %c0_5 = arith.constant 0 : index
    %5 = vector.load %arg6[%c0_4, %c0_5] : memref<2x128xf32, #tpu.memory_space<vmem>>, vector<2x128xf32>
    %c0_6 = arith.constant 0 : index
    %c0_7 = arith.constant 0 : index
    %c0_8 = arith.constant 0 : index
    %6 = vector.load %arg2[%c0_6, %c0_7, %c0_8] : memref<8x2x512xbf16, #tpu.memory_space<vmem>>, vector<1x2x512xbf16>
    %7 = vector.shape_cast %6 : vector<1x2x512xbf16> to vector<2x512xbf16>
    %8 = arith.truncf %4 : vector<2x128xf32> to vector<2x128xbf16>
    %cst = arith.constant dense<0.000000e+00> : vector<2x512xf32>
    %9 = tpu.matmul %8, %3, %cst {dimension_numbers = #tpu.dot_dimension_numbers<[1], [0], [0], [1], [0, 0, 1, 1], [], []>} : vector<2x128xbf16>, vector<128x512xbf16>, vector<2x512xf32> -> vector<2x512xf32>
    %10 = arith.extf %7 : vector<2x512xbf16> to vector<2x512xf32>
    %11 = arith.addf %10, %9 : vector<2x512xf32>
    %12 = vector.extract_strided_slice %11 {offsets = [0, 0], sizes = [2, 128], strides = [1, 1]} : vector<2x512xf32> to vector<2x128xf32>
    %13 = arith.negf %12 : vector<2x128xf32>
    %14 = math.exp %13 : vector<2x128xf32>
    %cst_9 = arith.constant 1.000000e+00 : f32
    %15 = vector.broadcast %cst_9 : f32 to vector<2x128xf32>
    %16 = arith.addf %15, %14 : vector<2x128xf32>
    %17 = arith.divf %15, %16 : vector<2x128xf32>
    %18 = vector.extract_strided_slice %11 {offsets = [0, 128], sizes = [2, 128], strides = [1, 1]} : vector<2x512xf32> to vector<2x128xf32>
    %19 = arith.negf %18 : vector<2x128xf32>
    %20 = math.exp %19 : vector<2x128xf32>
    %cst_10 = arith.constant 1.000000e+00 : f32
    %21 = vector.broadcast %cst_10 : f32 to vector<2x128xf32>
    %22 = arith.addf %21, %20 : vector<2x128xf32>
    %23 = arith.divf %21, %22 : vector<2x128xf32>
    %24 = vector.extract_strided_slice %11 {offsets = [0, 256], sizes = [2, 128], strides = [1, 1]} : vector<2x512xf32> to vector<2x128xf32>
    %25 = math.tanh %24 : vector<2x128xf32>
    %26 = vector.extract_strided_slice %11 {offsets = [0, 384], sizes = [2, 128], strides = [1, 1]} : vector<2x512xf32> to vector<2x128xf32>
    %27 = arith.negf %26 : vector<2x128xf32>
    %28 = math.exp %27 : vector<2x128xf32>
    %cst_11 = arith.constant 1.000000e+00 : f32
    %29 = vector.broadcast %cst_11 : f32 to vector<2x128xf32>
    %30 = arith.addf %29, %28 : vector<2x128xf32>
    %31 = arith.divf %29, %30 : vector<2x128xf32>
    %32 = arith.mulf %23, %5 : vector<2x128xf32>
    %33 = arith.mulf %17, %25 : vector<2x128xf32>
    %34 = arith.addf %32, %33 : vector<2x128xf32>
    %35 = math.tanh %34 : vector<2x128xf32>
    %36 = arith.mulf %31, %35 : vector<2x128xf32>
    %37 = arith.truncf %36 : vector<2x128xf32> to vector<2x128xbf16>
    %c0_12 = arith.constant 0 : index
    %c0_13 = arith.constant 0 : index
    %c0_14 = arith.constant 0 : index
    %38 = vector.load %arg4[%c0_12, %c0_13, %c0_14] : memref<2x8x128xbf16, #tpu.memory_space<vmem>>, vector<2x1x128xbf16>
    %39 = vector.shape_cast %38 : vector<2x1x128xbf16> to vector<2x128xbf16>
    %40 = vector.shape_cast %37 : vector<2x128xbf16> to vector<2x1x128xbf16>
    tpu.vector_store %arg4[%c0_12, %c0_13, %c0_14], %40 {strides = array<i32>} : memref<2x8x128xbf16, #tpu.memory_space<vmem>>, vector<2x1x128xbf16>,
    %c1 = arith.constant 1 : index
    %c0_15 = arith.constant 0 : index
    %c0_16 = arith.constant 0 : index
    %41 = vector.load %arg2[%c1, %c0_15, %c0_16] : memref<8x2x512xbf16, #tpu.memory_space<vmem>>, vector<1x2x512xbf16>
    %42 = vector.shape_cast %41 : vector<1x2x512xbf16> to vector<2x512xbf16>
    %43 = arith.truncf %36 : vector<2x128xf32> to vector<2x128xbf16>
    %cst_17 = arith.constant dense<0.000000e+00> : vector<2x512xf32>
    %44 = tpu.matmul %43, %3, %cst_17 {dimension_numbers = #tpu.dot_dimension_numbers<[1], [0], [0], [1], [0, 0, 1, 1], [], []>} : vector<2x128xbf16>, vector<128x512xbf16>, vector<2x512xf32> -> vector<2x512xf32>
    %45 = arith.extf %42 : vector<2x512xbf16> to vector<2x512xf32>
    %46 = arith.addf %45, %44 : vector<2x512xf32>
    %47 = vector.extract_strided_slice %46 {offsets = [0, 0], sizes = [2, 128], strides = [1, 1]} : vector<2x512xf32> to vector<2x128xf32>
    %48 = arith.negf %47 : vector<2x128xf32>
    %49 = math.exp %48 : vector<2x128xf32>
    %cst_18 = arith.constant 1.000000e+00 : f32
    %50 = vector.broadcast %cst_18 : f32 to vector<2x128xf32>
    %51 = arith.addf %50, %49 : vector<2x128xf32>
    %52 = arith.divf %50, %51 : vector<2x128xf32>
    %53 = vector.extract_strided_slice %46 {offsets = [0, 128], sizes = [2, 128], strides = [1, 1]} : vector<2x512xf32> to vector<2x128xf32>
    %54 = arith.negf %53 : vector<2x128xf32>
    %55 = math.exp %54 : vector<2x128xf32>
    %cst_19 = arith.constant 1.000000e+00 : f32
    %56 = vector.broadcast %cst_19 : f32 to vector<2x128xf32>
    %57 = arith.addf %56, %55 : vector<2x128xf32>
    %58 = arith.divf %56, %57 : vector<2x128xf32>
    %59 = vector.extract_strided_slice %46 {offsets = [0, 256], sizes = [2, 128], strides = [1, 1]} : vector<2x512xf32> to vector<2x128xf32>
    %60 = math.tanh %59 : vector<2x128xf32>
    %61 = vector.extract_strided_slice %46 {offsets = [0, 384], sizes = [2, 128], strides = [1, 1]} : vector<2x512xf32> to vector<2x128xf32>
    %62 = arith.negf %61 : vector<2x128xf32>
    %63 = math.exp %62 : vector<2x128xf32>
    %cst_20 = arith.constant 1.000000e+00 : f32
    %64 = vector.broadcast %cst_20 : f32 to vector<2x128xf32>
    %65 = arith.addf %64, %63 : vector<2x128xf32>
    %66 = arith.divf %64, %65 : vector<2x128xf32>
    %67 = arith.mulf %58, %34 : vector<2x128xf32>
    %68 = arith.mulf %52, %60 : vector<2x128xf32>
    %69 = arith.addf %67, %68 : vector<2x128xf32>
    %70 = math.tanh %69 : vector<2x128xf32>
    %71 = arith.mulf %66, %70 : vector<2x128xf32>
    %72 = arith.truncf %71 : vector<2x128xf32> to vector<2x128xbf16>
    %c0_21 = arith.constant 0 : index
    %c1_22 = arith.constant 1 : index
    %c0_23 = arith.constant 0 : index
    %73 = vector.load %arg4[%c0_21, %c1_22, %c0_23] : memref<2x8x128xbf16, #tpu.memory_space<vmem>>, vector<2x1x128xbf16>
    %74 = vector.shape_cast %73 : vector<2x1x128xbf16> to vector<2x128xbf16>
    %75 = vector.shape_cast %72 : vector<2x128xbf16> to vector<2x1x128xbf16>
    tpu.vector_store %arg4[%c0_21, %c1_22, %c0_23], %75 {strides = array<i32>} : memref<2x8x128xbf16, #tpu.memory_space<vmem>>, vector<2x1x128xbf16>,
    %c2 = arith.constant 2 : index
    %c0_24 = arith.constant 0 : index
    %c0_25 = arith.constant 0 : index
    %76 = vector.load %arg2[%c2, %c0_24, %c0_25] : memref<8x2x512xbf16, #tpu.memory_space<vmem>>, vector<1x2x512xbf16>
    %77 = vector.shape_cast %76 : vector<1x2x512xbf16> to vector<2x512xbf16>
    %78 = arith.truncf %71 : vector<2x128xf32> to vector<2x128xbf16>
    %cst_26 = arith.constant dense<0.000000e+00> : vector<2x512xf32>
    %79 = tpu.matmul %78, %3, %cst_26 {dimension_numbers = #tpu.dot_dimension_numbers<[1], [0], [0], [1], [0, 0, 1, 1], [], []>} : vector<2x128xbf16>, vector<128x512xbf16>, vector<2x512xf32> -> vector<2x512xf32>
    %80 = arith.extf %77 : vector<2x512xbf16> to vector<2x512xf32>
    %81 = arith.addf %80, %79 : vector<2x512xf32>
    %82 = vector.extract_strided_slice %81 {offsets = [0, 0], sizes = [2, 128], strides = [1, 1]} : vector<2x512xf32> to vector<2x128xf32>
    %83 = arith.negf %82 : vector<2x128xf32>
    %84 = math.exp %83 : vector<2x128xf32>
    %cst_27 = arith.constant 1.000000e+00 : f32
    %85 = vector.broadcast %cst_27 : f32 to vector<2x128xf32>
    %86 = arith.addf %85, %84 : vector<2x128xf32>
    %87 = arith.divf %85, %86 : vector<2x128xf32>
    %88 = vector.extract_strided_slice %81 {offsets = [0, 128], sizes = [2, 128], strides = [1, 1]} : vector<2x512xf32> to vector<2x128xf32>
    %89 = arith.negf %88 : vector<2x128xf32>
    %90 = math.exp %89 : vector<2x128xf32>
    %cst_28 = arith.constant 1.000000e+00 : f32
    %91 = vector.broadcast %cst_28 : f32 to vector<2x128xf32>
    %92 = arith.addf %91, %90 : vector<2x128xf32>
    %93 = arith.divf %91, %92 : vector<2x128xf32>
    %94 = vector.extract_strided_slice %81 {offsets = [0, 256], sizes = [2, 128], strides = [1, 1]} : vector<2x512xf32> to vector<2x128xf32>
    %95 = math.tanh %94 : vector<2x128xf32>
    %96 = vector.extract_strided_slice %81 {offsets = [0, 384], sizes = [2, 128], strides = [1, 1]} : vector<2x512xf32> to vector<2x128xf32>
    %97 = arith.negf %96 : vector<2x128xf32>
    %98 = math.exp %97 : vector<2x128xf32>
    %cst_29 = arith.constant 1.000000e+00 : f32
    %99 = vector.broadcast %cst_29 : f32 to vector<2x128xf32>
    %100 = arith.addf %99, %98 : vector<2x128xf32>
    %101 = arith.divf %99, %100 : vector<2x128xf32>
    %102 = arith.mulf %93, %69 : vector<2x128xf32>
    %103 = arith.mulf %87, %95 : vector<2x128xf32>
    %104 = arith.addf %102, %103 : vector<2x128xf32>
    %105 = math.tanh %104 : vector<2x128xf32>
    %106 = arith.mulf %101, %105 : vector<2x128xf32>
    %107 = arith.truncf %106 : vector<2x128xf32> to vector<2x128xbf16>
    %c0_30 = arith.constant 0 : index
    %c2_31 = arith.constant 2 : index
    %c0_32 = arith.constant 0 : index
    %108 = vector.load %arg4[%c0_30, %c2_31, %c0_32] : memref<2x8x128xbf16, #tpu.memory_space<vmem>>, vector<2x1x128xbf16>
    %109 = vector.shape_cast %108 : vector<2x1x128xbf16> to vector<2x128xbf16>
    %110 = vector.shape_cast %107 : vector<2x128xbf16> to vector<2x1x128xbf16>
    tpu.vector_store %arg4[%c0_30, %c2_31, %c0_32], %110 {strides = array<i32>} : memref<2x8x128xbf16, #tpu.memory_space<vmem>>, vector<2x1x128xbf16>,
    %c3 = arith.constant 3 : index
    %c0_33 = arith.constant 0 : index
    %c0_34 = arith.constant 0 : index
    %111 = vector.load %arg2[%c3, %c0_33, %c0_34] : memref<8x2x512xbf16, #tpu.memory_space<vmem>>, vector<1x2x512xbf16>
    %112 = vector.shape_cast %111 : vector<1x2x512xbf16> to vector<2x512xbf16>
    %113 = arith.truncf %106 : vector<2x128xf32> to vector<2x128xbf16>
    %cst_35 = arith.constant dense<0.000000e+00> : vector<2x512xf32>
    %114 = tpu.matmul %113, %3, %cst_35 {dimension_numbers = #tpu.dot_dimension_numbers<[1], [0], [0], [1], [0, 0, 1, 1], [], []>} : vector<2x128xbf16>, vector<128x512xbf16>, vector<2x512xf32> -> vector<2x512xf32>
    %115 = arith.extf %112 : vector<2x512xbf16> to vector<2x512xf32>
    %116 = arith.addf %115, %114 : vector<2x512xf32>
    %117 = vector.extract_strided_slice %116 {offsets = [0, 0], sizes = [2, 128], strides = [1, 1]} : vector<2x512xf32> to vector<2x128xf32>
    %118 = arith.negf %117 : vector<2x128xf32>
    %119 = math.exp %118 : vector<2x128xf32>
    %cst_36 = arith.constant 1.000000e+00 : f32
    %120 = vector.broadcast %cst_36 : f32 to vector<2x128xf32>
    %121 = arith.addf %120, %119 : vector<2x128xf32>
    %122 = arith.divf %120, %121 : vector<2x128xf32>
    %123 = vector.extract_strided_slice %116 {offsets = [0, 128], sizes = [2, 128], strides = [1, 1]} : vector<2x512xf32> to vector<2x128xf32>
    %124 = arith.negf %123 : vector<2x128xf32>
    %125 = math.exp %124 : vector<2x128xf32>
    %cst_37 = arith.constant 1.000000e+00 : f32
    %126 = vector.broadcast %cst_37 : f32 to vector<2x128xf32>
    %127 = arith.addf %126, %125 : vector<2x128xf32>
    %128 = arith.divf %126, %127 : vector<2x128xf32>
    %129 = vector.extract_strided_slice %116 {offsets = [0, 256], sizes = [2, 128], strides = [1, 1]} : vector<2x512xf32> to vector<2x128xf32>
    %130 = math.tanh %129 : vector<2x128xf32>
    %131 = vector.extract_strided_slice %116 {offsets = [0, 384], sizes = [2, 128], strides = [1, 1]} : vector<2x512xf32> to vector<2x128xf32>
    %132 = arith.negf %131 : vector<2x128xf32>
    %133 = math.exp %132 : vector<2x128xf32>
    %cst_38 = arith.constant 1.000000e+00 : f32
    %134 = vector.broadcast %cst_38 : f32 to vector<2x128xf32>
    %135 = arith.addf %134, %133 : vector<2x128xf32>
    %136 = arith.divf %134, %135 : vector<2x128xf32>
    %137 = arith.mulf %128, %104 : vector<2x128xf32>
    %138 = arith.mulf %122, %130 : vector<2x128xf32>
    %139 = arith.addf %137, %138 : vector<2x128xf32>
    %140 = math.tanh %139 : vector<2x128xf32>
    %141 = arith.mulf %136, %140 : vector<2x128xf32>
    %142 = arith.truncf %141 : vector<2x128xf32> to vector<2x128xbf16>
    %c0_39 = arith.constant 0 : index
    %c3_40 = arith.constant 3 : index
    %c0_41 = arith.constant 0 : index
    %143 = vector.load %arg4[%c0_39, %c3_40, %c0_41] : memref<2x8x128xbf16, #tpu.memory_space<vmem>>, vector<2x1x128xbf16>
    %144 = vector.shape_cast %143 : vector<2x1x128xbf16> to vector<2x128xbf16>
    %145 = vector.shape_cast %142 : vector<2x128xbf16> to vector<2x1x128xbf16>
    tpu.vector_store %arg4[%c0_39, %c3_40, %c0_41], %145 {strides = array<i32>} : memref<2x8x128xbf16, #tpu.memory_space<vmem>>, vector<2x1x128xbf16>,
    %c4 = arith.constant 4 : index
    %c0_42 = arith.constant 0 : index
    %c0_43 = arith.constant 0 : index
    %146 = vector.load %arg2[%c4, %c0_42, %c0_43] : memref<8x2x512xbf16, #tpu.memory_space<vmem>>, vector<1x2x512xbf16>
    %147 = vector.shape_cast %146 : vector<1x2x512xbf16> to vector<2x512xbf16>
    %148 = arith.truncf %141 : vector<2x128xf32> to vector<2x128xbf16>
    %cst_44 = arith.constant dense<0.000000e+00> : vector<2x512xf32>
    %149 = tpu.matmul %148, %3, %cst_44 {dimension_numbers = #tpu.dot_dimension_numbers<[1], [0], [0], [1], [0, 0, 1, 1], [], []>} : vector<2x128xbf16>, vector<128x512xbf16>, vector<2x512xf32> -> vector<2x512xf32>
    %150 = arith.extf %147 : vector<2x512xbf16> to vector<2x512xf32>
    %151 = arith.addf %150, %149 : vector<2x512xf32>
    %152 = vector.extract_strided_slice %151 {offsets = [0, 0], sizes = [2, 128], strides = [1, 1]} : vector<2x512xf32> to vector<2x128xf32>
    %153 = arith.negf %152 : vector<2x128xf32>
    %154 = math.exp %153 : vector<2x128xf32>
    %cst_45 = arith.constant 1.000000e+00 : f32
    %155 = vector.broadcast %cst_45 : f32 to vector<2x128xf32>
    %156 = arith.addf %155, %154 : vector<2x128xf32>
    %157 = arith.divf %155, %156 : vector<2x128xf32>
    %158 = vector.extract_strided_slice %151 {offsets = [0, 128], sizes = [2, 128], strides = [1, 1]} : vector<2x512xf32> to vector<2x128xf32>
    %159 = arith.negf %158 : vector<2x128xf32>
    %160 = math.exp %159 : vector<2x128xf32>
    %cst_46 = arith.constant 1.000000e+00 : f32
    %161 = vector.broadcast %cst_46 : f32 to vector<2x128xf32>
    %162 = arith.addf %161, %160 : vector<2x128xf32>
    %163 = arith.divf %161, %162 : vector<2x128xf32>
    %164 = vector.extract_strided_slice %151 {offsets = [0, 256], sizes = [2, 128], strides = [1, 1]} : vector<2x512xf32> to vector<2x128xf32>
    %165 = math.tanh %164 : vector<2x128xf32>
    %166 = vector.extract_strided_slice %151 {offsets = [0, 384], sizes = [2, 128], strides = [1, 1]} : vector<2x512xf32> to vector<2x128xf32>
    %167 = arith.negf %166 : vector<2x128xf32>
    %168 = math.exp %167 : vector<2x128xf32>
    %cst_47 = arith.constant 1.000000e+00 : f32
    %169 = vector.broadcast %cst_47 : f32 to vector<2x128xf32>
    %170 = arith.addf %169, %168 : vector<2x128xf32>
    %171 = arith.divf %169, %170 : vector<2x128xf32>
    %172 = arith.mulf %163, %139 : vector<2x128xf32>
    %173 = arith.mulf %157, %165 : vector<2x128xf32>
    %174 = arith.addf %172, %173 : vector<2x128xf32>
    %175 = math.tanh %174 : vector<2x128xf32>
    %176 = arith.mulf %171, %175 : vector<2x128xf32>
    %177 = arith.truncf %176 : vector<2x128xf32> to vector<2x128xbf16>
    %c0_48 = arith.constant 0 : index
    %c4_49 = arith.constant 4 : index
    %c0_50 = arith.constant 0 : index
    %178 = vector.load %arg4[%c0_48, %c4_49, %c0_50] : memref<2x8x128xbf16, #tpu.memory_space<vmem>>, vector<2x1x128xbf16>
    %179 = vector.shape_cast %178 : vector<2x1x128xbf16> to vector<2x128xbf16>
    %180 = vector.shape_cast %177 : vector<2x128xbf16> to vector<2x1x128xbf16>
    tpu.vector_store %arg4[%c0_48, %c4_49, %c0_50], %180 {strides = array<i32>} : memref<2x8x128xbf16, #tpu.memory_space<vmem>>, vector<2x1x128xbf16>,
    %c5 = arith.constant 5 : index
    %c0_51 = arith.constant 0 : index
    %c0_52 = arith.constant 0 : index
    %181 = vector.load %arg2[%c5, %c0_51, %c0_52] : memref<8x2x512xbf16, #tpu.memory_space<vmem>>, vector<1x2x512xbf16>
    %182 = vector.shape_cast %181 : vector<1x2x512xbf16> to vector<2x512xbf16>
    %183 = arith.truncf %176 : vector<2x128xf32> to vector<2x128xbf16>
    %cst_53 = arith.constant dense<0.000000e+00> : vector<2x512xf32>
    %184 = tpu.matmul %183, %3, %cst_53 {dimension_numbers = #tpu.dot_dimension_numbers<[1], [0], [0], [1], [0, 0, 1, 1], [], []>} : vector<2x128xbf16>, vector<128x512xbf16>, vector<2x512xf32> -> vector<2x512xf32>
    %185 = arith.extf %182 : vector<2x512xbf16> to vector<2x512xf32>
    %186 = arith.addf %185, %184 : vector<2x512xf32>
    %187 = vector.extract_strided_slice %186 {offsets = [0, 0], sizes = [2, 128], strides = [1, 1]} : vector<2x512xf32> to vector<2x128xf32>
    %188 = arith.negf %187 : vector<2x128xf32>
    %189 = math.exp %188 : vector<2x128xf32>
    %cst_54 = arith.constant 1.000000e+00 : f32
    %190 = vector.broadcast %cst_54 : f32 to vector<2x128xf32>
    %191 = arith.addf %190, %189 : vector<2x128xf32>
    %192 = arith.divf %190, %191 : vector<2x128xf32>
    %193 = vector.extract_strided_slice %186 {offsets = [0, 128], sizes = [2, 128], strides = [1, 1]} : vector<2x512xf32> to vector<2x128xf32>
    %194 = arith.negf %193 : vector<2x128xf32>
    %195 = math.exp %194 : vector<2x128xf32>
    %cst_55 = arith.constant 1.000000e+00 : f32
    %196 = vector.broadcast %cst_55 : f32 to vector<2x128xf32>
    %197 = arith.addf %196, %195 : vector<2x128xf32>
    %198 = arith.divf %196, %197 : vector<2x128xf32>
    %199 = vector.extract_strided_slice %186 {offsets = [0, 256], sizes = [2, 128], strides = [1, 1]} : vector<2x512xf32> to vector<2x128xf32>
    %200 = math.tanh %199 : vector<2x128xf32>
    %201 = vector.extract_strided_slice %186 {offsets = [0, 384], sizes = [2, 128], strides = [1, 1]} : vector<2x512xf32> to vector<2x128xf32>
    %202 = arith.negf %201 : vector<2x128xf32>
    %203 = math.exp %202 : vector<2x128xf32>
    %cst_56 = arith.constant 1.000000e+00 : f32
    %204 = vector.broadcast %cst_56 : f32 to vector<2x128xf32>
    %205 = arith.addf %204, %203 : vector<2x128xf32>
    %206 = arith.divf %204, %205 : vector<2x128xf32>
    %207 = arith.mulf %198, %174 : vector<2x128xf32>
    %208 = arith.mulf %192, %200 : vector<2x128xf32>
    %209 = arith.addf %207, %208 : vector<2x128xf32>
    %210 = math.tanh %209 : vector<2x128xf32>
    %211 = arith.mulf %206, %210 : vector<2x128xf32>
    %212 = arith.truncf %211 : vector<2x128xf32> to vector<2x128xbf16>
    %c0_57 = arith.constant 0 : index
    %c5_58 = arith.constant 5 : index
    %c0_59 = arith.constant 0 : index
    %213 = vector.load %arg4[%c0_57, %c5_58, %c0_59] : memref<2x8x128xbf16, #tpu.memory_space<vmem>>, vector<2x1x128xbf16>
    %214 = vector.shape_cast %213 : vector<2x1x128xbf16> to vector<2x128xbf16>
    %215 = vector.shape_cast %212 : vector<2x128xbf16> to vector<2x1x128xbf16>
    tpu.vector_store %arg4[%c0_57, %c5_58, %c0_59], %215 {strides = array<i32>} : memref<2x8x128xbf16, #tpu.memory_space<vmem>>, vector<2x1x128xbf16>,
    %c6 = arith.constant 6 : index
    %c0_60 = arith.constant 0 : index
    %c0_61 = arith.constant 0 : index
    %216 = vector.load %arg2[%c6, %c0_60, %c0_61] : memref<8x2x512xbf16, #tpu.memory_space<vmem>>, vector<1x2x512xbf16>
    %217 = vector.shape_cast %216 : vector<1x2x512xbf16> to vector<2x512xbf16>
    %218 = arith.truncf %211 : vector<2x128xf32> to vector<2x128xbf16>
    %cst_62 = arith.constant dense<0.000000e+00> : vector<2x512xf32>
    %219 = tpu.matmul %218, %3, %cst_62 {dimension_numbers = #tpu.dot_dimension_numbers<[1], [0], [0], [1], [0, 0, 1, 1], [], []>} : vector<2x128xbf16>, vector<128x512xbf16>, vector<2x512xf32> -> vector<2x512xf32>
    %220 = arith.extf %217 : vector<2x512xbf16> to vector<2x512xf32>
    %221 = arith.addf %220, %219 : vector<2x512xf32>
    %222 = vector.extract_strided_slice %221 {offsets = [0, 0], sizes = [2, 128], strides = [1, 1]} : vector<2x512xf32> to vector<2x128xf32>
    %223 = arith.negf %222 : vector<2x128xf32>
    %224 = math.exp %223 : vector<2x128xf32>
    %cst_63 = arith.constant 1.000000e+00 : f32
    %225 = vector.broadcast %cst_63 : f32 to vector<2x128xf32>
    %226 = arith.addf %225, %224 : vector<2x128xf32>
    %227 = arith.divf %225, %226 : vector<2x128xf32>
    %228 = vector.extract_strided_slice %221 {offsets = [0, 128], sizes = [2, 128], strides = [1, 1]} : vector<2x512xf32> to vector<2x128xf32>
    %229 = arith.negf %228 : vector<2x128xf32>
    %230 = math.exp %229 : vector<2x128xf32>
    %cst_64 = arith.constant 1.000000e+00 : f32
    %231 = vector.broadcast %cst_64 : f32 to vector<2x128xf32>
    %232 = arith.addf %231, %230 : vector<2x128xf32>
    %233 = arith.divf %231, %232 : vector<2x128xf32>
    %234 = vector.extract_strided_slice %221 {offsets = [0, 256], sizes = [2, 128], strides = [1, 1]} : vector<2x512xf32> to vector<2x128xf32>
    %235 = math.tanh %234 : vector<2x128xf32>
    %236 = vector.extract_strided_slice %221 {offsets = [0, 384], sizes = [2, 128], strides = [1, 1]} : vector<2x512xf32> to vector<2x128xf32>
    %237 = arith.negf %236 : vector<2x128xf32>
    %238 = math.exp %237 : vector<2x128xf32>
    %cst_65 = arith.constant 1.000000e+00 : f32
    %239 = vector.broadcast %cst_65 : f32 to vector<2x128xf32>
    %240 = arith.addf %239, %238 : vector<2x128xf32>
    %241 = arith.divf %239, %240 : vector<2x128xf32>
    %242 = arith.mulf %233, %209 : vector<2x128xf32>
    %243 = arith.mulf %227, %235 : vector<2x128xf32>
    %244 = arith.addf %242, %243 : vector<2x128xf32>
    %245 = math.tanh %244 : vector<2x128xf32>
    %246 = arith.mulf %241, %245 : vector<2x128xf32>
    %247 = arith.truncf %246 : vector<2x128xf32> to vector<2x128xbf16>
    %c0_66 = arith.constant 0 : index
    %c6_67 = arith.constant 6 : index
    %c0_68 = arith.constant 0 : index
    %248 = vector.load %arg4[%c0_66, %c6_67, %c0_68] : memref<2x8x128xbf16, #tpu.memory_space<vmem>>, vector<2x1x128xbf16>
    %249 = vector.shape_cast %248 : vector<2x1x128xbf16> to vector<2x128xbf16>
    %250 = vector.shape_cast %247 : vector<2x128xbf16> to vector<2x1x128xbf16>
    tpu.vector_store %arg4[%c0_66, %c6_67, %c0_68], %250 {strides = array<i32>} : memref<2x8x128xbf16, #tpu.memory_space<vmem>>, vector<2x1x128xbf16>,
    %c7 = arith.constant 7 : index
    %c0_69 = arith.constant 0 : index
    %c0_70 = arith.constant 0 : index
    %251 = vector.load %arg2[%c7, %c0_69, %c0_70] : memref<8x2x512xbf16, #tpu.memory_space<vmem>>, vector<1x2x512xbf16>
    %252 = vector.shape_cast %251 : vector<1x2x512xbf16> to vector<2x512xbf16>
    %253 = arith.truncf %246 : vector<2x128xf32> to vector<2x128xbf16>
    %cst_71 = arith.constant dense<0.000000e+00> : vector<2x512xf32>
    %254 = tpu.matmul %253, %3, %cst_71 {dimension_numbers = #tpu.dot_dimension_numbers<[1], [0], [0], [1], [0, 0, 1, 1], [], []>} : vector<2x128xbf16>, vector<128x512xbf16>, vector<2x512xf32> -> vector<2x512xf32>
    %255 = arith.extf %252 : vector<2x512xbf16> to vector<2x512xf32>
    %256 = arith.addf %255, %254 : vector<2x512xf32>
    %257 = vector.extract_strided_slice %256 {offsets = [0, 0], sizes = [2, 128], strides = [1, 1]} : vector<2x512xf32> to vector<2x128xf32>
    %258 = arith.negf %257 : vector<2x128xf32>
    %259 = math.exp %258 : vector<2x128xf32>
    %cst_72 = arith.constant 1.000000e+00 : f32
    %260 = vector.broadcast %cst_72 : f32 to vector<2x128xf32>
    %261 = arith.addf %260, %259 : vector<2x128xf32>
    %262 = arith.divf %260, %261 : vector<2x128xf32>
    %263 = vector.extract_strided_slice %256 {offsets = [0, 128], sizes = [2, 128], strides = [1, 1]} : vector<2x512xf32> to vector<2x128xf32>
    %264 = arith.negf %263 : vector<2x128xf32>
    %265 = math.exp %264 : vector<2x128xf32>
    %cst_73 = arith.constant 1.000000e+00 : f32
    %266 = vector.broadcast %cst_73 : f32 to vector<2x128xf32>
    %267 = arith.addf %266, %265 : vector<2x128xf32>
    %268 = arith.divf %266, %267 : vector<2x128xf32>
    %269 = vector.extract_strided_slice %256 {offsets = [0, 256], sizes = [2, 128], strides = [1, 1]} : vector<2x512xf32> to vector<2x128xf32>
    %270 = math.tanh %269 : vector<2x128xf32>
    %271 = vector.extract_strided_slice %256 {offsets = [0, 384], sizes = [2, 128], strides = [1, 1]} : vector<2x512xf32> to vector<2x128xf32>
    %272 = arith.negf %271 : vector<2x128xf32>
    %273 = math.exp %272 : vector<2x128xf32>
    %cst_74 = arith.constant 1.000000e+00 : f32
    %274 = vector.broadcast %cst_74 : f32 to vector<2x128xf32>
    %275 = arith.addf %274, %273 : vector<2x128xf32>
    %276 = arith.divf %274, %275 : vector<2x128xf32>
    %277 = arith.mulf %268, %244 : vector<2x128xf32>
    %278 = arith.mulf %262, %270 : vector<2x128xf32>
    %279 = arith.addf %277, %278 : vector<2x128xf32>
    %280 = math.tanh %279 : vector<2x128xf32>
    %281 = arith.mulf %276, %280 : vector<2x128xf32>
    %282 = arith.truncf %281 : vector<2x128xf32> to vector<2x128xbf16>
    %c0_75 = arith.constant 0 : index
    %c7_76 = arith.constant 7 : index
    %c0_77 = arith.constant 0 : index
    %283 = vector.load %arg4[%c0_75, %c7_76, %c0_77] : memref<2x8x128xbf16, #tpu.memory_space<vmem>>, vector<2x1x128xbf16>
    %284 = vector.shape_cast %283 : vector<2x1x128xbf16> to vector<2x128xbf16>
    %285 = vector.shape_cast %282 : vector<2x128xbf16> to vector<2x1x128xbf16>
    tpu.vector_store %arg4[%c0_75, %c7_76, %c0_77], %285 {strides = array<i32>} : memref<2x8x128xbf16, #tpu.memory_space<vmem>>, vector<2x1x128xbf16>,
    %c0_78 = arith.constant 0 : index
    %c0_79 = arith.constant 0 : index
    %286 = vector.load %arg5[%c0_78, %c0_79] : memref<2x128xf32, #tpu.memory_space<vmem>>, vector<2x128xf32>
    tpu.vector_store %arg5[%c0_78, %c0_79], %281 {strides = array<i32>} : memref<2x128xf32, #tpu.memory_space<vmem>>, vector<2x128xf32>,
    %c0_80 = arith.constant 0 : index
    %c0_81 = arith.constant 0 : index
    %287 = vector.load %arg6[%c0_80, %c0_81] : memref<2x128xf32, #tpu.memory_space<vmem>>, vector<2x128xf32>
    tpu.vector_store %arg6[%c0_80, %c0_81], %279 {strides = array<i32>} : memref<2x128xf32, #tpu.memory_space<vmem>>, vector<2x128xf32>,
    return
  }
  func.func @transform_0(%arg0: i32, %arg1: i32) -> (i32, i32, i32) {
    %c0_i32 = arith.constant 0 : i32
    %c0_i32_0 = arith.constant 0 : i32
    return %arg1, %arg0, %c0_i32 : i32, i32, i32
  }
  func.func @transform_1(%arg0: i32, %arg1: i32) -> (i32, i32) {
    %c0_i32 = arith.constant 0 : i32
    %c0_i32_0 = arith.constant 0 : i32
    %c0_i32_1 = arith.constant 0 : i32
    return %c0_i32, %c0_i32_0 : i32, i32
  }
  func.func @transform_2(%arg0: i32, %arg1: i32) -> (i32, i32, i32) {
    %c0_i32 = arith.constant 0 : i32
    %c0_i32_0 = arith.constant 0 : i32
    return %arg0, %arg1, %c0_i32 : i32, i32, i32
  }
}

module attributes {stable_mosaic.version = 11 : i64} {
  func.func @_lstm_recurrence_kernel(%arg0: i32, %arg1: i32, %arg2: memref<8x2x512xbf16, #tpu.memory_space<vmem>>, %arg3: memref<128x512xbf16, #tpu.memory_space<vmem>>, %arg4: memref<2x8x128xbf16, #tpu.memory_space<vmem>>, %arg5: memref<2x128xf32, #tpu.memory_space<vmem>>, %arg6: memref<2x128xf32, #tpu.memory_space<vmem>>) attributes {dimension_semantics = [#tpu.dimension_semantics<parallel>, #tpu.dimension_semantics<arbitrary>], iteration_bounds = array<i64: 1, 1>, scalar_prefetch = 0 : i64, scratch_operands = 2 : i64, tpu.core_type = #tpu.core_type<tc>, window_params = [{transform_indices = @transform_0, window_bounds = array<i64: 8, 2, 512>}, {pipeline_mode = #tpu.pipeline_mode<synchronous>, transform_indices = @transform_1, window_bounds = array<i64: 128, 512>}, {transform_indices = @transform_2, window_bounds = array<i64: 2, 8, 128>}]} {
    %c0_i32 = arith.constant 0 : i32
    %0 = arith.cmpi eq, %arg1, %c0_i32 : i32
    %1 = arith.extui %0 : i1 to i32
    %c0_i32_0 = arith.constant 0 : i32
    %2 = arith.cmpi ne, %1, %c0_i32_0 : i32
    scf.if %2 {
      %cst_82 = arith.constant 0.000000e+00 : f32
      %288 = vector.broadcast %cst_82 : f32 to vector<2x128xf32>
      %c0_83 = arith.constant 0 : index
      %c0_84 = arith.constant 0 : index
      %289 = vector.load %arg5[%c0_83, %c0_84] : memref<2x128xf32, #tpu.memory_space<vmem>>, vector<2x128xf32>
      tpu.vector_store %arg5[%c0_83, %c0_84], %288 {strides = array<i32>} : memref<2x128xf32, #tpu.memory_space<vmem>>, vector<2x128xf32>,
      %cst_85 = arith.constant 0.000000e+00 : f32
      %290 = vector.broadcast %cst_85 : f32 to vector<2x128xf32>
      %c0_86 = arith.constant 0 : index
      %c0_87 = arith.constant 0 : index
      %291 = vector.load %arg6[%c0_86, %c0_87] : memref<2x128xf32, #tpu.memory_space<vmem>>, vector<2x128xf32>
      tpu.vector_store %arg6[%c0_86, %c0_87], %290 {strides = array<i32>} : memref<2x128xf32, #tpu.memory_space<vmem>>, vector<2x128xf32>,
    } else {
    }
    %c0 = arith.constant 0 : index
    %c0_1 = arith.constant 0 : index
    %3 = vector.load %arg3[%c0, %c0_1] : memref<128x512xbf16, #tpu.memory_space<vmem>>, vector<128x512xbf16>
    %c0_2 = arith.constant 0 : index
    %c0_3 = arith.constant 0 : index
    %4 = vector.load %arg5[%c0_2, %c0_3] : memref<2x128xf32, #tpu.memory_space<vmem>>, vector<2x128xf32>
    %c0_4 = arith.constant 0 : index
    %c0_5 = arith.constant 0 : index
    %5 = vector.load %arg6[%c0_4, %c0_5] : memref<2x128xf32, #tpu.memory_space<vmem>>, vector<2x128xf32>
    %c0_6 = arith.constant 0 : index
    %c0_7 = arith.constant 0 : index
    %c0_8 = arith.constant 0 : index
    %6 = vector.load %arg2[%c0_6, %c0_7, %c0_8] : memref<8x2x512xbf16, #tpu.memory_space<vmem>>, vector<1x2x512xbf16>
    %7 = vector.shape_cast %6 : vector<1x2x512xbf16> to vector<2x512xbf16>
    %8 = arith.truncf %4 : vector<2x128xf32> to vector<2x128xbf16>
    %cst = arith.constant dense<0.000000e+00> : vector<2x512xf32>
    %9 = tpu.matmul %8, %3, %cst {dimension_numbers = #tpu.dot_dimension_numbers<[1], [0], [0], [1], [0, 0, 1, 1], [], []>} : vector<2x128xbf16>, vector<128x512xbf16>, vector<2x512xf32> -> vector<2x512xf32>
    %10 = arith.extf %7 : vector<2x512xbf16> to vector<2x512xf32>
    %11 = arith.addf %10, %9 : vector<2x512xf32>
    %12 = vector.extract_strided_slice %11 {offsets = [0, 0], sizes = [2, 128], strides = [1, 1]} : vector<2x512xf32> to vector<2x128xf32>
    %13 = arith.negf %12 : vector<2x128xf32>
    %14 = math.exp %13 : vector<2x128xf32>
    %cst_9 = arith.constant 1.000000e+00 : f32
    %15 = vector.broadcast %cst_9 : f32 to vector<2x128xf32>
    %16 = arith.addf %15, %14 : vector<2x128xf32>
    %17 = arith.divf %15, %16 : vector<2x128xf32>
    %18 = vector.extract_strided_slice %11 {offsets = [0, 128], sizes = [2, 128], strides = [1, 1]} : vector<2x512xf32> to vector<2x128xf32>
    %19 = arith.negf %18 : vector<2x128xf32>
    %20 = math.exp %19 : vector<2x128xf32>
    %cst_10 = arith.constant 1.000000e+00 : f32
    %21 = vector.broadcast %cst_10 : f32 to vector<2x128xf32>
    %22 = arith.addf %21, %20 : vector<2x128xf32>
    %23 = arith.divf %21, %22 : vector<2x128xf32>
    %24 = vector.extract_strided_slice %11 {offsets = [0, 256], sizes = [2, 128], strides = [1, 1]} : vector<2x512xf32> to vector<2x128xf32>
    %25 = math.tanh %24 : vector<2x128xf32>
    %26 = vector.extract_strided_slice %11 {offsets = [0, 384], sizes = [2, 128], strides = [1, 1]} : vector<2x512xf32> to vector<2x128xf32>
    %27 = arith.negf %26 : vector<2x128xf32>
    %28 = math.exp %27 : vector<2x128xf32>
    %cst_11 = arith.constant 1.000000e+00 : f32
    %29 = vector.broadcast %cst_11 : f32 to vector<2x128xf32>
    %30 = arith.addf %29, %28 : vector<2x128xf32>
    %31 = arith.divf %29, %30 : vector<2x128xf32>
    %32 = arith.mulf %23, %5 : vector<2x128xf32>
    %33 = arith.mulf %17, %25 : vector<2x128xf32>
    %34 = arith.addf %32, %33 : vector<2x128xf32>
    %35 = math.tanh %34 : vector<2x128xf32>
    %36 = arith.mulf %31, %35 : vector<2x128xf32>
    %37 = arith.truncf %36 : vector<2x128xf32> to vector<2x128xbf16>
    %c0_12 = arith.constant 0 : index
    %c0_13 = arith.constant 0 : index
    %c0_14 = arith.constant 0 : index
    %38 = vector.load %arg4[%c0_12, %c0_13, %c0_14] : memref<2x8x128xbf16, #tpu.memory_space<vmem>>, vector<2x1x128xbf16>
    %39 = vector.shape_cast %38 : vector<2x1x128xbf16> to vector<2x128xbf16>
    %40 = vector.shape_cast %37 : vector<2x128xbf16> to vector<2x1x128xbf16>
    tpu.vector_store %arg4[%c0_12, %c0_13, %c0_14], %40 {strides = array<i32>} : memref<2x8x128xbf16, #tpu.memory_space<vmem>>, vector<2x1x128xbf16>,
    %c1 = arith.constant 1 : index
    %c0_15 = arith.constant 0 : index
    %c0_16 = arith.constant 0 : index
    %41 = vector.load %arg2[%c1, %c0_15, %c0_16] : memref<8x2x512xbf16, #tpu.memory_space<vmem>>, vector<1x2x512xbf16>
    %42 = vector.shape_cast %41 : vector<1x2x512xbf16> to vector<2x512xbf16>
    %43 = arith.truncf %36 : vector<2x128xf32> to vector<2x128xbf16>
    %cst_17 = arith.constant dense<0.000000e+00> : vector<2x512xf32>
    %44 = tpu.matmul %43, %3, %cst_17 {dimension_numbers = #tpu.dot_dimension_numbers<[1], [0], [0], [1], [0, 0, 1, 1], [], []>} : vector<2x128xbf16>, vector<128x512xbf16>, vector<2x512xf32> -> vector<2x512xf32>
    %45 = arith.extf %42 : vector<2x512xbf16> to vector<2x512xf32>
    %46 = arith.addf %45, %44 : vector<2x512xf32>
    %47 = vector.extract_strided_slice %46 {offsets = [0, 0], sizes = [2, 128], strides = [1, 1]} : vector<2x512xf32> to vector<2x128xf32>
    %48 = arith.negf %47 : vector<2x128xf32>
    %49 = math.exp %48 : vector<2x128xf32>
    %cst_18 = arith.constant 1.000000e+00 : f32
    %50 = vector.broadcast %cst_18 : f32 to vector<2x128xf32>
    %51 = arith.addf %50, %49 : vector<2x128xf32>
    %52 = arith.divf %50, %51 : vector<2x128xf32>
    %53 = vector.extract_strided_slice %46 {offsets = [0, 128], sizes = [2, 128], strides = [1, 1]} : vector<2x512xf32> to vector<2x128xf32>
    %54 = arith.negf %53 : vector<2x128xf32>
    %55 = math.exp %54 : vector<2x128xf32>
    %cst_19 = arith.constant 1.000000e+00 : f32
    %56 = vector.broadcast %cst_19 : f32 to vector<2x128xf32>
    %57 = arith.addf %56, %55 : vector<2x128xf32>
    %58 = arith.divf %56, %57 : vector<2x128xf32>
    %59 = vector.extract_strided_slice %46 {offsets = [0, 256], sizes = [2, 128], strides = [1, 1]} : vector<2x512xf32> to vector<2x128xf32>
    %60 = math.tanh %59 : vector<2x128xf32>
    %61 = vector.extract_strided_slice %46 {offsets = [0, 384], sizes = [2, 128], strides = [1, 1]} : vector<2x512xf32> to vector<2x128xf32>
    %62 = arith.negf %61 : vector<2x128xf32>
    %63 = math.exp %62 : vector<2x128xf32>
    %cst_20 = arith.constant 1.000000e+00 : f32
    %64 = vector.broadcast %cst_20 : f32 to vector<2x128xf32>
    %65 = arith.addf %64, %63 : vector<2x128xf32>
    %66 = arith.divf %64, %65 : vector<2x128xf32>
    %67 = arith.mulf %58, %34 : vector<2x128xf32>
    %68 = arith.mulf %52, %60 : vector<2x128xf32>
    %69 = arith.addf %67, %68 : vector<2x128xf32>
    %70 = math.tanh %69 : vector<2x128xf32>
    %71 = arith.mulf %66, %70 : vector<2x128xf32>
    %72 = arith.truncf %71 : vector<2x128xf32> to vector<2x128xbf16>
    %c0_21 = arith.constant 0 : index
    %c1_22 = arith.constant 1 : index
    %c0_23 = arith.constant 0 : index
    %73 = vector.load %arg4[%c0_21, %c1_22, %c0_23] : memref<2x8x128xbf16, #tpu.memory_space<vmem>>, vector<2x1x128xbf16>
    %74 = vector.shape_cast %73 : vector<2x1x128xbf16> to vector<2x128xbf16>
    %75 = vector.shape_cast %72 : vector<2x128xbf16> to vector<2x1x128xbf16>
    tpu.vector_store %arg4[%c0_21, %c1_22, %c0_23], %75 {strides = array<i32>} : memref<2x8x128xbf16, #tpu.memory_space<vmem>>, vector<2x1x128xbf16>,
    %c2 = arith.constant 2 : index
    %c0_24 = arith.constant 0 : index
    %c0_25 = arith.constant 0 : index
    %76 = vector.load %arg2[%c2, %c0_24, %c0_25] : memref<8x2x512xbf16, #tpu.memory_space<vmem>>, vector<1x2x512xbf16>
    %77 = vector.shape_cast %76 : vector<1x2x512xbf16> to vector<2x512xbf16>
    %78 = arith.truncf %71 : vector<2x128xf32> to vector<2x128xbf16>
    %cst_26 = arith.constant dense<0.000000e+00> : vector<2x512xf32>
    %79 = tpu.matmul %78, %3, %cst_26 {dimension_numbers = #tpu.dot_dimension_numbers<[1], [0], [0], [1], [0, 0, 1, 1], [], []>} : vector<2x128xbf16>, vector<128x512xbf16>, vector<2x512xf32> -> vector<2x512xf32>
    %80 = arith.extf %77 : vector<2x512xbf16> to vector<2x512xf32>
    %81 = arith.addf %80, %79 : vector<2x512xf32>
    %82 = vector.extract_strided_slice %81 {offsets = [0, 0], sizes = [2, 128], strides = [1, 1]} : vector<2x512xf32> to vector<2x128xf32>
    %83 = arith.negf %82 : vector<2x128xf32>
    %84 = math.exp %83 : vector<2x128xf32>
    %cst_27 = arith.constant 1.000000e+00 : f32
    %85 = vector.broadcast %cst_27 : f32 to vector<2x128xf32>
    %86 = arith.addf %85, %84 : vector<2x128xf32>
    %87 = arith.divf %85, %86 : vector<2x128xf32>
    %88 = vector.extract_strided_slice %81 {offsets = [0, 128], sizes = [2, 128], strides = [1, 1]} : vector<2x512xf32> to vector<2x128xf32>
    %89 = arith.negf %88 : vector<2x128xf32>
    %90 = math.exp %89 : vector<2x128xf32>
    %cst_28 = arith.constant 1.000000e+00 : f32
    %91 = vector.broadcast %cst_28 : f32 to vector<2x128xf32>
    %92 = arith.addf %91, %90 : vector<2x128xf32>
    %93 = arith.divf %91, %92 : vector<2x128xf32>
    %94 = vector.extract_strided_slice %81 {offsets = [0, 256], sizes = [2, 128], strides = [1, 1]} : vector<2x512xf32> to vector<2x128xf32>
    %95 = math.tanh %94 : vector<2x128xf32>
    %96 = vector.extract_strided_slice %81 {offsets = [0, 384], sizes = [2, 128], strides = [1, 1]} : vector<2x512xf32> to vector<2x128xf32>
    %97 = arith.negf %96 : vector<2x128xf32>
    %98 = math.exp %97 : vector<2x128xf32>
    %cst_29 = arith.constant 1.000000e+00 : f32
    %99 = vector.broadcast %cst_29 : f32 to vector<2x128xf32>
    %100 = arith.addf %99, %98 : vector<2x128xf32>
    %101 = arith.divf %99, %100 : vector<2x128xf32>
    %102 = arith.mulf %93, %69 : vector<2x128xf32>
    %103 = arith.mulf %87, %95 : vector<2x128xf32>
    %104 = arith.addf %102, %103 : vector<2x128xf32>
    %105 = math.tanh %104 : vector<2x128xf32>
    %106 = arith.mulf %101, %105 : vector<2x128xf32>
    %107 = arith.truncf %106 : vector<2x128xf32> to vector<2x128xbf16>
    %c0_30 = arith.constant 0 : index
    %c2_31 = arith.constant 2 : index
    %c0_32 = arith.constant 0 : index
    %108 = vector.load %arg4[%c0_30, %c2_31, %c0_32] : memref<2x8x128xbf16, #tpu.memory_space<vmem>>, vector<2x1x128xbf16>
    %109 = vector.shape_cast %108 : vector<2x1x128xbf16> to vector<2x128xbf16>
    %110 = vector.shape_cast %107 : vector<2x128xbf16> to vector<2x1x128xbf16>
    tpu.vector_store %arg4[%c0_30, %c2_31, %c0_32], %110 {strides = array<i32>} : memref<2x8x128xbf16, #tpu.memory_space<vmem>>, vector<2x1x128xbf16>,
    %c3 = arith.constant 3 : index
    %c0_33 = arith.constant 0 : index
    %c0_34 = arith.constant 0 : index
    %111 = vector.load %arg2[%c3, %c0_33, %c0_34] : memref<8x2x512xbf16, #tpu.memory_space<vmem>>, vector<1x2x512xbf16>
    %112 = vector.shape_cast %111 : vector<1x2x512xbf16> to vector<2x512xbf16>
    %113 = arith.truncf %106 : vector<2x128xf32> to vector<2x128xbf16>
    %cst_35 = arith.constant dense<0.000000e+00> : vector<2x512xf32>
    %114 = tpu.matmul %113, %3, %cst_35 {dimension_numbers = #tpu.dot_dimension_numbers<[1], [0], [0], [1], [0, 0, 1, 1], [], []>} : vector<2x128xbf16>, vector<128x512xbf16>, vector<2x512xf32> -> vector<2x512xf32>
    %115 = arith.extf %112 : vector<2x512xbf16> to vector<2x512xf32>
    %116 = arith.addf %115, %114 : vector<2x512xf32>
    %117 = vector.extract_strided_slice %116 {offsets = [0, 0], sizes = [2, 128], strides = [1, 1]} : vector<2x512xf32> to vector<2x128xf32>
    %118 = arith.negf %117 : vector<2x128xf32>
    %119 = math.exp %118 : vector<2x128xf32>
    %cst_36 = arith.constant 1.000000e+00 : f32
    %120 = vector.broadcast %cst_36 : f32 to vector<2x128xf32>
    %121 = arith.addf %120, %119 : vector<2x128xf32>
    %122 = arith.divf %120, %121 : vector<2x128xf32>
    %123 = vector.extract_strided_slice %116 {offsets = [0, 128], sizes = [2, 128], strides = [1, 1]} : vector<2x512xf32> to vector<2x128xf32>
    %124 = arith.negf %123 : vector<2x128xf32>
    %125 = math.exp %124 : vector<2x128xf32>
    %cst_37 = arith.constant 1.000000e+00 : f32
    %126 = vector.broadcast %cst_37 : f32 to vector<2x128xf32>
    %127 = arith.addf %126, %125 : vector<2x128xf32>
    %128 = arith.divf %126, %127 : vector<2x128xf32>
    %129 = vector.extract_strided_slice %116 {offsets = [0, 256], sizes = [2, 128], strides = [1, 1]} : vector<2x512xf32> to vector<2x128xf32>
    %130 = math.tanh %129 : vector<2x128xf32>
    %131 = vector.extract_strided_slice %116 {offsets = [0, 384], sizes = [2, 128], strides = [1, 1]} : vector<2x512xf32> to vector<2x128xf32>
    %132 = arith.negf %131 : vector<2x128xf32>
    %133 = math.exp %132 : vector<2x128xf32>
    %cst_38 = arith.constant 1.000000e+00 : f32
    %134 = vector.broadcast %cst_38 : f32 to vector<2x128xf32>
    %135 = arith.addf %134, %133 : vector<2x128xf32>
    %136 = arith.divf %134, %135 : vector<2x128xf32>
    %137 = arith.mulf %128, %104 : vector<2x128xf32>
    %138 = arith.mulf %122, %130 : vector<2x128xf32>
    %139 = arith.addf %137, %138 : vector<2x128xf32>
    %140 = math.tanh %139 : vector<2x128xf32>
    %141 = arith.mulf %136, %140 : vector<2x128xf32>
    %142 = arith.truncf %141 : vector<2x128xf32> to vector<2x128xbf16>
    %c0_39 = arith.constant 0 : index
    %c3_40 = arith.constant 3 : index
    %c0_41 = arith.constant 0 : index
    %143 = vector.load %arg4[%c0_39, %c3_40, %c0_41] : memref<2x8x128xbf16, #tpu.memory_space<vmem>>, vector<2x1x128xbf16>
    %144 = vector.shape_cast %143 : vector<2x1x128xbf16> to vector<2x128xbf16>
    %145 = vector.shape_cast %142 : vector<2x128xbf16> to vector<2x1x128xbf16>
    tpu.vector_store %arg4[%c0_39, %c3_40, %c0_41], %145 {strides = array<i32>} : memref<2x8x128xbf16, #tpu.memory_space<vmem>>, vector<2x1x128xbf16>,
    %c4 = arith.constant 4 : index
    %c0_42 = arith.constant 0 : index
    %c0_43 = arith.constant 0 : index
    %146 = vector.load %arg2[%c4, %c0_42, %c0_43] : memref<8x2x512xbf16, #tpu.memory_space<vmem>>, vector<1x2x512xbf16>
    %147 = vector.shape_cast %146 : vector<1x2x512xbf16> to vector<2x512xbf16>
    %148 = arith.truncf %141 : vector<2x128xf32> to vector<2x128xbf16>
    %cst_44 = arith.constant dense<0.000000e+00> : vector<2x512xf32>
    %149 = tpu.matmul %148, %3, %cst_44 {dimension_numbers = #tpu.dot_dimension_numbers<[1], [0], [0], [1], [0, 0, 1, 1], [], []>} : vector<2x128xbf16>, vector<128x512xbf16>, vector<2x512xf32> -> vector<2x512xf32>
    %150 = arith.extf %147 : vector<2x512xbf16> to vector<2x512xf32>
    %151 = arith.addf %150, %149 : vector<2x512xf32>
    %152 = vector.extract_strided_slice %151 {offsets = [0, 0], sizes = [2, 128], strides = [1, 1]} : vector<2x512xf32> to vector<2x128xf32>
    %153 = arith.negf %152 : vector<2x128xf32>
    %154 = math.exp %153 : vector<2x128xf32>
    %cst_45 = arith.constant 1.000000e+00 : f32
    %155 = vector.broadcast %cst_45 : f32 to vector<2x128xf32>
    %156 = arith.addf %155, %154 : vector<2x128xf32>
    %157 = arith.divf %155, %156 : vector<2x128xf32>
    %158 = vector.extract_strided_slice %151 {offsets = [0, 128], sizes = [2, 128], strides = [1, 1]} : vector<2x512xf32> to vector<2x128xf32>
    %159 = arith.negf %158 : vector<2x128xf32>
    %160 = math.exp %159 : vector<2x128xf32>
    %cst_46 = arith.constant 1.000000e+00 : f32
    %161 = vector.broadcast %cst_46 : f32 to vector<2x128xf32>
    %162 = arith.addf %161, %160 : vector<2x128xf32>
    %163 = arith.divf %161, %162 : vector<2x128xf32>
    %164 = vector.extract_strided_slice %151 {offsets = [0, 256], sizes = [2, 128], strides = [1, 1]} : vector<2x512xf32> to vector<2x128xf32>
    %165 = math.tanh %164 : vector<2x128xf32>
    %166 = vector.extract_strided_slice %151 {offsets = [0, 384], sizes = [2, 128], strides = [1, 1]} : vector<2x512xf32> to vector<2x128xf32>
    %167 = arith.negf %166 : vector<2x128xf32>
    %168 = math.exp %167 : vector<2x128xf32>
    %cst_47 = arith.constant 1.000000e+00 : f32
    %169 = vector.broadcast %cst_47 : f32 to vector<2x128xf32>
    %170 = arith.addf %169, %168 : vector<2x128xf32>
    %171 = arith.divf %169, %170 : vector<2x128xf32>
    %172 = arith.mulf %163, %139 : vector<2x128xf32>
    %173 = arith.mulf %157, %165 : vector<2x128xf32>
    %174 = arith.addf %172, %173 : vector<2x128xf32>
    %175 = math.tanh %174 : vector<2x128xf32>
    %176 = arith.mulf %171, %175 : vector<2x128xf32>
    %177 = arith.truncf %176 : vector<2x128xf32> to vector<2x128xbf16>
    %c0_48 = arith.constant 0 : index
    %c4_49 = arith.constant 4 : index
    %c0_50 = arith.constant 0 : index
    %178 = vector.load %arg4[%c0_48, %c4_49, %c0_50] : memref<2x8x128xbf16, #tpu.memory_space<vmem>>, vector<2x1x128xbf16>
    %179 = vector.shape_cast %178 : vector<2x1x128xbf16> to vector<2x128xbf16>
    %180 = vector.shape_cast %177 : vector<2x128xbf16> to vector<2x1x128xbf16>
    tpu.vector_store %arg4[%c0_48, %c4_49, %c0_50], %180 {strides = array<i32>} : memref<2x8x128xbf16, #tpu.memory_space<vmem>>, vector<2x1x128xbf16>,
    %c5 = arith.constant 5 : index
    %c0_51 = arith.constant 0 : index
    %c0_52 = arith.constant 0 : index
    %181 = vector.load %arg2[%c5, %c0_51, %c0_52] : memref<8x2x512xbf16, #tpu.memory_space<vmem>>, vector<1x2x512xbf16>
    %182 = vector.shape_cast %181 : vector<1x2x512xbf16> to vector<2x512xbf16>
    %183 = arith.truncf %176 : vector<2x128xf32> to vector<2x128xbf16>
    %cst_53 = arith.constant dense<0.000000e+00> : vector<2x512xf32>
    %184 = tpu.matmul %183, %3, %cst_53 {dimension_numbers = #tpu.dot_dimension_numbers<[1], [0], [0], [1], [0, 0, 1, 1], [], []>} : vector<2x128xbf16>, vector<128x512xbf16>, vector<2x512xf32> -> vector<2x512xf32>
    %185 = arith.extf %182 : vector<2x512xbf16> to vector<2x512xf32>
    %186 = arith.addf %185, %184 : vector<2x512xf32>
    %187 = vector.extract_strided_slice %186 {offsets = [0, 0], sizes = [2, 128], strides = [1, 1]} : vector<2x512xf32> to vector<2x128xf32>
    %188 = arith.negf %187 : vector<2x128xf32>
    %189 = math.exp %188 : vector<2x128xf32>
    %cst_54 = arith.constant 1.000000e+00 : f32
    %190 = vector.broadcast %cst_54 : f32 to vector<2x128xf32>
    %191 = arith.addf %190, %189 : vector<2x128xf32>
    %192 = arith.divf %190, %191 : vector<2x128xf32>
    %193 = vector.extract_strided_slice %186 {offsets = [0, 128], sizes = [2, 128], strides = [1, 1]} : vector<2x512xf32> to vector<2x128xf32>
    %194 = arith.negf %193 : vector<2x128xf32>
    %195 = math.exp %194 : vector<2x128xf32>
    %cst_55 = arith.constant 1.000000e+00 : f32
    %196 = vector.broadcast %cst_55 : f32 to vector<2x128xf32>
    %197 = arith.addf %196, %195 : vector<2x128xf32>
    %198 = arith.divf %196, %197 : vector<2x128xf32>
    %199 = vector.extract_strided_slice %186 {offsets = [0, 256], sizes = [2, 128], strides = [1, 1]} : vector<2x512xf32> to vector<2x128xf32>
    %200 = math.tanh %199 : vector<2x128xf32>
    %201 = vector.extract_strided_slice %186 {offsets = [0, 384], sizes = [2, 128], strides = [1, 1]} : vector<2x512xf32> to vector<2x128xf32>
    %202 = arith.negf %201 : vector<2x128xf32>
    %203 = math.exp %202 : vector<2x128xf32>
    %cst_56 = arith.constant 1.000000e+00 : f32
    %204 = vector.broadcast %cst_56 : f32 to vector<2x128xf32>
    %205 = arith.addf %204, %203 : vector<2x128xf32>
    %206 = arith.divf %204, %205 : vector<2x128xf32>
    %207 = arith.mulf %198, %174 : vector<2x128xf32>
    %208 = arith.mulf %192, %200 : vector<2x128xf32>
    %209 = arith.addf %207, %208 : vector<2x128xf32>
    %210 = math.tanh %209 : vector<2x128xf32>
    %211 = arith.mulf %206, %210 : vector<2x128xf32>
    %212 = arith.truncf %211 : vector<2x128xf32> to vector<2x128xbf16>
    %c0_57 = arith.constant 0 : index
    %c5_58 = arith.constant 5 : index
    %c0_59 = arith.constant 0 : index
    %213 = vector.load %arg4[%c0_57, %c5_58, %c0_59] : memref<2x8x128xbf16, #tpu.memory_space<vmem>>, vector<2x1x128xbf16>
    %214 = vector.shape_cast %213 : vector<2x1x128xbf16> to vector<2x128xbf16>
    %215 = vector.shape_cast %212 : vector<2x128xbf16> to vector<2x1x128xbf16>
    tpu.vector_store %arg4[%c0_57, %c5_58, %c0_59], %215 {strides = array<i32>} : memref<2x8x128xbf16, #tpu.memory_space<vmem>>, vector<2x1x128xbf16>,
    %c6 = arith.constant 6 : index
    %c0_60 = arith.constant 0 : index
    %c0_61 = arith.constant 0 : index
    %216 = vector.load %arg2[%c6, %c0_60, %c0_61] : memref<8x2x512xbf16, #tpu.memory_space<vmem>>, vector<1x2x512xbf16>
    %217 = vector.shape_cast %216 : vector<1x2x512xbf16> to vector<2x512xbf16>
    %218 = arith.truncf %211 : vector<2x128xf32> to vector<2x128xbf16>
    %cst_62 = arith.constant dense<0.000000e+00> : vector<2x512xf32>
    %219 = tpu.matmul %218, %3, %cst_62 {dimension_numbers = #tpu.dot_dimension_numbers<[1], [0], [0], [1], [0, 0, 1, 1], [], []>} : vector<2x128xbf16>, vector<128x512xbf16>, vector<2x512xf32> -> vector<2x512xf32>
    %220 = arith.extf %217 : vector<2x512xbf16> to vector<2x512xf32>
    %221 = arith.addf %220, %219 : vector<2x512xf32>
    %222 = vector.extract_strided_slice %221 {offsets = [0, 0], sizes = [2, 128], strides = [1, 1]} : vector<2x512xf32> to vector<2x128xf32>
    %223 = arith.negf %222 : vector<2x128xf32>
    %224 = math.exp %223 : vector<2x128xf32>
    %cst_63 = arith.constant 1.000000e+00 : f32
    %225 = vector.broadcast %cst_63 : f32 to vector<2x128xf32>
    %226 = arith.addf %225, %224 : vector<2x128xf32>
    %227 = arith.divf %225, %226 : vector<2x128xf32>
    %228 = vector.extract_strided_slice %221 {offsets = [0, 128], sizes = [2, 128], strides = [1, 1]} : vector<2x512xf32> to vector<2x128xf32>
    %229 = arith.negf %228 : vector<2x128xf32>
    %230 = math.exp %229 : vector<2x128xf32>
    %cst_64 = arith.constant 1.000000e+00 : f32
    %231 = vector.broadcast %cst_64 : f32 to vector<2x128xf32>
    %232 = arith.addf %231, %230 : vector<2x128xf32>
    %233 = arith.divf %231, %232 : vector<2x128xf32>
    %234 = vector.extract_strided_slice %221 {offsets = [0, 256], sizes = [2, 128], strides = [1, 1]} : vector<2x512xf32> to vector<2x128xf32>
    %235 = math.tanh %234 : vector<2x128xf32>
    %236 = vector.extract_strided_slice %221 {offsets = [0, 384], sizes = [2, 128], strides = [1, 1]} : vector<2x512xf32> to vector<2x128xf32>
    %237 = arith.negf %236 : vector<2x128xf32>
    %238 = math.exp %237 : vector<2x128xf32>
    %cst_65 = arith.constant 1.000000e+00 : f32
    %239 = vector.broadcast %cst_65 : f32 to vector<2x128xf32>
    %240 = arith.addf %239, %238 : vector<2x128xf32>
    %241 = arith.divf %239, %240 : vector<2x128xf32>
    %242 = arith.mulf %233, %209 : vector<2x128xf32>
    %243 = arith.mulf %227, %235 : vector<2x128xf32>
    %244 = arith.addf %242, %243 : vector<2x128xf32>
    %245 = math.tanh %244 : vector<2x128xf32>
    %246 = arith.mulf %241, %245 : vector<2x128xf32>
    %247 = arith.truncf %246 : vector<2x128xf32> to vector<2x128xbf16>
    %c0_66 = arith.constant 0 : index
    %c6_67 = arith.constant 6 : index
    %c0_68 = arith.constant 0 : index
    %248 = vector.load %arg4[%c0_66, %c6_67, %c0_68] : memref<2x8x128xbf16, #tpu.memory_space<vmem>>, vector<2x1x128xbf16>
    %249 = vector.shape_cast %248 : vector<2x1x128xbf16> to vector<2x128xbf16>
    %250 = vector.shape_cast %247 : vector<2x128xbf16> to vector<2x1x128xbf16>
    tpu.vector_store %arg4[%c0_66, %c6_67, %c0_68], %250 {strides = array<i32>} : memref<2x8x128xbf16, #tpu.memory_space<vmem>>, vector<2x1x128xbf16>,
    %c7 = arith.constant 7 : index
    %c0_69 = arith.constant 0 : index
    %c0_70 = arith.constant 0 : index
    %251 = vector.load %arg2[%c7, %c0_69, %c0_70] : memref<8x2x512xbf16, #tpu.memory_space<vmem>>, vector<1x2x512xbf16>
    %252 = vector.shape_cast %251 : vector<1x2x512xbf16> to vector<2x512xbf16>
    %253 = arith.truncf %246 : vector<2x128xf32> to vector<2x128xbf16>
    %cst_71 = arith.constant dense<0.000000e+00> : vector<2x512xf32>
    %254 = tpu.matmul %253, %3, %cst_71 {dimension_numbers = #tpu.dot_dimension_numbers<[1], [0], [0], [1], [0, 0, 1, 1], [], []>} : vector<2x128xbf16>, vector<128x512xbf16>, vector<2x512xf32> -> vector<2x512xf32>
    %255 = arith.extf %252 : vector<2x512xbf16> to vector<2x512xf32>
    %256 = arith.addf %255, %254 : vector<2x512xf32>
    %257 = vector.extract_strided_slice %256 {offsets = [0, 0], sizes = [2, 128], strides = [1, 1]} : vector<2x512xf32> to vector<2x128xf32>
    %258 = arith.negf %257 : vector<2x128xf32>
    %259 = math.exp %258 : vector<2x128xf32>
    %cst_72 = arith.constant 1.000000e+00 : f32
    %260 = vector.broadcast %cst_72 : f32 to vector<2x128xf32>
    %261 = arith.addf %260, %259 : vector<2x128xf32>
    %262 = arith.divf %260, %261 : vector<2x128xf32>
    %263 = vector.extract_strided_slice %256 {offsets = [0, 128], sizes = [2, 128], strides = [1, 1]} : vector<2x512xf32> to vector<2x128xf32>
    %264 = arith.negf %263 : vector<2x128xf32>
    %265 = math.exp %264 : vector<2x128xf32>
    %cst_73 = arith.constant 1.000000e+00 : f32
    %266 = vector.broadcast %cst_73 : f32 to vector<2x128xf32>
    %267 = arith.addf %266, %265 : vector<2x128xf32>
    %268 = arith.divf %266, %267 : vector<2x128xf32>
    %269 = vector.extract_strided_slice %256 {offsets = [0, 256], sizes = [2, 128], strides = [1, 1]} : vector<2x512xf32> to vector<2x128xf32>
    %270 = math.tanh %269 : vector<2x128xf32>
    %271 = vector.extract_strided_slice %256 {offsets = [0, 384], sizes = [2, 128], strides = [1, 1]} : vector<2x512xf32> to vector<2x128xf32>
    %272 = arith.negf %271 : vector<2x128xf32>
    %273 = math.exp %272 : vector<2x128xf32>
    %cst_74 = arith.constant 1.000000e+00 : f32
    %274 = vector.broadcast %cst_74 : f32 to vector<2x128xf32>
    %275 = arith.addf %274, %273 : vector<2x128xf32>
    %276 = arith.divf %274, %275 : vector<2x128xf32>
    %277 = arith.mulf %268, %244 : vector<2x128xf32>
    %278 = arith.mulf %262, %270 : vector<2x128xf32>
    %279 = arith.addf %277, %278 : vector<2x128xf32>
    %280 = math.tanh %279 : vector<2x128xf32>
    %281 = arith.mulf %276, %280 : vector<2x128xf32>
    %282 = arith.truncf %281 : vector<2x128xf32> to vector<2x128xbf16>
    %c0_75 = arith.constant 0 : index
    %c7_76 = arith.constant 7 : index
    %c0_77 = arith.constant 0 : index
    %283 = vector.load %arg4[%c0_75, %c7_76, %c0_77] : memref<2x8x128xbf16, #tpu.memory_space<vmem>>, vector<2x1x128xbf16>
    %284 = vector.shape_cast %283 : vector<2x1x128xbf16> to vector<2x128xbf16>
    %285 = vector.shape_cast %282 : vector<2x128xbf16> to vector<2x1x128xbf16>
    tpu.vector_store %arg4[%c0_75, %c7_76, %c0_77], %285 {strides = array<i32>} : memref<2x8x128xbf16, #tpu.memory_space<vmem>>, vector<2x1x128xbf16>,
    %c0_78 = arith.constant 0 : index
    %c0_79 = arith.constant 0 : index
    %286 = vector.load %arg5[%c0_78, %c0_79] : memref<2x128xf32, #tpu.memory_space<vmem>>, vector<2x128xf32>
    tpu.vector_store %arg5[%c0_78, %c0_79], %281 {strides = array<i32>} : memref<2x128xf32, #tpu.memory_space<vmem>>, vector<2x128xf32>,
    %c0_80 = arith.constant 0 : index
    %c0_81 = arith.constant 0 : index
    %287 = vector.load %arg6[%c0_80, %c0_81] : memref<2x128xf32, #tpu.memory_space<vmem>>, vector<2x128xf32>
    tpu.vector_store %arg6[%c0_80, %c0_81], %279 {strides = array<i32>} : memref<2x128xf32, #tpu.memory_space<vmem>>, vector<2x128xf32>,
    return
  }
  func.func @transform_0(%arg0: i32, %arg1: i32) -> (i32, i32, i32) {
    %c0_i32 = arith.constant 0 : i32
    %c0_i32_0 = arith.constant 0 : i32
    return %arg1, %arg0, %c0_i32 : i32, i32, i32
  }
  func.func @transform_1(%arg0: i32, %arg1: i32) -> (i32, i32) {
    %c0_i32 = arith.constant 0 : i32
    %c0_i32_0 = arith.constant 0 : i32
    %c0_i32_1 = arith.constant 0 : i32
    return %c0_i32, %c0_i32_0 : i32, i32
  }
  func.func @transform_2(%arg0: i32, %arg1: i32) -> (i32, i32, i32) {
    %c0_i32 = arith.constant 0 : i32
    %c0_i32_0 = arith.constant 0 : i32
    return %arg0, %arg1, %c0_i32 : i32, i32, i32
  }
}

</mosaic_0001>

<bundles_post_ra>
// kernel: tpu_custom_call.1
= control target key start
LH: loop header
LB: loop body
LE: loop exit
PB: predicated region body
PF: predicated region fallthrough
CT: control target
= control target key end

     0   :  { %7 = vsyncpa [#allocation5], 0  ;;  %s2664_s0 = inlined_call_operand.hbm [shape: bf16[8,2,512], index: 0, kind: input, shape index: {}]   ;;  %s2665_s1 = inlined_call_operand.hbm [shape: bf16[128,512], index: 1, kind: input, shape index: {}]   ;;  %s2666_s2 = inlined_call_operand.hbm [shape: bf16[2,8,128], index: 2, kind: output, shape index: {}]  }
   0x1   :  { %8 = vsyncpa [#allocation8], 0 }
   0x2   :  { %9 = vsyncpa [#allocation6], 0  ;;  %s2085_s9 = smov [#allocation4]   ;;  %s2013_s13 = scalar_lea.hbm %s2664_s0, 512 }
   0x3   :  { %s15_s10 = sshll.u32 %s2085_s9, 4  ;;  %p2014_p0 = scmp.ne.s32.totalorder %s2664_s0, %s2013_s13  ;;  %s16_s10 = int_to_ptr.vmem [resolvable:$true] %s15_s10 }
   0x4   :  { %p2017_p1 = scmp.lt.u32.totalorder %s2013_s13, %s2664_s0 }
   0x6   :  { %p2019_p2 = pnand %p2017_p1, %p2014_p0 }
   0x8   :  { %2022 = shalt.err (!%p2019_p2)
}
   0x9   :  { %s2023_s18 = scalar_lea.vmem %s16_s10, 512  ;;  %p2028_p4 = scmp.lt.s32.totalorder %s16_s10, %s16_s10 }
   0xa   :  { %p2024_p3 = scmp.ne.s32.totalorder %s16_s10, %s2023_s18  ;;  %p2029_p5 = scmp.lt.s32.totalorder %s2023_s18, %s2023_s18 }
   0xc   :  { %p2030_p6 = por %p2029_p5, %p2028_p4 }
   0xe   :  { %p2031_p7 = pnand %p2030_p6, %p2024_p3 }
  0x10   :  { %2034 = shalt.err (!%p2031_p7)
}
  0x11   :  { %s2086_s19 = smov 64   ;;  %s2087_s20 = smov 4  }
  0x12   :  { %21 = dma.hbm_to_vmem [thread:$0]  %s2664_s0, 512, %s16_s10, [#allocation5], %s2086_s19, %s2086_s19, %s2087_s20  }
  0x13   :  { %s2088_s23 = smov [#allocation7]   ;;  %s2035_s27 = scalar_lea.hbm %s2665_s1, 4096 }
  0x14   :  { %s27_s24 = sshll.u32 %s2088_s23, 4  ;;  %p2036_p8 = scmp.ne.s32.totalorder %s2665_s1, %s2035_s27  ;;  %s28_s24 = int_to_ptr.vmem [resolvable:$true] %s27_s24 }
  0x15   :  { %p2039_p9 = scmp.lt.u32.totalorder %s2035_s27, %s2665_s1 }
  0x17   :  { %p2041_p10 = pnand %p2039_p9, %p2036_p8 }
  0x19   :  { %2044 = shalt.err (!%p2041_p10)
}
  0x1a   :  { %s2045_s4 = scalar_lea.vmem %s28_s24, 4096  ;;  %p2050_p12 = scmp.lt.s32.totalorder %s28_s24, %s28_s24 }
  0x1b   :  { %p2046_p11 = scmp.ne.s32.totalorder %s28_s24, %s2045_s4  ;;  %p2051_p13 = scmp.lt.s32.totalorder %s2045_s4, %s2045_s4 }
  0x1d   :  { %p2052_p0 = por %p2051_p13, %p2050_p12 }
  0x1f   :  { %p2053_p1 = pnand %p2052_p0, %p2046_p11 }
  0x21   :  { %2056 = shalt.err (!%p2053_p1)
}
  0x22   :  { %s2089_s0 = smov 256   ;;  %s2090_s5 = smov 16  }
  0x23   :  { %33 = dma.hbm_to_vmem [thread:$0]  %s2665_s1, 4096, %s28_s24, [#allocation8], %s2089_s0, %s2089_s0, %s2090_s5  }
  0x24   :  { %2079 = dma.done.wait [#allocation5], 512  }
  0x25   :  { %2080 = vsyncadd [#allocation5], 4294966784 }
  0x26   :  { %2081 = dma.done.wait [#allocation8], 4096  }
  0x27   :  { %2082 = vsyncadd [#allocation8], 4294963200  ;;  %v2091_v0 = vmov 0   ;;  %v2092_v1 = vmov 0.0   ;;  %v2141_v2 = vld [vmem:[#allocation7 + $0x4] ss:$16 sps:$4 sm:$0xff]   ;;  %v335_v38 = vlaneseq }
  0x28   :  { %275 = vmatprep.mubr.bf16.mxu0 %v2091_v0  ;;  %316 = vmatprep.mubr.bf16.mxu1 %v2091_v0  ;;  %45 = vst [vmem:[#allocation2] sm:$0x3] %v2092_v1  ;;  %46 = vst [vmem:[#allocation3] sm:$0x3] %v2092_v1  ;;  %v2143_v3 = vld [vmem:[#allocation7 + $0xc] ss:$16 sps:$4 sm:$0xff]  }
  0x29   :  { %243 = vmatprep.subr.bf16.mxu0 %v2141_v2  ;;  %v2146_v4 = vld [vmem:[#allocation7] ss:$16 sps:$4 sm:$0xff]   ;;  %v2148_v5 = vld [vmem:[#allocation7 + $0x8] ss:$16 sps:$4 sm:$0xff]   ;;  %284 = vmatprep.subr.bf16.mxu1 %v2143_v3  ;;  %v2151_v6 = vld [vmem:[#allocation7 + $0x24] ss:$16 sps:$4 sm:$0xff]  }
  0x2a   :  { %244 = vmatpush1.bf16.msra.mxu0 %v2146_v4  ;;  %285 = vmatpush1.bf16.msra.mxu1 %v2148_v5  ;;  %v2155_v7 = vld [vmem:[#allocation7 + $0x2c] ss:$16 sps:$4 sm:$0xff]   ;;  %v2157_v8 = vld [vmem:[#allocation7 + $0x20] ss:$16 sps:$4 sm:$0xff]   ;;  %v2160_v9 = vld [vmem:[#allocation7 + $0x28] ss:$16 sps:$4 sm:$0xff]  }
  0x2b   :  { %245 = vmatprep.subr.bf16.mxu0 %v2151_v6  ;;  %286 = vmatprep.subr.bf16.mxu1 %v2155_v7  ;;  %v2163_v10 = vld [vmem:[#allocation7 + $0x44] ss:$16 sps:$4 sm:$0xff]   ;;  %v2165_v11 = vld [vmem:[#allocation7 + $0x4c] ss:$16 sps:$4 sm:$0xff]   ;;  %v2167_v12 = vld [vmem:[#allocation7 + $0x40] ss:$16 sps:$4 sm:$0xff]  }
  0x2c   :  { %v2169_v13 = vld [vmem:[#allocation7 + $0x48] ss:$16 sps:$4 sm:$0xff]   ;;  %v2173_v14 = vld [vmem:[#allocation7 + $0x64] ss:$16 sps:$4 sm:$0xff]   ;;  %v2177_v15 = vld [vmem:[#allocation7 + $0x6c] ss:$16 sps:$4 sm:$0xff]  }
  0x2d   :  { %v2179_v16 = vld [vmem:[#allocation7 + $0x60] ss:$16 sps:$4 sm:$0xff]   ;;  %v2183_v17 = vld [vmem:[#allocation7 + $0x68] ss:$16 sps:$4 sm:$0xff]   ;;  %v2185_v18 = vld [vmem:[#allocation7 + $0x84] ss:$16 sps:$4 sm:$0xff]  }
  0x2e   :  { %246 = vmatpush1.bf16.msra.mxu0 %v2157_v8  ;;  %287 = vmatpush1.bf16.msra.mxu1 %v2160_v9  ;;  %v2189_v19 = vld [vmem:[#allocation7 + $0x8c] ss:$16 sps:$4 sm:$0xff]   ;;  %v2191_v20 = vld [vmem:[#allocation7 + $0x80] ss:$16 sps:$4 sm:$0xff]   ;;  %v2193_v21 = vld [vmem:[#allocation7 + $0x88] ss:$16 sps:$4 sm:$0xff]  }
  0x2f   :  { %247 = vmatprep.subr.bf16.mxu0 %v2163_v10  ;;  %288 = vmatprep.subr.bf16.mxu1 %v2165_v11  ;;  %v2197_v22 = vld [vmem:[#allocation7 + $0xa4] ss:$16 sps:$4 sm:$0xff]   ;;  %v2201_v23 = vld [vmem:[#allocation7 + $0xac] ss:$16 sps:$4 sm:$0xff]   ;;  %v2205_v24 = vld [vmem:[#allocation7 + $0xa0] ss:$16 sps:$4 sm:$0xff]  }
  0x30   :  { %v2207_v25 = vld [vmem:[#allocation7 + $0xa8] ss:$16 sps:$4 sm:$0xff]   ;;  %v2211_v26 = vld [vmem:[#allocation7 + $0xc4] ss:$16 sps:$4 sm:$0xff]   ;;  %v2213_v27 = vld [vmem:[#allocation7 + $0xcc] ss:$16 sps:$4 sm:$0xff]  }
  0x31   :  { %v2217_v28 = vld [vmem:[#allocation7 + $0xc0] ss:$16 sps:$4 sm:$0xff]   ;;  %v2219_v29 = vld [vmem:[#allocation7 + $0xc8] ss:$16 sps:$4 sm:$0xff]   ;;  %v2223_v30 = vld [vmem:[#allocation7 + $0xe4] ss:$16 sps:$4 sm:$0xff]  }
  0x32   :  { %248 = vmatpush1.bf16.msra.mxu0 %v2167_v12  ;;  %289 = vmatpush1.bf16.msra.mxu1 %v2169_v13  ;;  %v2225_v31 = vld [vmem:[#allocation7 + $0xec] ss:$16 sps:$4 sm:$0xff]   ;;  %v2229_v32 = vld [vmem:[#allocation7 + $0xe0] ss:$16 sps:$4 sm:$0xff]   ;;  %v2231_v33 = vld [vmem:[#allocation7 + $0xe8] ss:$16 sps:$4 sm:$0xff]  }
  0x33   :  { %249 = vmatprep.subr.bf16.mxu0 %v2173_v14  ;;  %290 = vmatprep.subr.bf16.mxu1 %v2177_v15  ;;  %v79_v34 = vld [vmem:[#allocation2] sm:$0x3]  ;;  %v2093_v36 = vmov 1983009808   ;;  %v336_v40 = vshrl.u32 %v335_v38, 7  ;;  %v2275_v45 = vld [vmem:[#allocation4] sm:$0xff]  }
  0x34   :  { %v82_v35 = vpack.c.bf16 %v79_v34, %v79_v34  ;;  %v333_v37 = vunpack.c.l.s4 %v2093_v36  ;;  %v325_v54 = vunpack.c.l.bf16 %v2275_v45  ;;  %vm416_vm0 = vcmask 1040384   ;;  %s2096_s1 = smov [#allocation9]  }
  0x35   :  { %vm417_vm1 = vsmask.f32 256  ;;  %vm600_vm3 = vsmask.f32 7938  ;;  %vm783_vm5 = vcmask 1041409   ;;  %vm1150_vm10 = vcmask 1042434  }
  0x36   :  { %250 = vmatpush1.bf16.msra.mxu0 %v2179_v16  ;;  %291 = vmatpush1.bf16.msra.mxu1 %v2183_v17  ;;  %v334_v39 = vunpack.c.0.s8 %v333_v37  ;;  %vm418_vm2 = vmand %vm416_vm0, %vm417_vm1  ;;  %vm784_vm6 = vsmask.f32 1280  ;;  %vm967_vm8 = vsmask.f32 7942  ;;  %vm1151_vm11 = vsmask.f32 2304 }
  0x37   :  { %251 = vmatprep.subr.bf16.mxu0 %v2185_v18  ;;  %292 = vmatprep.subr.bf16.mxu1 %v2189_v19  ;;  %vm601_vm4 = vmand %vm416_vm0, %vm600_vm3  ;;  %vm1334_vm13 = vsmask.f32 7946  ;;  %vm1517_vm15 = vcmask 1043459   ;;  %vm1518_vm0 = vsmask.f32 3328  ;;  %s1716_s8 = sshll.u32 %s2096_s1, 4  ;;  %s1717_s8 = int_to_ptr.vmem [resolvable:$true] %s1716_s8 }
  0x38   :  { %v2273_v43 = vsub.s32 %v334_v39, %v336_v40  ;;  %v80_v39 = vld [vmem:[#allocation3] sm:$0x3]  ;;  %vm785_vm7 = vmand %vm783_vm5, %vm784_vm6  ;;  %s2057_s9 = scalar_lea.vmem %s1717_s8, 128  ;;  %p2062_p3 = scmp.lt.s32.totalorder %s1717_s8, %s1717_s8 }
  0x39   :  { %vm968_vm9 = vmand %vm783_vm5, %vm967_vm8  ;;  %p2058_p2 = scmp.ne.s32.totalorder %s1717_s8, %s2057_s9  ;;  %p2063_p4 = scmp.lt.s32.totalorder %s2057_s9, %s2057_s9 }
  0x3a   :  { %252 = vmatpush1.bf16.msra.mxu0 %v2191_v20  ;;  %293 = vmatpush1.bf16.msra.mxu1 %v2193_v21  ;;  %vm2496_vm12 = vmand %vm1150_vm10, %vm1151_vm11 }
  0x3b   :  { %253 = vmatprep.subr.bf16.mxu0 %v2197_v22  ;;  %294 = vmatprep.subr.bf16.mxu1 %v2201_v23  ;;  %vm1335_vm14 = vmand %vm1150_vm10, %vm1334_vm13  ;;  %p2064_p5 = por %p2063_p4, %p2062_p3 }
  0x3c   :  { %vm1519_vm1 = vmand %vm1517_vm15, %vm1518_vm0 }
  0x3d   :  { %p2065_p6 = pnand %p2064_p5, %p2058_p2 }
  0x3e   :  { %254 = vmatpush1.bf16.msra.mxu0 %v2205_v24  ;;  %295 = vmatpush1.bf16.msra.mxu1 %v2207_v25 }
  0x3f   :  { %255 = vmatprep.subr.bf16.mxu0 %v2211_v26  ;;  %296 = vmatprep.subr.bf16.mxu1 %v2213_v27 }
  0x42   :  { %256 = vmatpush1.bf16.msra.mxu0 %v2217_v28  ;;  %297 = vmatpush1.bf16.msra.mxu1 %v2219_v29 }
  0x43   :  { %257 = vmatprep.subr.bf16.mxu0 %v2223_v30  ;;  %298 = vmatprep.subr.bf16.mxu1 %v2225_v31 }
  0x46   :  { %258 = vmatpush1.bf16.msra.mxu0 %v2229_v32  ;;  %299 = vmatpush1.bf16.msra.mxu1 %v2231_v33 }
  0x47   :  { %427 = vmatprep.subr.bf16.mxu0 %v2141_v2  ;;  %468 = vmatprep.subr.bf16.mxu1 %v2143_v3 }
  0x49   :  { %276 = vmatmul.mubr.bf16.vlgmr.msra.gmra.mrb[0].mxu0 %v82_v35  ;;  %317 = vmatmul.mubr.bf16.vlgmr.msra.gmra.mrb[0].mxu1 %v82_v35 }
  0x4a   :  { %428 = vmatpush1.bf16.msra.mxu0 %v2146_v4  ;;  %469 = vmatpush1.bf16.msra.mxu1 %v2148_v5 }
  0x4b   :  { %429 = vmatprep.subr.bf16.mxu0 %v2151_v6  ;;  %470 = vmatprep.subr.bf16.mxu1 %v2155_v7 }
  0x4c   :  { %459 = vmatprep.mubr.bf16.mxu0 %v2091_v0  ;;  %500 = vmatprep.mubr.bf16.mxu1 %v2091_v0 }
  0x4e   :  { %430 = vmatpush1.bf16.msra.mxu0 %v2157_v8  ;;  %471 = vmatpush1.bf16.msra.mxu1 %v2160_v9 }
  0x4f   :  { %431 = vmatprep.subr.bf16.mxu0 %v2163_v10  ;;  %472 = vmatprep.subr.bf16.mxu1 %v2165_v11 }
  0x52   :  { %432 = vmatpush1.bf16.msra.mxu0 %v2167_v12  ;;  %473 = vmatpush1.bf16.msra.mxu1 %v2169_v13 }
  0x53   :  { %433 = vmatprep.subr.bf16.mxu0 %v2173_v14  ;;  %474 = vmatprep.subr.bf16.mxu1 %v2177_v15 }
  0x56   :  { %434 = vmatpush1.bf16.msra.mxu0 %v2179_v16  ;;  %475 = vmatpush1.bf16.msra.mxu1 %v2183_v17 }
  0x57   :  { %435 = vmatprep.subr.bf16.mxu0 %v2185_v18  ;;  %476 = vmatprep.subr.bf16.mxu1 %v2189_v19 }
  0x5a   :  { %436 = vmatpush1.bf16.msra.mxu0 %v2191_v20  ;;  %477 = vmatpush1.bf16.msra.mxu1 %v2193_v21 }
  0x5b   :  { %437 = vmatprep.subr.bf16.mxu0 %v2197_v22  ;;  %478 = vmatprep.subr.bf16.mxu1 %v2201_v23 }
  0x5e   :  { %438 = vmatpush1.bf16.msra.mxu0 %v2205_v24  ;;  %479 = vmatpush1.bf16.msra.mxu1 %v2207_v25 }
  0x5f   :  { %439 = vmatprep.subr.bf16.mxu0 %v2211_v26  ;;  %480 = vmatprep.subr.bf16.mxu1 %v2213_v27 }
  0x62   :  { %440 = vmatpush1.bf16.msra.mxu0 %v2217_v28  ;;  %481 = vmatpush1.bf16.msra.mxu1 %v2219_v29 }
  0x63   :  { %441 = vmatprep.subr.bf16.mxu0 %v2223_v30  ;;  %482 = vmatprep.subr.bf16.mxu1 %v2225_v31 }
  0x66   :  { %442 = vmatpush1.bf16.msra.mxu0 %v2229_v32  ;;  %483 = vmatpush1.bf16.msra.mxu1 %v2231_v33 }
  0x67   :  { %610 = vmatprep.subr.bf16.mxu0 %v2141_v2  ;;  %651 = vmatprep.subr.bf16.mxu1 %v2143_v3 }
 0x11c   :  { %v277_v41 = vpop.f32.mrb[0].mxu0  ;;  %v318_v42 = vpop.f32.mrb[0].mxu1 }
 0x11d   :  { %v279_v44 = vpop.f32.mrb[1].mxu0  ;;  %v320_v46 = vpop.f32.mrb[1].mxu1 }
 0x11e   :  { %v330_v47 = vcombine.low %v277_v41, %v279_v44  ;;  %v331_v48 = vcombine.low %v318_v42, %v320_v46  ;;  %v281_v49 = vpop.f32.mrb[2].mxu0  ;;  %v322_v50 = vpop.f32.mrb[2].mxu1 }
 0x11f   :  { %v282_v51 = vpop.f32.mrb[3].mxu0  ;;  %v323_v52 = vpop.f32.mrb[3].mxu1  ;;  %v2094_v49 = vmov 1966171168  }
 0x120   :  { %v338_v53 = vrot.slane %v330_v47, %v2273_v43  ;;  %v345_v55 = vrot.slane %v331_v48, %v2273_v43  ;;  %v383_v50 = vunpack.c.l.s4 %v2094_v49 }
 0x122   :  { %v346_v56 = vcombine.low %v338_v53, %v345_v55  ;;  %v384_v51 = vunpack.c.0.s8 %v383_v50  ;;  %v2095_v53 = vmov 286326784  }
 0x124   :  { %v348_v57 = vadd.f32 %v346_v56, %v325_v54  ;;  %v401_v54 = vunpack.c.l.s4 %v2095_v53  ;;  %v2283_v56 = vsub.s32 %v384_v51, %v336_v40 }
 0x126   :  { %v1761_v58 = vmul.f32 -1.442695, %v348_v57  ;;  %v356_v59 = vrot.slane %v348_v57, 2  ;;  %v367_v61 = vrot.slane %v348_v57, 6  ;;  %v364_v1 = vrot.slane %v348_v57, 4 }
 0x128   :  { %1853 = vpow2.f32 %v1761_v58  ;;  %v1762_v60 = vmul.f32 -1.442695, %v356_v59  ;;  %v1763_v62 = vmul.f32 -1.442695, %v367_v61  ;;  %v402_v58 = vunpack.c.0.s8 %v401_v54 }
 0x12a   :  { %1855 = vpow2.f32 %v1762_v60  ;;  %v2288_v61 = vsub.s32 %v402_v58, %v336_v40 }
 0x12b   :  { %1857 = vpow2.f32 %v1763_v62 }
 0x132   :  { %v1854_v63 = vpop.eup %1853 }
 0x133   :  { %v352_v34 = vadd.f32 1.0, %v1854_v63 }
 0x134   :  { %v1856_v35 = vpop.eup %1855 }
 0x135   :  { %1859 = vrcp.f32 %v352_v34  ;;  %v361_v36 = vadd.f32 1.0, %v1856_v35  ;;  %v1858_v37 = vpop.eup %1857  ;;  %v419_v34 = vld [vmem:[#allocation9] sm:$0x1] }
 0x136   :  { %1861 = vtanh.f32 %v364_v1  ;;  %v372_v44 = vadd.f32 1.0, %v1858_v37 }
 0x137   :  { %1863 = vrcp.f32 %v361_v36  ;;  %v422_v36 = vld [vmem:[#allocation9 + $0x4] sm:$0x1] }
 0x138   :  { %1865 = vrcp.f32 %v372_v44 }
 0x13f   :  { %v1860_v38 = vpop.eup %1859 }
 0x140   :  { %v1862_v41 = vpop.eup %1861 }
 0x141   :  { %v1864_v42 = vpop.eup %1863  ;;  %v376_v47 = vmul.f32 %v1862_v41, %v1860_v38 }
 0x142   :  { %v375_v46 = vmul.f32 %v1864_v42, %v80_v39  ;;  %v1866_v52 = vpop.eup %1865 }
 0x144   :  { %v2280_v48 = vadd.f32 %v376_v47, %v375_v46 }
 0x146   :  { %1867 = vtanh.f32 %v2280_v48 }
 0x150   :  { %v1868_v55 = vpop.eup %1867 }
 0x151   :  { %v379_v57 = vmul.f32 %v1868_v55, %v1866_v52  ;;  %v509_v55 = vunpack.c.h.bf16 %v2275_v45 }
 0x153   :  { %v380_v59 = vpack.c.bf16 %v379_v57, %v379_v57 }
 0x155   :  { %v388_v60 = vrot.slane %v380_v59, %v2283_v56  ;;  %460 = vmatmul.mubr.bf16.vlgmr.msra.gmra.mrb[4].mxu0 %v380_v59  ;;  %501 = vmatmul.mubr.bf16.vlgmr.msra.gmra.mrb[4].mxu1 %v380_v59 }
 0x156   :  { %611 = vmatpush1.bf16.msra.mxu0 %v2146_v4  ;;  %652 = vmatpush1.bf16.msra.mxu1 %v2148_v5 }
 0x157   :  { %v395_v62 = vrot.slane %v388_v60, %v2283_v56  ;;  %612 = vmatprep.subr.bf16.mxu0 %v2151_v6  ;;  %653 = vmatprep.subr.bf16.mxu1 %v2155_v7 }
 0x158   :  { %642 = vmatprep.mubr.bf16.mxu0 %v2091_v0  ;;  %683 = vmatprep.mubr.bf16.mxu1 %v2091_v0 }
 0x159   :  { %v397_v63 = vunpack.i.h.s16 %v395_v62  ;;  %v1764_v1 = vpack.i.b16 %v395_v62, %v395_v62 }
 0x15a   :  { %613 = vmatpush1.bf16.msra.mxu0 %v2157_v8  ;;  %654 = vmatpush1.bf16.msra.mxu1 %v2160_v9 }
 0x15b   :  { %v399_v40 = vpack.i.b16 %v397_v63, %v397_v63  ;;  %v406_v35 = vrot.slane %v1764_v1, %v2288_v61  ;;  %614 = vmatprep.subr.bf16.mxu0 %v2163_v10  ;;  %655 = vmatprep.subr.bf16.mxu1 %v2165_v11 }
 0x15d   :  { %v413_v37 = vrot.slane %v399_v40, %v2288_v61  ;;  %v420_v38 = vsel %vm418_vm2, %v406_v35, %v419_v34 }
 0x15e   :  { %421 = vst [vmem:[#allocation9] sm:$0x1] %v420_v38  ;;  %615 = vmatpush1.bf16.msra.mxu0 %v2167_v12  ;;  %656 = vmatpush1.bf16.msra.mxu1 %v2169_v13 }
 0x15f   :  { %v423_v39 = vsel %vm418_vm2, %v413_v37, %v422_v36  ;;  %616 = vmatprep.subr.bf16.mxu0 %v2173_v14  ;;  %657 = vmatprep.subr.bf16.mxu1 %v2177_v15  ;;  %vm1701_vm2 = vsmask.f32 7950 }
 0x160   :  { %424 = vst [vmem:[#allocation9 + $0x4] sm:$0x1] %v423_v39  ;;  %vm1702_vm3 = vmand %vm1517_vm15, %vm1701_vm2 }
 0x162   :  { %617 = vmatpush1.bf16.msra.mxu0 %v2179_v16  ;;  %658 = vmatpush1.bf16.msra.mxu1 %v2183_v17 }
 0x163   :  { %618 = vmatprep.subr.bf16.mxu0 %v2185_v18  ;;  %659 = vmatprep.subr.bf16.mxu1 %v2189_v19 }
 0x166   :  { %619 = vmatpush1.bf16.msra.mxu0 %v2191_v20  ;;  %660 = vmatpush1.bf16.msra.mxu1 %v2193_v21 }
 0x167   :  { %620 = vmatprep.subr.bf16.mxu0 %v2197_v22  ;;  %661 = vmatprep.subr.bf16.mxu1 %v2201_v23 }
 0x16a   :  { %621 = vmatpush1.bf16.msra.mxu0 %v2205_v24  ;;  %662 = vmatpush1.bf16.msra.mxu1 %v2207_v25 }
 0x16b   :  { %622 = vmatprep.subr.bf16.mxu0 %v2211_v26  ;;  %663 = vmatprep.subr.bf16.mxu1 %v2213_v27 }
 0x16e   :  { %623 = vmatpush1.bf16.msra.mxu0 %v2217_v28  ;;  %664 = vmatpush1.bf16.msra.mxu1 %v2219_v29 }
 0x16f   :  { %624 = vmatprep.subr.bf16.mxu0 %v2223_v30  ;;  %665 = vmatprep.subr.bf16.mxu1 %v2225_v31 }
 0x172   :  { %625 = vmatpush1.bf16.msra.mxu0 %v2229_v32  ;;  %666 = vmatpush1.bf16.msra.mxu1 %v2231_v33 }
 0x173   :  { %794 = vmatprep.subr.bf16.mxu0 %v2141_v2  ;;  %835 = vmatprep.subr.bf16.mxu1 %v2143_v3 }
 0x228   :  { %v461_v41 = vpop.f32.mrb[4].mxu0  ;;  %v502_v42 = vpop.f32.mrb[4].mxu1 }
 0x229   :  { %v463_v44 = vpop.f32.mrb[5].mxu0  ;;  %v504_v46 = vpop.f32.mrb[5].mxu1 }
 0x22a   :  { %v514_v47 = vcombine.low %v461_v41, %v463_v44  ;;  %v515_v49 = vcombine.low %v502_v42, %v504_v46  ;;  %v465_v50 = vpop.f32.mrb[6].mxu0  ;;  %v506_v51 = vpop.f32.mrb[6].mxu1 }
 0x22b   :  { %v466_v52 = vpop.f32.mrb[7].mxu0  ;;  %v507_v53 = vpop.f32.mrb[7].mxu1 }
 0x22c   :  { %v522_v54 = vrot.slane %v514_v47, %v2273_v43  ;;  %v529_v57 = vrot.slane %v515_v49, %v2273_v43 }
 0x22e   :  { %v530_v58 = vcombine.low %v522_v54, %v529_v57 }
 0x230   :  { %v532_v59 = vadd.f32 %v530_v58, %v509_v55 }
 0x232   :  { %v1765_v60 = vmul.f32 -1.442695, %v532_v59  ;;  %v540_v62 = vrot.slane %v532_v59, 2  ;;  %v551_v1 = vrot.slane %v532_v59, 6  ;;  %v548_v35 = vrot.slane %v532_v59, 4 }
 0x234   :  { %1869 = vpow2.f32 %v1765_v60  ;;  %v1766_v63 = vmul.f32 -1.442695, %v540_v62  ;;  %v1767_v34 = vmul.f32 -1.442695, %v551_v1  ;;  %v602_v60 = vld [vmem:[#allocation9] sm:$0x1] }
 0x235   :  { %v605_v1 = vld [vmem:[#allocation9 + $0x4] sm:$0x1] }
 0x236   :  { %1871 = vpow2.f32 %v1766_v63 }
 0x237   :  { %1873 = vpow2.f32 %v1767_v34 }
 0x23e   :  { %v1870_v40 = vpop.eup %1869 }
 0x23f   :  { %v536_v36 = vadd.f32 1.0, %v1870_v40 }
 0x240   :  { %v1872_v37 = vpop.eup %1871 }
 0x241   :  { %1875 = vrcp.f32 %v536_v36  ;;  %v545_v38 = vadd.f32 1.0, %v1872_v37  ;;  %v1874_v45 = vpop.eup %1873  ;;  %v2372_v37 = vld [vmem:[#allocation4 + $0x8] sm:$0xff]  }
 0x242   :  { %1877 = vtanh.f32 %v548_v35  ;;  %v556_v44 = vadd.f32 1.0, %v1874_v45 }
 0x243   :  { %1879 = vrcp.f32 %v545_v38 }
 0x244   :  { %1881 = vrcp.f32 %v556_v44 }
 0x24b   :  { %v1876_v39 = vpop.eup %1875 }
 0x24c   :  { %v1878_v41 = vpop.eup %1877 }
 0x24d   :  { %v1880_v42 = vpop.eup %1879  ;;  %v560_v47 = vmul.f32 %v1878_v41, %v1876_v39 }
 0x24e   :  { %v559_v46 = vmul.f32 %v1880_v42, %v2280_v48  ;;  %v1882_v50 = vpop.eup %1881 }
 0x250   :  { %v2330_v49 = vadd.f32 %v560_v47, %v559_v46 }
 0x252   :  { %1883 = vtanh.f32 %v2330_v49 }
 0x25c   :  { %v1884_v51 = vpop.eup %1883 }
 0x25d   :  { %v563_v52 = vmul.f32 %v1884_v51, %v1882_v50  ;;  %v692_v50 = vunpack.c.l.bf16 %v2372_v37 }
 0x25f   :  { %v564_v53 = vpack.c.bf16 %v563_v52, %v563_v52 }
 0x261   :  { %v572_v54 = vrot.slane %v564_v53, %v2283_v56  ;;  %643 = vmatmul.mubr.bf16.vlgmr.msra.gmra.mrb[8].mxu0 %v564_v53  ;;  %684 = vmatmul.mubr.bf16.vlgmr.msra.gmra.mrb[8].mxu1 %v564_v53 }
 0x262   :  { %795 = vmatpush1.bf16.msra.mxu0 %v2146_v4  ;;  %836 = vmatpush1.bf16.msra.mxu1 %v2148_v5 }
 0x263   :  { %v579_v48 = vrot.slane %v572_v54, %v2283_v56  ;;  %796 = vmatprep.subr.bf16.mxu0 %v2151_v6  ;;  %837 = vmatprep.subr.bf16.mxu1 %v2155_v7 }
 0x264   :  { %826 = vmatprep.mubr.bf16.mxu0 %v2091_v0  ;;  %867 = vmatprep.mubr.bf16.mxu1 %v2091_v0 }
 0x265   :  { %v581_v55 = vunpack.i.h.s16 %v579_v48  ;;  %v1768_v57 = vpack.i.b16 %v579_v48, %v579_v48 }
 0x266   :  { %797 = vmatpush1.bf16.msra.mxu0 %v2157_v8  ;;  %838 = vmatpush1.bf16.msra.mxu1 %v2160_v9 }
 0x267   :  { %v583_v58 = vpack.i.b16 %v581_v55, %v581_v55  ;;  %v590_v59 = vrot.slane %v1768_v57, %v2288_v61  ;;  %798 = vmatprep.subr.bf16.mxu0 %v2163_v10  ;;  %839 = vmatprep.subr.bf16.mxu1 %v2165_v11 }
 0x269   :  { %v597_v62 = vrot.slane %v583_v58, %v2288_v61  ;;  %v603_v63 = vsel %vm601_vm4, %v590_v59, %v602_v60 }
 0x26a   :  { %604 = vst [vmem:[#allocation9] sm:$0x1] %v603_v63  ;;  %799 = vmatpush1.bf16.msra.mxu0 %v2167_v12  ;;  %840 = vmatpush1.bf16.msra.mxu1 %v2169_v13 }
 0x26b   :  { %v606_v34 = vsel %vm601_vm4, %v597_v62, %v605_v1  ;;  %800 = vmatprep.subr.bf16.mxu0 %v2173_v14  ;;  %841 = vmatprep.subr.bf16.mxu1 %v2177_v15 }
 0x26c   :  { %607 = vst [vmem:[#allocation9 + $0x4] sm:$0x1] %v606_v34 }
 0x26e   :  { %801 = vmatpush1.bf16.msra.mxu0 %v2179_v16  ;;  %842 = vmatpush1.bf16.msra.mxu1 %v2183_v17 }
 0x26f   :  { %802 = vmatprep.subr.bf16.mxu0 %v2185_v18  ;;  %843 = vmatprep.subr.bf16.mxu1 %v2189_v19 }
 0x272   :  { %803 = vmatpush1.bf16.msra.mxu0 %v2191_v20  ;;  %844 = vmatpush1.bf16.msra.mxu1 %v2193_v21 }
 0x273   :  { %804 = vmatprep.subr.bf16.mxu0 %v2197_v22  ;;  %845 = vmatprep.subr.bf16.mxu1 %v2201_v23 }
 0x276   :  { %805 = vmatpush1.bf16.msra.mxu0 %v2205_v24  ;;  %846 = vmatpush1.bf16.msra.mxu1 %v2207_v25 }
 0x277   :  { %806 = vmatprep.subr.bf16.mxu0 %v2211_v26  ;;  %847 = vmatprep.subr.bf16.mxu1 %v2213_v27 }
 0x27a   :  { %807 = vmatpush1.bf16.msra.mxu0 %v2217_v28  ;;  %848 = vmatpush1.bf16.msra.mxu1 %v2219_v29 }
 0x27b   :  { %808 = vmatprep.subr.bf16.mxu0 %v2223_v30  ;;  %849 = vmatprep.subr.bf16.mxu1 %v2225_v31 }
 0x27e   :  { %809 = vmatpush1.bf16.msra.mxu0 %v2229_v32  ;;  %850 = vmatpush1.bf16.msra.mxu1 %v2231_v33 }
 0x27f   :  { %977 = vmatprep.subr.bf16.mxu0 %v2141_v2  ;;  %1018 = vmatprep.subr.bf16.mxu1 %v2143_v3 }
 0x334   :  { %v644_v40 = vpop.f32.mrb[8].mxu0  ;;  %v685_v35 = vpop.f32.mrb[8].mxu1 }
 0x335   :  { %v646_v36 = vpop.f32.mrb[9].mxu0  ;;  %v687_v38 = vpop.f32.mrb[9].mxu1 }
 0x336   :  { %v697_v45 = vcombine.low %v644_v40, %v646_v36  ;;  %v698_v39 = vcombine.low %v685_v35, %v687_v38  ;;  %v648_v41 = vpop.f32.mrb[10].mxu0  ;;  %v689_v42 = vpop.f32.mrb[10].mxu1 }
 0x337   :  { %v649_v44 = vpop.f32.mrb[11].mxu0  ;;  %v690_v46 = vpop.f32.mrb[11].mxu1 }
 0x338   :  { %v705_v47 = vrot.slane %v697_v45, %v2273_v43  ;;  %v712_v51 = vrot.slane %v698_v39, %v2273_v43 }
 0x33a   :  { %v713_v52 = vcombine.low %v705_v47, %v712_v51 }
 0x33c   :  { %v715_v53 = vadd.f32 %v713_v52, %v692_v50 }
 0x33e   :  { %v1769_v54 = vmul.f32 -1.442695, %v715_v53  ;;  %v723_v48 = vrot.slane %v715_v53, 2  ;;  %v734_v57 = vrot.slane %v715_v53, 6  ;;  %v731_v60 = vrot.slane %v715_v53, 4 }
 0x33f   :  { %v786_v53 = vld [vmem:[#allocation9] sm:$0x2] }
 0x340   :  { %1885 = vpow2.f32 %v1769_v54  ;;  %v1770_v55 = vmul.f32 -1.442695, %v723_v48  ;;  %v1771_v58 = vmul.f32 -1.442695, %v734_v57 }
 0x342   :  { %1887 = vpow2.f32 %v1770_v55  ;;  %v789_v55 = vld [vmem:[#allocation9 + $0x4] sm:$0x2] }
 0x343   :  { %1889 = vpow2.f32 %v1771_v58 }
 0x34a   :  { %v1886_v59 = vpop.eup %1885 }
 0x34b   :  { %v719_v62 = vadd.f32 1.0, %v1886_v59 }
 0x34c   :  { %v1888_v63 = vpop.eup %1887 }
 0x34d   :  { %1891 = vrcp.f32 %v719_v62  ;;  %v728_v1 = vadd.f32 1.0, %v1888_v63  ;;  %v1890_v34 = vpop.eup %1889 }
 0x34e   :  { %1893 = vtanh.f32 %v731_v60  ;;  %v739_v38 = vadd.f32 1.0, %v1890_v34 }
 0x34f   :  { %1895 = vrcp.f32 %v728_v1 }
 0x350   :  { %1897 = vrcp.f32 %v739_v38 }
 0x357   :  { %v1892_v40 = vpop.eup %1891 }
 0x358   :  { %v1894_v35 = vpop.eup %1893 }
 0x359   :  { %v1896_v36 = vpop.eup %1895  ;;  %v743_v39 = vmul.f32 %v1894_v35, %v1892_v40 }
 0x35a   :  { %v742_v45 = vmul.f32 %v1896_v36, %v2330_v49  ;;  %v1898_v42 = vpop.eup %1897 }
 0x35c   :  { %v2378_v41 = vadd.f32 %v743_v39, %v742_v45 }
 0x35e   :  { %1899 = vtanh.f32 %v2378_v41 }
 0x368   :  { %v1900_v44 = vpop.eup %1899 }
 0x369   :  { %v746_v46 = vmul.f32 %v1900_v44, %v1898_v42  ;;  %v876_v42 = vunpack.c.h.bf16 %v2372_v37 }
 0x36b   :  { %v747_v47 = vpack.c.bf16 %v746_v46, %v746_v46 }
 0x36d   :  { %v755_v50 = vrot.slane %v747_v47, %v2283_v56  ;;  %827 = vmatmul.mubr.bf16.vlgmr.msra.gmra.mrb[12].mxu0 %v747_v47  ;;  %868 = vmatmul.mubr.bf16.vlgmr.msra.gmra.mrb[12].mxu1 %v747_v47 }
 0x36e   :  { %978 = vmatpush1.bf16.msra.mxu0 %v2146_v4  ;;  %1019 = vmatpush1.bf16.msra.mxu1 %v2148_v5 }
 0x36f   :  { %v762_v49 = vrot.slane %v755_v50, %v2283_v56  ;;  %979 = vmatprep.subr.bf16.mxu0 %v2151_v6  ;;  %1020 = vmatprep.subr.bf16.mxu1 %v2155_v7 }
 0x370   :  { %1009 = vmatprep.mubr.bf16.mxu0 %v2091_v0  ;;  %1050 = vmatprep.mubr.bf16.mxu1 %v2091_v0 }
 0x371   :  { %v764_v51 = vunpack.i.h.s16 %v762_v49  ;;  %v1772_v52 = vpack.i.b16 %v762_v49, %v762_v49 }
 0x372   :  { %980 = vmatpush1.bf16.msra.mxu0 %v2157_v8  ;;  %1021 = vmatpush1.bf16.msra.mxu1 %v2160_v9 }
 0x373   :  { %v766_v54 = vpack.i.b16 %v764_v51, %v764_v51  ;;  %v773_v48 = vrot.slane %v1772_v52, %v2288_v61  ;;  %981 = vmatprep.subr.bf16.mxu0 %v2163_v10  ;;  %1022 = vmatprep.subr.bf16.mxu1 %v2165_v11 }
 0x375   :  { %v780_v57 = vrot.slane %v766_v54, %v2288_v61  ;;  %v787_v58 = vsel %vm785_vm7, %v773_v48, %v786_v53 }
 0x376   :  { %788 = vst [vmem:[#allocation9] sm:$0x2] %v787_v58  ;;  %982 = vmatpush1.bf16.msra.mxu0 %v2167_v12  ;;  %1023 = vmatpush1.bf16.msra.mxu1 %v2169_v13 }
 0x377   :  { %v790_v59 = vsel %vm785_vm7, %v780_v57, %v789_v55  ;;  %983 = vmatprep.subr.bf16.mxu0 %v2173_v14  ;;  %1024 = vmatprep.subr.bf16.mxu1 %v2177_v15 }
 0x378   :  { %791 = vst [vmem:[#allocation9 + $0x4] sm:$0x2] %v790_v59 }
 0x37a   :  { %984 = vmatpush1.bf16.msra.mxu0 %v2179_v16  ;;  %1025 = vmatpush1.bf16.msra.mxu1 %v2183_v17 }
 0x37b   :  { %985 = vmatprep.subr.bf16.mxu0 %v2185_v18  ;;  %1026 = vmatprep.subr.bf16.mxu1 %v2189_v19 }
 0x37e   :  { %986 = vmatpush1.bf16.msra.mxu0 %v2191_v20  ;;  %1027 = vmatpush1.bf16.msra.mxu1 %v2193_v21 }
 0x37f   :  { %987 = vmatprep.subr.bf16.mxu0 %v2197_v22  ;;  %1028 = vmatprep.subr.bf16.mxu1 %v2201_v23 }
 0x382   :  { %988 = vmatpush1.bf16.msra.mxu0 %v2205_v24  ;;  %1029 = vmatpush1.bf16.msra.mxu1 %v2207_v25 }
 0x383   :  { %989 = vmatprep.subr.bf16.mxu0 %v2211_v26  ;;  %1030 = vmatprep.subr.bf16.mxu1 %v2213_v27 }
 0x386   :  { %990 = vmatpush1.bf16.msra.mxu0 %v2217_v28  ;;  %1031 = vmatpush1.bf16.msra.mxu1 %v2219_v29 }
 0x387   :  { %991 = vmatprep.subr.bf16.mxu0 %v2223_v30  ;;  %1032 = vmatprep.subr.bf16.mxu1 %v2225_v31 }
 0x38a   :  { %992 = vmatpush1.bf16.msra.mxu0 %v2229_v32  ;;  %1033 = vmatpush1.bf16.msra.mxu1 %v2231_v33 }
 0x38b   :  { %1161 = vmatprep.subr.bf16.mxu0 %v2141_v2  ;;  %1202 = vmatprep.subr.bf16.mxu1 %v2143_v3 }
 0x440   :  { %v828_v60 = vpop.f32.mrb[12].mxu0  ;;  %v869_v62 = vpop.f32.mrb[12].mxu1 }
 0x441   :  { %v830_v63 = vpop.f32.mrb[13].mxu0  ;;  %v871_v1 = vpop.f32.mrb[13].mxu1 }
 0x442   :  { %v881_v34 = vcombine.low %v828_v60, %v830_v63  ;;  %v882_v40 = vcombine.low %v869_v62, %v871_v1  ;;  %v832_v35 = vpop.f32.mrb[14].mxu0  ;;  %v873_v36 = vpop.f32.mrb[14].mxu1 }
 0x443   :  { %v833_v38 = vpop.f32.mrb[15].mxu0  ;;  %v874_v45 = vpop.f32.mrb[15].mxu1 }
 0x444   :  { %v889_v39 = vrot.slane %v881_v34, %v2273_v43  ;;  %v896_v44 = vrot.slane %v882_v40, %v2273_v43 }
 0x446   :  { %v897_v46 = vcombine.low %v889_v39, %v896_v44  ;;  %v972_v44 = vld [vmem:[#allocation9 + $0x4] sm:$0x2] }
 0x448   :  { %v899_v2 = vadd.f32 %v897_v46, %v876_v42 }
 0x44a   :  { %v1773_v47 = vmul.f32 -1.442695, %v899_v2  ;;  %v907_v3 = vrot.slane %v899_v2, 2  ;;  %v918_v49 = vrot.slane %v899_v2, 6  ;;  %v915_v53 = vrot.slane %v899_v2, 4 }
 0x44c   :  { %1901 = vpow2.f32 %v1773_v47  ;;  %v1774_v50 = vmul.f32 -1.442695, %v907_v3  ;;  %v1775_v51 = vmul.f32 -1.442695, %v918_v49 }
 0x44e   :  { %1903 = vpow2.f32 %v1774_v50 }
 0x44f   :  { %1905 = vpow2.f32 %v1775_v51 }
 0x456   :  { %v1902_v52 = vpop.eup %1901 }
 0x457   :  { %v903_v54 = vadd.f32 1.0, %v1902_v52 }
 0x458   :  { %v1904_v48 = vpop.eup %1903 }
 0x459   :  { %1907 = vrcp.f32 %v903_v54  ;;  %v912_v55 = vadd.f32 1.0, %v1904_v48  ;;  %v1906_v37 = vpop.eup %1905 }
 0x45a   :  { %1909 = vtanh.f32 %v915_v53  ;;  %v923_v60 = vadd.f32 1.0, %v1906_v37 }
 0x45b   :  { %1911 = vrcp.f32 %v912_v55 }
 0x45c   :  { %1913 = vrcp.f32 %v923_v60  ;;  %v2480_v60 = vld [vmem:[#allocation7] ss:$16 sps:$4 sm:$0xff]  }
 0x463   :  { %v1908_v57 = vpop.eup %1907 }
 0x464   :  { %v1910_v58 = vpop.eup %1909 }
 0x465   :  { %v1912_v59 = vpop.eup %1911  ;;  %v927_v63 = vmul.f32 %v1910_v58, %v1908_v57 }
 0x466   :  { %v926_v62 = vmul.f32 %v1912_v59, %v2378_v41  ;;  %v1914_v34 = vpop.eup %1913 }
 0x468   :  { %v2424_v1 = vadd.f32 %v927_v63, %v926_v62  ;;  %v2483_v62 = vld [vmem:[#allocation7 + $0x8] ss:$16 sps:$4 sm:$0xff]  }
 0x46a   :  { %1915 = vtanh.f32 %v2424_v1 }
 0x474   :  { %v1916_v40 = vpop.eup %1915 }
 0x475   :  { %v930_v35 = vmul.f32 %v1916_v40, %v1914_v34  ;;  %v2490_v34 = vld [vmem:[#allocation7 + $0x2c] ss:$16 sps:$4 sm:$0xff]  }
 0x477   :  { %v931_v36 = vpack.c.bf16 %v930_v35, %v930_v35 }
 0x479   :  { %v939_v38 = vrot.slane %v931_v36, %v2283_v56  ;;  %1010 = vmatmul.mubr.bf16.vlgmr.msra.gmra.mrb[16].mxu0 %v931_v36  ;;  %1051 = vmatmul.mubr.bf16.vlgmr.msra.gmra.mrb[16].mxu1 %v931_v36 }
 0x47a   :  { %1162 = vmatpush1.bf16.msra.mxu0 %v2146_v4  ;;  %1203 = vmatpush1.bf16.msra.mxu1 %v2148_v5 }
 0x47b   :  { %v946_v41 = vrot.slane %v939_v38, %v2283_v56  ;;  %1163 = vmatprep.subr.bf16.mxu0 %v2151_v6  ;;  %1204 = vmatprep.subr.bf16.mxu1 %v2155_v7  ;;  %v969_v6 = vld [vmem:[#allocation9] sm:$0x2]  ;;  %v1153_v38 = vld [vmem:[#allocation9] sm:$0x4] }
 0x47c   :  { %1193 = vmatprep.mubr.bf16.mxu0 %v2091_v0  ;;  %1234 = vmatprep.mubr.bf16.mxu1 %v2091_v0 }
 0x47d   :  { %v948_v45 = vunpack.i.h.s16 %v946_v41  ;;  %v1776_v39 = vpack.i.b16 %v946_v41, %v946_v41  ;;  %v2500_v41 = vld [vmem:[#allocation7 + $0x20] ss:$16 sps:$4 sm:$0xff]  }
 0x47e   :  { %1164 = vmatpush1.bf16.msra.mxu0 %v2157_v8  ;;  %1205 = vmatpush1.bf16.msra.mxu1 %v2160_v9  ;;  %v2464_v9 = vld [vmem:[#allocation7 + $0x4] ss:$16 sps:$4 sm:$0xff]  }
 0x47f   :  { %v950_v4 = vpack.i.b16 %v948_v45, %v948_v45  ;;  %v957_v5 = vrot.slane %v1776_v39, %v2288_v61  ;;  %1165 = vmatprep.subr.bf16.mxu0 %v2163_v10  ;;  %1206 = vmatprep.subr.bf16.mxu1 %v2165_v11  ;;  %v2467_v10 = vld [vmem:[#allocation7 + $0xc] ss:$16 sps:$4 sm:$0xff]   ;;  %v2503_v45 = vld [vmem:[#allocation7 + $0x28] ss:$16 sps:$4 sm:$0xff]  }
 0x481   :  { %v964_v7 = vrot.slane %v950_v4, %v2288_v61  ;;  %v970_v42 = vsel %vm968_vm9, %v957_v5, %v969_v6  ;;  %v2507_v5 = vld [vmem:[#allocation7 + $0x44] ss:$16 sps:$4 sm:$0xff]   ;;  %v2510_v6 = vld [vmem:[#allocation7 + $0x4c] ss:$16 sps:$4 sm:$0xff]  }
 0x482   :  { %971 = vst [vmem:[#allocation9] sm:$0x2] %v970_v42  ;;  %1166 = vmatpush1.bf16.msra.mxu0 %v2167_v12  ;;  %1207 = vmatpush1.bf16.msra.mxu1 %v2169_v13 }
 0x483   :  { %v973_v8 = vsel %vm968_vm9, %v964_v7, %v972_v44  ;;  %1167 = vmatprep.subr.bf16.mxu0 %v2173_v14  ;;  %1208 = vmatprep.subr.bf16.mxu1 %v2177_v15  ;;  %v2470_v14 = vld [vmem:[#allocation4 + $0x10] sm:$0xff]   ;;  %v1156_v7 = vld [vmem:[#allocation9 + $0x4] sm:$0x4] }
 0x484   :  { %974 = vst [vmem:[#allocation9 + $0x4] sm:$0x2] %v973_v8  ;;  %v2516_v8 = vld [vmem:[#allocation7 + $0x40] ss:$16 sps:$4 sm:$0xff]  }
 0x486   :  { %1168 = vmatpush1.bf16.msra.mxu0 %v2179_v16  ;;  %1209 = vmatpush1.bf16.msra.mxu1 %v2183_v17 }
 0x487   :  { %1169 = vmatprep.subr.bf16.mxu0 %v2185_v18  ;;  %1210 = vmatprep.subr.bf16.mxu1 %v2189_v19 }
 0x48a   :  { %1170 = vmatpush1.bf16.msra.mxu0 %v2191_v20  ;;  %1211 = vmatpush1.bf16.msra.mxu1 %v2193_v21 }
 0x48b   :  { %1171 = vmatprep.subr.bf16.mxu0 %v2197_v22  ;;  %1212 = vmatprep.subr.bf16.mxu1 %v2201_v23  ;;  %v1059_v23 = vunpack.c.l.bf16 %v2470_v14 }
 0x48e   :  { %1172 = vmatpush1.bf16.msra.mxu0 %v2205_v24  ;;  %1213 = vmatpush1.bf16.msra.mxu1 %v2207_v25 }
 0x48f   :  { %1173 = vmatprep.subr.bf16.mxu0 %v2211_v26  ;;  %1214 = vmatprep.subr.bf16.mxu1 %v2213_v27 }
 0x492   :  { %1174 = vmatpush1.bf16.msra.mxu0 %v2217_v28  ;;  %1215 = vmatpush1.bf16.msra.mxu1 %v2219_v29 }
 0x493   :  { %1175 = vmatprep.subr.bf16.mxu0 %v2223_v30  ;;  %1216 = vmatprep.subr.bf16.mxu1 %v2225_v31 }
 0x496   :  { %1176 = vmatpush1.bf16.msra.mxu0 %v2229_v32  ;;  %1217 = vmatpush1.bf16.msra.mxu1 %v2231_v33 }
 0x497   :  { %1344 = vmatprep.subr.bf16.mxu0 %v2464_v9  ;;  %1385 = vmatprep.subr.bf16.mxu1 %v2467_v10 }
 0x54c   :  { %v1011_v11 = vpop.f32.mrb[16].mxu0  ;;  %v1052_v12 = vpop.f32.mrb[16].mxu1 }
 0x54d   :  { %v1013_v13 = vpop.f32.mrb[17].mxu0  ;;  %v1054_v15 = vpop.f32.mrb[17].mxu1 }
 0x54e   :  { %v1064_v16 = vcombine.low %v1011_v11, %v1013_v13  ;;  %v1065_v17 = vcombine.low %v1052_v12, %v1054_v15  ;;  %v1015_v18 = vpop.f32.mrb[18].mxu0  ;;  %v1056_v19 = vpop.f32.mrb[18].mxu1  ;;  %v2519_v11 = vld [vmem:[#allocation7 + $0x48] ss:$16 sps:$4 sm:$0xff]   ;;  %v2524_v13 = vld [vmem:[#allocation7 + $0x64] ss:$16 sps:$4 sm:$0xff]  }
 0x54f   :  { %v1016_v20 = vpop.f32.mrb[19].mxu0  ;;  %v1057_v21 = vpop.f32.mrb[19].mxu1  ;;  %v2527_v15 = vld [vmem:[#allocation7 + $0x6c] ss:$16 sps:$4 sm:$0xff]   ;;  %v2536_v18 = vld [vmem:[#allocation7 + $0x84] ss:$16 sps:$4 sm:$0xff]  }
 0x550   :  { %v1072_v22 = vrot.slane %v1064_v16, %v2273_v43  ;;  %v1079_v24 = vrot.slane %v1065_v17, %v2273_v43  ;;  %v2530_v16 = vld [vmem:[#allocation7 + $0x60] ss:$16 sps:$4 sm:$0xff]   ;;  %v2533_v17 = vld [vmem:[#allocation7 + $0x68] ss:$16 sps:$4 sm:$0xff]   ;;  %v2539_v19 = vld [vmem:[#allocation7 + $0x8c] ss:$16 sps:$4 sm:$0xff]  }
 0x551   :  { %v2542_v20 = vld [vmem:[#allocation7 + $0x80] ss:$16 sps:$4 sm:$0xff]   ;;  %v2545_v21 = vld [vmem:[#allocation7 + $0x88] ss:$16 sps:$4 sm:$0xff]  }
 0x552   :  { %v1080_v25 = vcombine.low %v1072_v22, %v1079_v24  ;;  %v2548_v22 = vld [vmem:[#allocation7 + $0xa4] ss:$16 sps:$4 sm:$0xff]   ;;  %v2554_v24 = vld [vmem:[#allocation7 + $0xa0] ss:$16 sps:$4 sm:$0xff]  }
 0x554   :  { %v1082_v26 = vadd.f32 %v1080_v25, %v1059_v23  ;;  %v2551_v23 = vld [vmem:[#allocation7 + $0xac] ss:$16 sps:$4 sm:$0xff]   ;;  %v2557_v25 = vld [vmem:[#allocation7 + $0xa8] ss:$16 sps:$4 sm:$0xff]  }
 0x556   :  { %v1777_v27 = vmul.f32 -1.442695, %v1082_v26  ;;  %v1090_v28 = vrot.slane %v1082_v26, 2  ;;  %v1101_v30 = vrot.slane %v1082_v26, 6  ;;  %v1098_v33 = vrot.slane %v1082_v26, 4 }
 0x557   :  { %v2560_v26 = vld [vmem:[#allocation7 + $0xc4] ss:$16 sps:$4 sm:$0xff]  }
 0x558   :  { %1917 = vpow2.f32 %v1777_v27  ;;  %v1778_v29 = vmul.f32 -1.442695, %v1090_v28  ;;  %v1779_v31 = vmul.f32 -1.442695, %v1101_v30  ;;  %v2563_v27 = vld [vmem:[#allocation7 + $0xcc] ss:$16 sps:$4 sm:$0xff]  }
 0x559   :  { %v2566_v28 = vld [vmem:[#allocation7 + $0xc0] ss:$16 sps:$4 sm:$0xff]   ;;  %v2572_v30 = vld [vmem:[#allocation7 + $0xe4] ss:$16 sps:$4 sm:$0xff]  }
 0x55a   :  { %1919 = vpow2.f32 %v1778_v29  ;;  %v2569_v29 = vld [vmem:[#allocation7 + $0xc8] ss:$16 sps:$4 sm:$0xff]  }
 0x55b   :  { %1921 = vpow2.f32 %v1779_v31  ;;  %v2575_v31 = vld [vmem:[#allocation7 + $0xec] ss:$16 sps:$4 sm:$0xff]  }
 0x562   :  { %v1918_v32 = vpop.eup %1917 }
 0x563   :  { %v1086_v46 = vadd.f32 1.0, %v1918_v32  ;;  %v2578_v32 = vld [vmem:[#allocation7 + $0xe0] ss:$16 sps:$4 sm:$0xff]  }
 0x564   :  { %v1920_v2 = vpop.eup %1919 }
 0x565   :  { %1923 = vrcp.f32 %v1086_v46  ;;  %v1095_v47 = vadd.f32 1.0, %v1920_v2  ;;  %v1922_v3 = vpop.eup %1921 }
 0x566   :  { %1925 = vtanh.f32 %v1098_v33  ;;  %v1106_v52 = vadd.f32 1.0, %v1922_v3  ;;  %v2581_v33 = vld [vmem:[#allocation7 + $0xe8] ss:$16 sps:$4 sm:$0xff]  }
 0x567   :  { %1927 = vrcp.f32 %v1095_v47 }
 0x568   :  { %1929 = vrcp.f32 %v1106_v52 }
 0x56f   :  { %v1924_v50 = vpop.eup %1923 }
 0x570   :  { %v1926_v49 = vpop.eup %1925 }
 0x571   :  { %v1928_v51 = vpop.eup %1927  ;;  %v1110_v54 = vmul.f32 %v1926_v49, %v1924_v50 }
 0x572   :  { %v1109_v53 = vmul.f32 %v1928_v51, %v2424_v1  ;;  %v1930_v55 = vpop.eup %1929  ;;  %v2487_v1 = vld [vmem:[#allocation7 + $0x24] ss:$16 sps:$4 sm:$0xff]  }
 0x574   :  { %v2476_v48 = vadd.f32 %v1110_v54, %v1109_v53 }
 0x576   :  { %1931 = vtanh.f32 %v2476_v48 }
 0x580   :  { %v1932_v37 = vpop.eup %1931 }
 0x581   :  { %v1113_v57 = vmul.f32 %v1932_v37, %v1930_v55  ;;  %v1243_v37 = vunpack.c.h.bf16 %v2470_v14 }
 0x583   :  { %v1114_v58 = vpack.c.bf16 %v1113_v57, %v1113_v57 }
 0x585   :  { %v1122_v59 = vrot.slane %v1114_v58, %v2283_v56  ;;  %1194 = vmatmul.mubr.bf16.vlgmr.msra.gmra.mrb[20].mxu0 %v1114_v58  ;;  %1235 = vmatmul.mubr.bf16.vlgmr.msra.gmra.mrb[20].mxu1 %v1114_v58 }
 0x586   :  { %1345 = vmatpush1.bf16.msra.mxu0 %v2480_v60  ;;  %1386 = vmatpush1.bf16.msra.mxu1 %v2483_v62 }
 0x587   :  { %v1129_v63 = vrot.slane %v1122_v59, %v2283_v56  ;;  %1346 = vmatprep.subr.bf16.mxu0 %v2487_v1  ;;  %1387 = vmatprep.subr.bf16.mxu1 %v2490_v34 }
 0x588   :  { %1376 = vmatprep.mubr.bf16.mxu0 %v2091_v0  ;;  %1417 = vmatprep.mubr.bf16.mxu1 %v2091_v0 }
 0x589   :  { %v1131_v40 = vunpack.i.h.s16 %v1129_v63  ;;  %v1780_v35 = vpack.i.b16 %v1129_v63, %v1129_v63 }
 0x58a   :  { %1347 = vmatpush1.bf16.msra.mxu0 %v2500_v41  ;;  %1388 = vmatpush1.bf16.msra.mxu1 %v2503_v45 }
 0x58b   :  { %v1133_v39 = vpack.i.b16 %v1131_v40, %v1131_v40  ;;  %v1140_v4 = vrot.slane %v1780_v35, %v2288_v61  ;;  %1348 = vmatprep.subr.bf16.mxu0 %v2507_v5  ;;  %1389 = vmatprep.subr.bf16.mxu1 %v2510_v6 }
 0x58d   :  { %v1147_v42 = vrot.slane %v1133_v39, %v2288_v61  ;;  %v1154_v44 = vsel %vm2496_vm12, %v1140_v4, %v1153_v38 }
 0x58e   :  { %1155 = vst [vmem:[#allocation9] sm:$0x4] %v1154_v44  ;;  %1349 = vmatpush1.bf16.msra.mxu0 %v2516_v8  ;;  %1390 = vmatpush1.bf16.msra.mxu1 %v2519_v11 }
 0x58f   :  { %v1157_v12 = vsel %vm2496_vm12, %v1147_v42, %v1156_v7  ;;  %1350 = vmatprep.subr.bf16.mxu0 %v2524_v13  ;;  %1391 = vmatprep.subr.bf16.mxu1 %v2527_v15 }
 0x590   :  { %1158 = vst [vmem:[#allocation9 + $0x4] sm:$0x4] %v1157_v12 }
 0x592   :  { %1351 = vmatpush1.bf16.msra.mxu0 %v2530_v16  ;;  %1392 = vmatpush1.bf16.msra.mxu1 %v2533_v17 }
 0x593   :  { %1352 = vmatprep.subr.bf16.mxu0 %v2536_v18  ;;  %1393 = vmatprep.subr.bf16.mxu1 %v2539_v19 }
 0x596   :  { %1353 = vmatpush1.bf16.msra.mxu0 %v2542_v20  ;;  %1394 = vmatpush1.bf16.msra.mxu1 %v2545_v21 }
 0x597   :  { %1354 = vmatprep.subr.bf16.mxu0 %v2548_v22  ;;  %1395 = vmatprep.subr.bf16.mxu1 %v2551_v23 }
 0x59a   :  { %1355 = vmatpush1.bf16.msra.mxu0 %v2554_v24  ;;  %1396 = vmatpush1.bf16.msra.mxu1 %v2557_v25 }
 0x59b   :  { %1356 = vmatprep.subr.bf16.mxu0 %v2560_v26  ;;  %1397 = vmatprep.subr.bf16.mxu1 %v2563_v27 }
 0x59e   :  { %1357 = vmatpush1.bf16.msra.mxu0 %v2566_v28  ;;  %1398 = vmatpush1.bf16.msra.mxu1 %v2569_v29 }
 0x59f   :  { %1358 = vmatprep.subr.bf16.mxu0 %v2572_v30  ;;  %1399 = vmatprep.subr.bf16.mxu1 %v2575_v31 }
 0x5a2   :  { %1359 = vmatpush1.bf16.msra.mxu0 %v2578_v32  ;;  %1400 = vmatpush1.bf16.msra.mxu1 %v2581_v33 }
 0x5a3   :  { %1528 = vmatprep.subr.bf16.mxu0 %v2464_v9  ;;  %1569 = vmatprep.subr.bf16.mxu1 %v2467_v10 }
 0x658   :  { %v1195_v46 = vpop.f32.mrb[20].mxu0  ;;  %v1236_v2 = vpop.f32.mrb[20].mxu1 }
 0x659   :  { %v1197_v47 = vpop.f32.mrb[21].mxu0  ;;  %v1238_v3 = vpop.f32.mrb[21].mxu1 }
 0x65a   :  { %v1248_v50 = vcombine.low %v1195_v46, %v1197_v47  ;;  %v1249_v49 = vcombine.low %v1236_v2, %v1238_v3  ;;  %v1199_v51 = vpop.f32.mrb[22].mxu0  ;;  %v1240_v52 = vpop.f32.mrb[22].mxu1 }
 0x65b   :  { %v1200_v53 = vpop.f32.mrb[23].mxu0  ;;  %v1241_v54 = vpop.f32.mrb[23].mxu1 }
 0x65c   :  { %v1256_v55 = vrot.slane %v1248_v50, %v2273_v43  ;;  %v1263_v57 = vrot.slane %v1249_v49, %v2273_v43 }
 0x65e   :  { %v1264_v58 = vcombine.low %v1256_v55, %v1263_v57 }
 0x660   :  { %v1266_v9 = vadd.f32 %v1264_v58, %v1243_v37 }
 0x662   :  { %v1781_v59 = vmul.f32 -1.442695, %v1266_v9  ;;  %v1274_v10 = vrot.slane %v1266_v9, 2  ;;  %v1285_v40 = vrot.slane %v1266_v9, 6  ;;  %v1282_v38 = vrot.slane %v1266_v9, 4 }
 0x664   :  { %1933 = vpow2.f32 %v1781_v59  ;;  %v1782_v63 = vmul.f32 -1.442695, %v1274_v10  ;;  %v1783_v35 = vmul.f32 -1.442695, %v1285_v40 }
 0x666   :  { %1935 = vpow2.f32 %v1782_v63 }
 0x667   :  { %1937 = vpow2.f32 %v1783_v35 }
 0x66e   :  { %v1934_v36 = vpop.eup %1933 }
 0x66f   :  { %v1270_v39 = vadd.f32 1.0, %v1934_v36 }
 0x670   :  { %v1936_v4 = vpop.eup %1935 }
 0x671   :  { %1939 = vrcp.f32 %v1270_v39  ;;  %v1279_v7 = vadd.f32 1.0, %v1936_v4  ;;  %v1938_v14 = vpop.eup %1937 }
 0x672   :  { %1941 = vtanh.f32 %v1282_v38  ;;  %v1290_v46 = vadd.f32 1.0, %v1938_v14 }
 0x673   :  { %1943 = vrcp.f32 %v1279_v7 }
 0x674   :  { %1945 = vrcp.f32 %v1290_v46  ;;  %v1520_v46 = vld [vmem:[#allocation9] sm:$0x8] }
 0x67b   :  { %v1940_v42 = vpop.eup %1939 }
 0x67c   :  { %v1942_v44 = vpop.eup %1941 }
 0x67d   :  { %v1944_v12 = vpop.eup %1943  ;;  %v1294_v47 = vmul.f32 %v1942_v44, %v1940_v42 }
 0x67e   :  { %v1293_v2 = vmul.f32 %v1944_v12, %v2476_v48  ;;  %v1946_v50 = vpop.eup %1945 }
 0x680   :  { %v2590_v3 = vadd.f32 %v1294_v47, %v1293_v2 }
 0x682   :  { %1947 = vtanh.f32 %v2590_v3 }
 0x68c   :  { %v1948_v49 = vpop.eup %1947 }
 0x68d   :  { %v1297_v51 = vmul.f32 %v1948_v49, %v1946_v50 }
 0x68f   :  { %v1298_v52 = vpack.c.bf16 %v1297_v51, %v1297_v51 }
 0x691   :  { %v1306_v53 = vrot.slane %v1298_v52, %v2283_v56  ;;  %1377 = vmatmul.mubr.bf16.vlgmr.msra.gmra.mrb[24].mxu0 %v1298_v52  ;;  %1418 = vmatmul.mubr.bf16.vlgmr.msra.gmra.mrb[24].mxu1 %v1298_v52 }
 0x692   :  { %1529 = vmatpush1.bf16.msra.mxu0 %v2480_v60  ;;  %1570 = vmatpush1.bf16.msra.mxu1 %v2483_v62 }
 0x693   :  { %v1313_v48 = vrot.slane %v1306_v53, %v2283_v56  ;;  %1530 = vmatprep.subr.bf16.mxu0 %v2487_v1  ;;  %1571 = vmatprep.subr.bf16.mxu1 %v2490_v34  ;;  %v1336_v1 = vld [vmem:[#allocation9] sm:$0x4] }
 0x694   :  { %1560 = vmatprep.mubr.bf16.mxu0 %v2091_v0  ;;  %1601 = vmatprep.mubr.bf16.mxu1 %v2091_v0  ;;  %v1339_v0 = vld [vmem:[#allocation9 + $0x4] sm:$0x4] }
 0x695   :  { %v1315_v54 = vunpack.i.h.s16 %v1313_v48  ;;  %v1784_v55 = vpack.i.b16 %v1313_v48, %v1313_v48 }
 0x696   :  { %1531 = vmatpush1.bf16.msra.mxu0 %v2500_v41  ;;  %1572 = vmatpush1.bf16.msra.mxu1 %v2503_v45 }
 0x697   :  { %v1317_v60 = vpack.i.b16 %v1315_v54, %v1315_v54  ;;  %v1324_v62 = vrot.slane %v1784_v55, %v2288_v61  ;;  %1532 = vmatprep.subr.bf16.mxu0 %v2507_v5  ;;  %1573 = vmatprep.subr.bf16.mxu1 %v2510_v6 }
 0x699   :  { %v1331_v34 = vrot.slane %v1317_v60, %v2288_v61  ;;  %v1337_v37 = vsel %vm1335_vm14, %v1324_v62, %v1336_v1 }
 0x69a   :  { %1338 = vst [vmem:[#allocation9] sm:$0x4] %v1337_v37  ;;  %1533 = vmatpush1.bf16.msra.mxu0 %v2516_v8  ;;  %1574 = vmatpush1.bf16.msra.mxu1 %v2519_v11  ;;  %v2630_v8 = vld [vmem:[#allocation4 + $0x18] sm:$0xff]  }
 0x69b   :  { %v1340_v41 = vsel %vm1335_vm14, %v1331_v34, %v1339_v0  ;;  %1534 = vmatprep.subr.bf16.mxu0 %v2524_v13  ;;  %1575 = vmatprep.subr.bf16.mxu1 %v2527_v15 }
 0x69c   :  { %1341 = vst [vmem:[#allocation9 + $0x4] sm:$0x4] %v1340_v41  ;;  %v1610_v41 = vunpack.c.h.bf16 %v2630_v8 }
 0x69e   :  { %1535 = vmatpush1.bf16.msra.mxu0 %v2530_v16  ;;  %1576 = vmatpush1.bf16.msra.mxu1 %v2533_v17 }
 0x69f   :  { %1536 = vmatprep.subr.bf16.mxu0 %v2536_v18  ;;  %1577 = vmatprep.subr.bf16.mxu1 %v2539_v19 }
 0x6a2   :  { %1537 = vmatpush1.bf16.msra.mxu0 %v2542_v20  ;;  %1578 = vmatpush1.bf16.msra.mxu1 %v2545_v21  ;;  %v1426_v21 = vunpack.c.l.bf16 %v2630_v8 }
 0x6a3   :  { %1538 = vmatprep.subr.bf16.mxu0 %v2548_v22  ;;  %1579 = vmatprep.subr.bf16.mxu1 %v2551_v23 }
 0x6a6   :  { %1539 = vmatpush1.bf16.msra.mxu0 %v2554_v24  ;;  %1580 = vmatpush1.bf16.msra.mxu1 %v2557_v25 }
 0x6a7   :  { %1540 = vmatprep.subr.bf16.mxu0 %v2560_v26  ;;  %1581 = vmatprep.subr.bf16.mxu1 %v2563_v27 }
 0x6aa   :  { %1541 = vmatpush1.bf16.msra.mxu0 %v2566_v28  ;;  %1582 = vmatpush1.bf16.msra.mxu1 %v2569_v29 }
 0x6ab   :  { %1542 = vmatprep.subr.bf16.mxu0 %v2572_v30  ;;  %1583 = vmatprep.subr.bf16.mxu1 %v2575_v31 }
 0x6ae   :  { %1543 = vmatpush1.bf16.msra.mxu0 %v2578_v32  ;;  %1584 = vmatpush1.bf16.msra.mxu1 %v2581_v33 }
 0x764   :  { %v1378_v45 = vpop.f32.mrb[24].mxu0  ;;  %v1419_v5 = vpop.f32.mrb[24].mxu1 }
 0x765   :  { %v1380_v6 = vpop.f32.mrb[25].mxu0  ;;  %v1421_v11 = vpop.f32.mrb[25].mxu1 }
 0x766   :  { %v1431_v13 = vcombine.low %v1378_v45, %v1380_v6  ;;  %v1432_v15 = vcombine.low %v1419_v5, %v1421_v11  ;;  %v1382_v16 = vpop.f32.mrb[26].mxu0  ;;  %v1423_v17 = vpop.f32.mrb[26].mxu1 }
 0x767   :  { %v1383_v18 = vpop.f32.mrb[27].mxu0  ;;  %v1424_v19 = vpop.f32.mrb[27].mxu1 }
 0x768   :  { %v1439_v20 = vrot.slane %v1431_v13, %v2273_v43  ;;  %v1446_v22 = vrot.slane %v1432_v15, %v2273_v43 }
 0x76a   :  { %v1447_v23 = vcombine.low %v1439_v20, %v1446_v22 }
 0x76c   :  { %v1449_v24 = vadd.f32 %v1447_v23, %v1426_v21 }
 0x76e   :  { %v1785_v25 = vmul.f32 -1.442695, %v1449_v24  ;;  %v1457_v26 = vrot.slane %v1449_v24, 2  ;;  %v1468_v28 = vrot.slane %v1449_v24, 6  ;;  %v1465_v31 = vrot.slane %v1449_v24, 4 }
 0x770   :  { %1949 = vpow2.f32 %v1785_v25  ;;  %v1786_v27 = vmul.f32 -1.442695, %v1457_v26  ;;  %v1787_v29 = vmul.f32 -1.442695, %v1468_v28 }
 0x772   :  { %1951 = vpow2.f32 %v1786_v27 }
 0x773   :  { %1953 = vpow2.f32 %v1787_v29 }
 0x77a   :  { %v1950_v30 = vpop.eup %1949 }
 0x77b   :  { %v1453_v32 = vadd.f32 1.0, %v1950_v30 }
 0x77c   :  { %v1952_v33 = vpop.eup %1951 }
 0x77d   :  { %1955 = vrcp.f32 %v1453_v32  ;;  %v1462_v57 = vadd.f32 1.0, %v1952_v33  ;;  %v1954_v58 = vpop.eup %1953 }
 0x77e   :  { %1957 = vtanh.f32 %v1465_v31  ;;  %v1473_v63 = vadd.f32 1.0, %v1954_v58 }
 0x77f   :  { %1959 = vrcp.f32 %v1462_v57 }
 0x780   :  { %1961 = vrcp.f32 %v1473_v63 }
 0x787   :  { %v1956_v9 = vpop.eup %1955 }
 0x788   :  { %v1958_v59 = vpop.eup %1957 }
 0x789   :  { %v1960_v10 = vpop.eup %1959  ;;  %v1477_v35 = vmul.f32 %v1958_v59, %v1956_v9 }
 0x78a   :  { %v1476_v40 = vmul.f32 %v1960_v10, %v2590_v3  ;;  %v1962_v38 = vpop.eup %1961  ;;  %v1523_v3 = vld [vmem:[#allocation9 + $0x4] sm:$0x8] }
 0x78c   :  { %v1478_v36 = vadd.f32 %v1477_v35, %v1476_v40 }
 0x78e   :  { %1963 = vtanh.f32 %v1478_v36 }
 0x798   :  { %v1964_v39 = vpop.eup %1963 }
 0x799   :  { %v1480_v4 = vmul.f32 %v1964_v39, %v1962_v38 }
 0x79b   :  { %v1481_v7 = vpack.c.bf16 %v1480_v4, %v1480_v4 }
 0x79d   :  { %v1489_v14 = vrot.slane %v1481_v7, %v2283_v56  ;;  %1561 = vmatmul.mubr.bf16.vlgmr.msra.gmra.mrb[28].mxu0 %v1481_v7  ;;  %1602 = vmatmul.mubr.bf16.vlgmr.msra.gmra.mrb[28].mxu1 %v1481_v7 }
 0x79f   :  { %v1496_v42 = vrot.slane %v1489_v14, %v2283_v56 }
 0x7a1   :  { %v1498_v44 = vunpack.i.h.s16 %v1496_v42  ;;  %v1788_v12 = vpack.i.b16 %v1496_v42, %v1496_v42 }
 0x7a3   :  { %v1500_v2 = vpack.i.b16 %v1498_v44, %v1498_v44  ;;  %v1507_v47 = vrot.slane %v1788_v12, %v2288_v61 }
 0x7a5   :  { %v1514_v50 = vrot.slane %v1500_v2, %v2288_v61  ;;  %v1521_v49 = vsel %vm1519_vm1, %v1507_v47, %v1520_v46 }
 0x7a6   :  { %1522 = vst [vmem:[#allocation9] sm:$0x8] %v1521_v49 }
 0x7a7   :  { %v1524_v51 = vsel %vm1519_vm1, %v1514_v50, %v1523_v3 }
 0x7a8   :  { %1525 = vst [vmem:[#allocation9 + $0x4] sm:$0x8] %v1524_v51 }
 0x7ad   :  { %v1703_v63 = vld [vmem:[#allocation9] sm:$0x8] }
 0x870   :  { %v1562_v52 = vpop.f32.mrb[28].mxu0  ;;  %v1603_v53 = vpop.f32.mrb[28].mxu1 }
 0x871   :  { %v1564_v48 = vpop.f32.mrb[29].mxu0  ;;  %v1605_v54 = vpop.f32.mrb[29].mxu1 }
 0x872   :  { %v1615_v55 = vcombine.low %v1562_v52, %v1564_v48  ;;  %v1616_v60 = vcombine.low %v1603_v53, %v1605_v54  ;;  %v1566_v62 = vpop.f32.mrb[30].mxu0  ;;  %v1607_v1 = vpop.f32.mrb[30].mxu1 }
 0x873   :  { %v1567_v34 = vpop.f32.mrb[31].mxu0  ;;  %v1608_v37 = vpop.f32.mrb[31].mxu1 }
 0x874   :  { %v1623_v0 = vrot.slane %v1615_v55, %v2273_v43  ;;  %v1630_v45 = vrot.slane %v1616_v60, %v2273_v43 }
 0x876   :  { %v1631_v5 = vcombine.low %v1623_v0, %v1630_v45 }
 0x878   :  { %v1633_v6 = vadd.f32 %v1631_v5, %v1610_v41 }
 0x87a   :  { %v1789_v11 = vmul.f32 -1.442695, %v1633_v6  ;;  %v1641_v13 = vrot.slane %v1633_v6, 2  ;;  %v1652_v16 = vrot.slane %v1633_v6, 6  ;;  %v1649_v19 = vrot.slane %v1633_v6, 4 }
 0x87c   :  { %1965 = vpow2.f32 %v1789_v11  ;;  %v1790_v15 = vmul.f32 -1.442695, %v1641_v13  ;;  %v1791_v17 = vmul.f32 -1.442695, %v1652_v16 }
 0x87e   :  { %1967 = vpow2.f32 %v1790_v15 }
 0x87f   :  { %1969 = vpow2.f32 %v1791_v17 }
 0x886   :  { %v1966_v18 = vpop.eup %1965 }
 0x887   :  { %v1637_v20 = vadd.f32 1.0, %v1966_v18 }
 0x888   :  { %v1968_v21 = vpop.eup %1967 }
 0x889   :  { %1971 = vrcp.f32 %v1637_v20  ;;  %v1646_v22 = vadd.f32 1.0, %v1968_v21  ;;  %v1970_v8 = vpop.eup %1969 }
 0x88a   :  { %1973 = vtanh.f32 %v1649_v19  ;;  %v1657_v25 = vadd.f32 1.0, %v1970_v8 }
 0x88b   :  { %1975 = vrcp.f32 %v1646_v22 }
 0x88c   :  { %1977 = vrcp.f32 %v1657_v25 }
 0x893   :  { %v1972_v43 = vpop.eup %1971 }
 0x894   :  { %v1974_v23 = vpop.eup %1973 }
 0x895   :  { %v1976_v24 = vpop.eup %1975  ;;  %v1661_v27 = vmul.f32 %v1974_v23, %v1972_v43 }
 0x896   :  { %v1660_v26 = vmul.f32 %v1976_v24, %v1478_v36  ;;  %v1978_v29 = vpop.eup %1977  ;;  %v1706_v36 = vld [vmem:[#allocation9 + $0x4] sm:$0x8] }
 0x898   :  { %v1662_v28 = vadd.f32 %v1661_v27, %v1660_v26 }
 0x89a   :  { %1979 = vtanh.f32 %v1662_v28  ;;  %1710 = vst [vmem:[#allocation3] sm:$0x3] %v1662_v28 }
 0x8a4   :  { %v1980_v30 = vpop.eup %1979 }
 0x8a5   :  { %v1664_v31 = vmul.f32 %v1980_v30, %v1978_v29 }
 0x8a7   :  { %v1665_v32 = vpack.c.bf16 %v1664_v31, %v1664_v31  ;;  %1709 = vst [vmem:[#allocation2] sm:$0x3] %v1664_v31 }
 0x8a9   :  { %v1673_v33 = vrot.slane %v1665_v32, %v2283_v56 }
 0x8ab   :  { %v1680_v57 = vrot.slane %v1673_v33, %v2283_v56 }
 0x8ad   :  { %v1682_v58 = vunpack.i.h.s16 %v1680_v57  ;;  %v1792_v9 = vpack.i.b16 %v1680_v57, %v1680_v57 }
 0x8af   :  { %v1684_v59 = vpack.i.b16 %v1682_v58, %v1682_v58  ;;  %v1691_v10 = vrot.slane %v1792_v9, %v2288_v61 }
 0x8b1   :  { %v1698_v40 = vrot.slane %v1684_v59, %v2288_v61  ;;  %v1704_v35 = vsel %vm1702_vm3, %v1691_v10, %v1703_v63 }
 0x8b2   :  { %1705 = vst [vmem:[#allocation9] sm:$0x8] %v1704_v35 }
 0x8b3   :  { %v1707_v38 = vsel %vm1702_vm3, %v1698_v40, %v1706_v36 }
 0x8b4   :  { %1708 = vst [vmem:[#allocation9 + $0x4] sm:$0x8] %v1707_v38 }
 0x8b5   :  { %2068 = shalt.err (!%p2065_p6)
}
 0x8b6   :  { %s2069_s12 = scalar_lea.hbm %s2666_s2, 128 }
 0x8b7   :  { %p2070_p7 = scmp.ne.s32.totalorder %s2666_s2, %s2069_s12  ;;  %p2073_p8 = scmp.lt.u32.totalorder %s2069_s12, %s2666_s2 }
 0x8b9   :  { %p2075_p9 = pnand %p2073_p8, %p2070_p7 }
 0x8bb   :  { %2078 = shalt.err (!%p2075_p9)
}
 0x8bc   :  { %1722 = dma.vmem_to_hbm [thread:$0]  %s1717_s8, 128, %s2666_s2, [#allocation6], %s2086_s19, %s2086_s19, %s2087_s20  }
 0x8bd   :  { %2083 = dma.done.wait [#allocation6], 128  }
 0x8be   :  { %2084 = vsyncadd [#allocation6], 4294967168 }
 0x8bf   :  { %1726 = vsyncpa [#allocation5], 1 }
 0x8c0   :  { %1727 = vsyncpa [#allocation8], 1 }
 0x8c1   :  { %1728 = vsyncpa [#allocation6], 1 }

// kernel: tpu_custom_call.1
= control target key start
LH: loop header
LB: loop body
LE: loop exit
PB: predicated region body
PF: predicated region fallthrough
CT: control target
= control target key end

     0   :  { %7 = vsyncpa [#allocation5], 0  ;;  %s2664_s0 = inlined_call_operand.hbm [shape: bf16[8,2,512], index: 0, kind: input, shape index: {}]   ;;  %s2665_s1 = inlined_call_operand.hbm [shape: bf16[128,512], index: 1, kind: input, shape index: {}]   ;;  %s2666_s2 = inlined_call_operand.hbm [shape: bf16[2,8,128], index: 2, kind: output, shape index: {}]  }
   0x1   :  { %8 = vsyncpa [#allocation8], 0 }
   0x2   :  { %9 = vsyncpa [#allocation6], 0  ;;  %s2085_s9 = smov [#allocation4]   ;;  %s2013_s13 = scalar_lea.hbm %s2664_s0, 512 }
   0x3   :  { %s15_s10 = sshll.u32 %s2085_s9, 4  ;;  %p2014_p0 = scmp.ne.s32.totalorder %s2664_s0, %s2013_s13  ;;  %s16_s10 = int_to_ptr.vmem [resolvable:$true] %s15_s10 }
   0x4   :  { %p2017_p1 = scmp.lt.u32.totalorder %s2013_s13, %s2664_s0 }
   0x6   :  { %p2019_p2 = pnand %p2017_p1, %p2014_p0 }
   0x8   :  { %2022 = shalt.err (!%p2019_p2)
}
   0x9   :  { %s2023_s18 = scalar_lea.vmem %s16_s10, 512  ;;  %p2028_p4 = scmp.lt.s32.totalorder %s16_s10, %s16_s10 }
   0xa   :  { %p2024_p3 = scmp.ne.s32.totalorder %s16_s10, %s2023_s18  ;;  %p2029_p5 = scmp.lt.s32.totalorder %s2023_s18, %s2023_s18 }
   0xc   :  { %p2030_p6 = por %p2029_p5, %p2028_p4 }
   0xe   :  { %p2031_p7 = pnand %p2030_p6, %p2024_p3 }
  0x10   :  { %2034 = shalt.err (!%p2031_p7)
}
  0x11   :  { %s2086_s19 = smov 64   ;;  %s2087_s20 = smov 4  }
  0x12   :  { %21 = dma.hbm_to_vmem [thread:$0]  %s2664_s0, 512, %s16_s10, [#allocation5], %s2086_s19, %s2086_s19, %s2087_s20  }
  0x13   :  { %s2088_s23 = smov [#allocation7]   ;;  %s2035_s27 = scalar_lea.hbm %s2665_s1, 4096 }
  0x14   :  { %s27_s24 = sshll.u32 %s2088_s23, 4  ;;  %p2036_p8 = scmp.ne.s32.totalorder %s2665_s1, %s2035_s27  ;;  %s28_s24 = int_to_ptr.vmem [resolvable:$true] %s27_s24 }
  0x15   :  { %p2039_p9 = scmp.lt.u32.totalorder %s2035_s27, %s2665_s1 }
  0x17   :  { %p2041_p10 = pnand %p2039_p9, %p2036_p8 }
  0x19   :  { %2044 = shalt.err (!%p2041_p10)
}
  0x1a   :  { %s2045_s4 = scalar_lea.vmem %s28_s24, 4096  ;;  %p2050_p12 = scmp.lt.s32.totalorder %s28_s24, %s28_s24 }
  0x1b   :  { %p2046_p11 = scmp.ne.s32.totalorder %s28_s24, %s2045_s4  ;;  %p2051_p13 = scmp.lt.s32.totalorder %s2045_s4, %s2045_s4 }
  0x1d   :  { %p2052_p0 = por %p2051_p13, %p2050_p12 }
  0x1f   :  { %p2053_p1 = pnand %p2052_p0, %p2046_p11 }
  0x21   :  { %2056 = shalt.err (!%p2053_p1)
}
  0x22   :  { %s2089_s0 = smov 256   ;;  %s2090_s5 = smov 16  }
  0x23   :  { %33 = dma.hbm_to_vmem [thread:$0]  %s2665_s1, 4096, %s28_s24, [#allocation8], %s2089_s0, %s2089_s0, %s2090_s5  }
  0x24   :  { %2079 = dma.done.wait [#allocation5], 512  }
  0x25   :  { %2080 = vsyncadd [#allocation5], 4294966784 }
  0x26   :  { %2081 = dma.done.wait [#allocation8], 4096  }
  0x27   :  { %2082 = vsyncadd [#allocation8], 4294963200  ;;  %v2091_v0 = vmov 0   ;;  %v2092_v1 = vmov 0.0   ;;  %v2141_v2 = vld [vmem:[#allocation7 + $0x4] ss:$16 sps:$4 sm:$0xff]   ;;  %v335_v38 = vlaneseq }
  0x28   :  { %275 = vmatprep.mubr.bf16.mxu0 %v2091_v0  ;;  %316 = vmatprep.mubr.bf16.mxu1 %v2091_v0  ;;  %45 = vst [vmem:[#allocation2] sm:$0x3] %v2092_v1  ;;  %46 = vst [vmem:[#allocation3] sm:$0x3] %v2092_v1  ;;  %v2143_v3 = vld [vmem:[#allocation7 + $0xc] ss:$16 sps:$4 sm:$0xff]  }
  0x29   :  { %243 = vmatprep.subr.bf16.mxu0 %v2141_v2  ;;  %v2146_v4 = vld [vmem:[#allocation7] ss:$16 sps:$4 sm:$0xff]   ;;  %v2148_v5 = vld [vmem:[#allocation7 + $0x8] ss:$16 sps:$4 sm:$0xff]   ;;  %284 = vmatprep.subr.bf16.mxu1 %v2143_v3  ;;  %v2151_v6 = vld [vmem:[#allocation7 + $0x24] ss:$16 sps:$4 sm:$0xff]  }
  0x2a   :  { %244 = vmatpush1.bf16.msra.mxu0 %v2146_v4  ;;  %285 = vmatpush1.bf16.msra.mxu1 %v2148_v5  ;;  %v2155_v7 = vld [vmem:[#allocation7 + $0x2c] ss:$16 sps:$4 sm:$0xff]   ;;  %v2157_v8 = vld [vmem:[#allocation7 + $0x20] ss:$16 sps:$4 sm:$0xff]   ;;  %v2160_v9 = vld [vmem:[#allocation7 + $0x28] ss:$16 sps:$4 sm:$0xff]  }
  0x2b   :  { %245 = vmatprep.subr.bf16.mxu0 %v2151_v6  ;;  %286 = vmatprep.subr.bf16.mxu1 %v2155_v7  ;;  %v2163_v10 = vld [vmem:[#allocation7 + $0x44] ss:$16 sps:$4 sm:$0xff]   ;;  %v2165_v11 = vld [vmem:[#allocation7 + $0x4c] ss:$16 sps:$4 sm:$0xff]   ;;  %v2167_v12 = vld [vmem:[#allocation7 + $0x40] ss:$16 sps:$4 sm:$0xff]  }
  0x2c   :  { %v2169_v13 = vld [vmem:[#allocation7 + $0x48] ss:$16 sps:$4 sm:$0xff]   ;;  %v2173_v14 = vld [vmem:[#allocation7 + $0x64] ss:$16 sps:$4 sm:$0xff]   ;;  %v2177_v15 = vld [vmem:[#allocation7 + $0x6c] ss:$16 sps:$4 sm:$0xff]  }
  0x2d   :  { %v2179_v16 = vld [vmem:[#allocation7 + $0x60] ss:$16 sps:$4 sm:$0xff]   ;;  %v2183_v17 = vld [vmem:[#allocation7 + $0x68] ss:$16 sps:$4 sm:$0xff]   ;;  %v2185_v18 = vld [vmem:[#allocation7 + $0x84] ss:$16 sps:$4 sm:$0xff]  }
  0x2e   :  { %246 = vmatpush1.bf16.msra.mxu0 %v2157_v8  ;;  %287 = vmatpush1.bf16.msra.mxu1 %v2160_v9  ;;  %v2189_v19 = vld [vmem:[#allocation7 + $0x8c] ss:$16 sps:$4 sm:$0xff]   ;;  %v2191_v20 = vld [vmem:[#allocation7 + $0x80] ss:$16 sps:$4 sm:$0xff]   ;;  %v2193_v21 = vld [vmem:[#allocation7 + $0x88] ss:$16 sps:$4 sm:$0xff]  }
  0x2f   :  { %247 = vmatprep.subr.bf16.mxu0 %v2163_v10  ;;  %288 = vmatprep.subr.bf16.mxu1 %v2165_v11  ;;  %v2197_v22 = vld [vmem:[#allocation7 + $0xa4] ss:$16 sps:$4 sm:$0xff]   ;;  %v2201_v23 = vld [vmem:[#allocation7 + $0xac] ss:$16 sps:$4 sm:$0xff]   ;;  %v2205_v24 = vld [vmem:[#allocation7 + $0xa0] ss:$16 sps:$4 sm:$0xff]  }
  0x30   :  { %v2207_v25 = vld [vmem:[#allocation7 + $0xa8] ss:$16 sps:$4 sm:$0xff]   ;;  %v2211_v26 = vld [vmem:[#allocation7 + $0xc4] ss:$16 sps:$4 sm:$0xff]   ;;  %v2213_v27 = vld [vmem:[#allocation7 + $0xcc] ss:$16 sps:$4 sm:$0xff]  }
  0x31   :  { %v2217_v28 = vld [vmem:[#allocation7 + $0xc0] ss:$16 sps:$4 sm:$0xff]   ;;  %v2219_v29 = vld [vmem:[#allocation7 + $0xc8] ss:$16 sps:$4 sm:$0xff]   ;;  %v2223_v30 = vld [vmem:[#allocation7 + $0xe4] ss:$16 sps:$4 sm:$0xff]  }
  0x32   :  { %248 = vmatpush1.bf16.msra.mxu0 %v2167_v12  ;;  %289 = vmatpush1.bf16.msra.mxu1 %v2169_v13  ;;  %v2225_v31 = vld [vmem:[#allocation7 + $0xec] ss:$16 sps:$4 sm:$0xff]   ;;  %v2229_v32 = vld [vmem:[#allocation7 + $0xe0] ss:$16 sps:$4 sm:$0xff]   ;;  %v2231_v33 = vld [vmem:[#allocation7 + $0xe8] ss:$16 sps:$4 sm:$0xff]  }
  0x33   :  { %249 = vmatprep.subr.bf16.mxu0 %v2173_v14  ;;  %290 = vmatprep.subr.bf16.mxu1 %v2177_v15  ;;  %v79_v34 = vld [vmem:[#allocation2] sm:$0x3]  ;;  %v2093_v36 = vmov 1983009808   ;;  %v336_v40 = vshrl.u32 %v335_v38, 7  ;;  %v2275_v45 = vld [vmem:[#allocation4] sm:$0xff]  }
  0x34   :  { %v82_v35 = vpack.c.bf16 %v79_v34, %v79_v34  ;;  %v333_v37 = vunpack.c.l.s4 %v2093_v36  ;;  %v325_v54 = vunpack.c.l.bf16 %v2275_v45  ;;  %vm416_vm0 = vcmask 1040384   ;;  %s2096_s1 = smov [#allocation9]  }
  0x35   :  { %vm417_vm1 = vsmask.f32 256  ;;  %vm600_vm3 = vsmask.f32 7938  ;;  %vm783_vm5 = vcmask 1041409   ;;  %vm1150_vm10 = vcmask 1042434  }
  0x36   :  { %250 = vmatpush1.bf16.msra.mxu0 %v2179_v16  ;;  %291 = vmatpush1.bf16.msra.mxu1 %v2183_v17  ;;  %v334_v39 = vunpack.c.0.s8 %v333_v37  ;;  %vm418_vm2 = vmand %vm416_vm0, %vm417_vm1  ;;  %vm784_vm6 = vsmask.f32 1280  ;;  %vm967_vm8 = vsmask.f32 7942  ;;  %vm1151_vm11 = vsmask.f32 2304 }
  0x37   :  { %251 = vmatprep.subr.bf16.mxu0 %v2185_v18  ;;  %292 = vmatprep.subr.bf16.mxu1 %v2189_v19  ;;  %vm601_vm4 = vmand %vm416_vm0, %vm600_vm3  ;;  %vm1334_vm13 = vsmask.f32 7946  ;;  %vm1517_vm15 = vcmask 1043459   ;;  %vm1518_vm0 = vsmask.f32 3328  ;;  %s1716_s8 = sshll.u32 %s2096_s1, 4  ;;  %s1717_s8 = int_to_ptr.vmem [resolvable:$true] %s1716_s8 }
  0x38   :  { %v2273_v43 = vsub.s32 %v334_v39, %v336_v40  ;;  %v80_v39 = vld [vmem:[#allocation3] sm:$0x3]  ;;  %vm785_vm7 = vmand %vm783_vm5, %vm784_vm6  ;;  %s2057_s9 = scalar_lea.vmem %s1717_s8, 128  ;;  %p2062_p3 = scmp.lt.s32.totalorder %s1717_s8, %s1717_s8 }
  0x39   :  { %vm968_vm9 = vmand %vm783_vm5, %vm967_vm8  ;;  %p2058_p2 = scmp.ne.s32.totalorder %s1717_s8, %s2057_s9  ;;  %p2063_p4 = scmp.lt.s32.totalorder %s2057_s9, %s2057_s9 }
  0x3a   :  { %252 = vmatpush1.bf16.msra.mxu0 %v2191_v20  ;;  %293 = vmatpush1.bf16.msra.mxu1 %v2193_v21  ;;  %vm2496_vm12 = vmand %vm1150_vm10, %vm1151_vm11 }
  0x3b   :  { %253 = vmatprep.subr.bf16.mxu0 %v2197_v22  ;;  %294 = vmatprep.subr.bf16.mxu1 %v2201_v23  ;;  %vm1335_vm14 = vmand %vm1150_vm10, %vm1334_vm13  ;;  %p2064_p5 = por %p2063_p4, %p2062_p3 }
  0x3c   :  { %vm1519_vm1 = vmand %vm1517_vm15, %vm1518_vm0 }
  0x3d   :  { %p2065_p6 = pnand %p2064_p5, %p2058_p2 }
  0x3e   :  { %254 = vmatpush1.bf16.msra.mxu0 %v2205_v24  ;;  %295 = vmatpush1.bf16.msra.mxu1 %v2207_v25 }
  0x3f   :  { %255 = vmatprep.subr.bf16.mxu0 %v2211_v26  ;;  %296 = vmatprep.subr.bf16.mxu1 %v2213_v27 }
  0x42   :  { %256 = vmatpush1.bf16.msra.mxu0 %v2217_v28  ;;  %297 = vmatpush1.bf16.msra.mxu1 %v2219_v29 }
  0x43   :  { %257 = vmatprep.subr.bf16.mxu0 %v2223_v30  ;;  %298 = vmatprep.subr.bf16.mxu1 %v2225_v31 }
  0x46   :  { %258 = vmatpush1.bf16.msra.mxu0 %v2229_v32  ;;  %299 = vmatpush1.bf16.msra.mxu1 %v2231_v33 }
  0x47   :  { %427 = vmatprep.subr.bf16.mxu0 %v2141_v2  ;;  %468 = vmatprep.subr.bf16.mxu1 %v2143_v3 }
  0x49   :  { %276 = vmatmul.mubr.bf16.vlgmr.msra.gmra.mrb[0].mxu0 %v82_v35  ;;  %317 = vmatmul.mubr.bf16.vlgmr.msra.gmra.mrb[0].mxu1 %v82_v35 }
  0x4a   :  { %428 = vmatpush1.bf16.msra.mxu0 %v2146_v4  ;;  %469 = vmatpush1.bf16.msra.mxu1 %v2148_v5 }
  0x4b   :  { %429 = vmatprep.subr.bf16.mxu0 %v2151_v6  ;;  %470 = vmatprep.subr.bf16.mxu1 %v2155_v7 }
  0x4c   :  { %459 = vmatprep.mubr.bf16.mxu0 %v2091_v0  ;;  %500 = vmatprep.mubr.bf16.mxu1 %v2091_v0 }
  0x4e   :  { %430 = vmatpush1.bf16.msra.mxu0 %v2157_v8  ;;  %471 = vmatpush1.bf16.msra.mxu1 %v2160_v9 }
  0x4f   :  { %431 = vmatprep.subr.bf16.mxu0 %v2163_v10  ;;  %472 = vmatprep.subr.bf16.mxu1 %v2165_v11 }
  0x52   :  { %432 = vmatpush1.bf16.msra.mxu0 %v2167_v12  ;;  %473 = vmatpush1.bf16.msra.mxu1 %v2169_v13 }
  0x53   :  { %433 = vmatprep.subr.bf16.mxu0 %v2173_v14  ;;  %474 = vmatprep.subr.bf16.mxu1 %v2177_v15 }
  0x56   :  { %434 = vmatpush1.bf16.msra.mxu0 %v2179_v16  ;;  %475 = vmatpush1.bf16.msra.mxu1 %v2183_v17 }
  0x57   :  { %435 = vmatprep.subr.bf16.mxu0 %v2185_v18  ;;  %476 = vmatprep.subr.bf16.mxu1 %v2189_v19 }
  0x5a   :  { %436 = vmatpush1.bf16.msra.mxu0 %v2191_v20  ;;  %477 = vmatpush1.bf16.msra.mxu1 %v2193_v21 }
  0x5b   :  { %437 = vmatprep.subr.bf16.mxu0 %v2197_v22  ;;  %478 = vmatprep.subr.bf16.mxu1 %v2201_v23 }
  0x5e   :  { %438 = vmatpush1.bf16.msra.mxu0 %v2205_v24  ;;  %479 = vmatpush1.bf16.msra.mxu1 %v2207_v25 }
  0x5f   :  { %439 = vmatprep.subr.bf16.mxu0 %v2211_v26  ;;  %480 = vmatprep.subr.bf16.mxu1 %v2213_v27 }
  0x62   :  { %440 = vmatpush1.bf16.msra.mxu0 %v2217_v28  ;;  %481 = vmatpush1.bf16.msra.mxu1 %v2219_v29 }
  0x63   :  { %441 = vmatprep.subr.bf16.mxu0 %v2223_v30  ;;  %482 = vmatprep.subr.bf16.mxu1 %v2225_v31 }
  0x66   :  { %442 = vmatpush1.bf16.msra.mxu0 %v2229_v32  ;;  %483 = vmatpush1.bf16.msra.mxu1 %v2231_v33 }
  0x67   :  { %610 = vmatprep.subr.bf16.mxu0 %v2141_v2  ;;  %651 = vmatprep.subr.bf16.mxu1 %v2143_v3 }
 0x11c   :  { %v277_v41 = vpop.f32.mrb[0].mxu0  ;;  %v318_v42 = vpop.f32.mrb[0].mxu1 }
 0x11d   :  { %v279_v44 = vpop.f32.mrb[1].mxu0  ;;  %v320_v46 = vpop.f32.mrb[1].mxu1 }
 0x11e   :  { %v330_v47 = vcombine.low %v277_v41, %v279_v44  ;;  %v331_v48 = vcombine.low %v318_v42, %v320_v46  ;;  %v281_v49 = vpop.f32.mrb[2].mxu0  ;;  %v322_v50 = vpop.f32.mrb[2].mxu1 }
 0x11f   :  { %v282_v51 = vpop.f32.mrb[3].mxu0  ;;  %v323_v52 = vpop.f32.mrb[3].mxu1  ;;  %v2094_v49 = vmov 1966171168  }
 0x120   :  { %v338_v53 = vrot.slane %v330_v47, %v2273_v43  ;;  %v345_v55 = vrot.slane %v331_v48, %v2273_v43  ;;  %v383_v50 = vunpack.c.l.s4 %v2094_v49 }
 0x122   :  { %v346_v56 = vcombine.low %v338_v53, %v345_v55  ;;  %v384_v51 = vunpack.c.0.s8 %v383_v50  ;;  %v2095_v53 = vmov 286326784  }
 0x124   :  { %v348_v57 = vadd.f32 %v346_v56, %v325_v54  ;;  %v401_v54 = vunpack.c.l.s4 %v2095_v53  ;;  %v2283_v56 = vsub.s32 %v384_v51, %v336_v40 }
 0x126   :  { %v1761_v58 = vmul.f32 -1.442695, %v348_v57  ;;  %v356_v59 = vrot.slane %v348_v57, 2  ;;  %v367_v61 = vrot.slane %v348_v57, 6  ;;  %v364_v1 = vrot.slane %v348_v57, 4 }
 0x128   :  { %1853 = vpow2.f32 %v1761_v58  ;;  %v1762_v60 = vmul.f32 -1.442695, %v356_v59  ;;  %v1763_v62 = vmul.f32 -1.442695, %v367_v61  ;;  %v402_v58 = vunpack.c.0.s8 %v401_v54 }
 0x12a   :  { %1855 = vpow2.f32 %v1762_v60  ;;  %v2288_v61 = vsub.s32 %v402_v58, %v336_v40 }
 0x12b   :  { %1857 = vpow2.f32 %v1763_v62 }
 0x132   :  { %v1854_v63 = vpop.eup %1853 }
 0x133   :  { %v352_v34 = vadd.f32 1.0, %v1854_v63 }
 0x134   :  { %v1856_v35 = vpop.eup %1855 }
 0x135   :  { %1859 = vrcp.f32 %v352_v34  ;;  %v361_v36 = vadd.f32 1.0, %v1856_v35  ;;  %v1858_v37 = vpop.eup %1857  ;;  %v419_v34 = vld [vmem:[#allocation9] sm:$0x1] }
 0x136   :  { %1861 = vtanh.f32 %v364_v1  ;;  %v372_v44 = vadd.f32 1.0, %v1858_v37 }
 0x137   :  { %1863 = vrcp.f32 %v361_v36  ;;  %v422_v36 = vld [vmem:[#allocation9 + $0x4] sm:$0x1] }
 0x138   :  { %1865 = vrcp.f32 %v372_v44 }
 0x13f   :  { %v1860_v38 = vpop.eup %1859 }
 0x140   :  { %v1862_v41 = vpop.eup %1861 }
 0x141   :  { %v1864_v42 = vpop.eup %1863  ;;  %v376_v47 = vmul.f32 %v1862_v41, %v1860_v38 }
 0x142   :  { %v375_v46 = vmul.f32 %v1864_v42, %v80_v39  ;;  %v1866_v52 = vpop.eup %1865 }
 0x144   :  { %v2280_v48 = vadd.f32 %v376_v47, %v375_v46 }
 0x146   :  { %1867 = vtanh.f32 %v2280_v48 }
 0x150   :  { %v1868_v55 = vpop.eup %1867 }
 0x151   :  { %v379_v57 = vmul.f32 %v1868_v55, %v1866_v52  ;;  %v509_v55 = vunpack.c.h.bf16 %v2275_v45 }
 0x153   :  { %v380_v59 = vpack.c.bf16 %v379_v57, %v379_v57 }
 0x155   :  { %v388_v60 = vrot.slane %v380_v59, %v2283_v56  ;;  %460 = vmatmul.mubr.bf16.vlgmr.msra.gmra.mrb[4].mxu0 %v380_v59  ;;  %501 = vmatmul.mubr.bf16.vlgmr.msra.gmra.mrb[4].mxu1 %v380_v59 }
 0x156   :  { %611 = vmatpush1.bf16.msra.mxu0 %v2146_v4  ;;  %652 = vmatpush1.bf16.msra.mxu1 %v2148_v5 }
 0x157   :  { %v395_v62 = vrot.slane %v388_v60, %v2283_v56  ;;  %612 = vmatprep.subr.bf16.mxu0 %v2151_v6  ;;  %653 = vmatprep.subr.bf16.mxu1 %v2155_v7 }
 0x158   :  { %642 = vmatprep.mubr.bf16.mxu0 %v2091_v0  ;;  %683 = vmatprep.mubr.bf16.mxu1 %v2091_v0 }
 0x159   :  { %v397_v63 = vunpack.i.h.s16 %v395_v62  ;;  %v1764_v1 = vpack.i.b16 %v395_v62, %v395_v62 }
 0x15a   :  { %613 = vmatpush1.bf16.msra.mxu0 %v2157_v8  ;;  %654 = vmatpush1.bf16.msra.mxu1 %v2160_v9 }
 0x15b   :  { %v399_v40 = vpack.i.b16 %v397_v63, %v397_v63  ;;  %v406_v35 = vrot.slane %v1764_v1, %v2288_v61  ;;  %614 = vmatprep.subr.bf16.mxu0 %v2163_v10  ;;  %655 = vmatprep.subr.bf16.mxu1 %v2165_v11 }
 0x15d   :  { %v413_v37 = vrot.slane %v399_v40, %v2288_v61  ;;  %v420_v38 = vsel %vm418_vm2, %v406_v35, %v419_v34 }
 0x15e   :  { %421 = vst [vmem:[#allocation9] sm:$0x1] %v420_v38  ;;  %615 = vmatpush1.bf16.msra.mxu0 %v2167_v12  ;;  %656 = vmatpush1.bf16.msra.mxu1 %v2169_v13 }
 0x15f   :  { %v423_v39 = vsel %vm418_vm2, %v413_v37, %v422_v36  ;;  %616 = vmatprep.subr.bf16.mxu0 %v2173_v14  ;;  %657 = vmatprep.subr.bf16.mxu1 %v2177_v15  ;;  %vm1701_vm2 = vsmask.f32 7950 }
 0x160   :  { %424 = vst [vmem:[#allocation9 + $0x4] sm:$0x1] %v423_v39  ;;  %vm1702_vm3 = vmand %vm1517_vm15, %vm1701_vm2 }
 0x162   :  { %617 = vmatpush1.bf16.msra.mxu0 %v2179_v16  ;;  %658 = vmatpush1.bf16.msra.mxu1 %v2183_v17 }
 0x163   :  { %618 = vmatprep.subr.bf16.mxu0 %v2185_v18  ;;  %659 = vmatprep.subr.bf16.mxu1 %v2189_v19 }
 0x166   :  { %619 = vmatpush1.bf16.msra.mxu0 %v2191_v20  ;;  %660 = vmatpush1.bf16.msra.mxu1 %v2193_v21 }
 0x167   :  { %620 = vmatprep.subr.bf16.mxu0 %v2197_v22  ;;  %661 = vmatprep.subr.bf16.mxu1 %v2201_v23 }
 0x16a   :  { %621 = vmatpush1.bf16.msra.mxu0 %v2205_v24  ;;  %662 = vmatpush1.bf16.msra.mxu1 %v2207_v25 }
 0x16b   :  { %622 = vmatprep.subr.bf16.mxu0 %v2211_v26  ;;  %663 = vmatprep.subr.bf16.mxu1 %v2213_v27 }
 0x16e   :  { %623 = vmatpush1.bf16.msra.mxu0 %v2217_v28  ;;  %664 = vmatpush1.bf16.msra.mxu1 %v2219_v29 }
 0x16f   :  { %624 = vmatprep.subr.bf16.mxu0 %v2223_v30  ;;  %665 = vmatprep.subr.bf16.mxu1 %v2225_v31 }
 0x172   :  { %625 = vmatpush1.bf16.msra.mxu0 %v2229_v32  ;;  %666 = vmatpush1.bf16.msra.mxu1 %v2231_v33 }
 0x173   :  { %794 = vmatprep.subr.bf16.mxu0 %v2141_v2  ;;  %835 = vmatprep.subr.bf16.mxu1 %v2143_v3 }
 0x228   :  { %v461_v41 = vpop.f32.mrb[4].mxu0  ;;  %v502_v42 = vpop.f32.mrb[4].mxu1 }
 0x229   :  { %v463_v44 = vpop.f32.mrb[5].mxu0  ;;  %v504_v46 = vpop.f32.mrb[5].mxu1 }
 0x22a   :  { %v514_v47 = vcombine.low %v461_v41, %v463_v44  ;;  %v515_v49 = vcombine.low %v502_v42, %v504_v46  ;;  %v465_v50 = vpop.f32.mrb[6].mxu0  ;;  %v506_v51 = vpop.f32.mrb[6].mxu1 }
 0x22b   :  { %v466_v52 = vpop.f32.mrb[7].mxu0  ;;  %v507_v53 = vpop.f32.mrb[7].mxu1 }
 0x22c   :  { %v522_v54 = vrot.slane %v514_v47, %v2273_v43  ;;  %v529_v57 = vrot.slane %v515_v49, %v2273_v43 }
 0x22e   :  { %v530_v58 = vcombine.low %v522_v54, %v529_v57 }
 0x230   :  { %v532_v59 = vadd.f32 %v530_v58, %v509_v55 }
 0x232   :  { %v1765_v60 = vmul.f32 -1.442695, %v532_v59  ;;  %v540_v62 = vrot.slane %v532_v59, 2  ;;  %v551_v1 = vrot.slane %v532_v59, 6  ;;  %v548_v35 = vrot.slane %v532_v59, 4 }
 0x234   :  { %1869 = vpow2.f32 %v1765_v60  ;;  %v1766_v63 = vmul.f32 -1.442695, %v540_v62  ;;  %v1767_v34 = vmul.f32 -1.442695, %v551_v1  ;;  %v602_v60 = vld [vmem:[#allocation9] sm:$0x1] }
 0x235   :  { %v605_v1 = vld [vmem:[#allocation9 + $0x4] sm:$0x1] }
 0x236   :  { %1871 = vpow2.f32 %v1766_v63 }
 0x237   :  { %1873 = vpow2.f32 %v1767_v34 }
 0x23e   :  { %v1870_v40 = vpop.eup %1869 }
 0x23f   :  { %v536_v36 = vadd.f32 1.0, %v1870_v40 }
 0x240   :  { %v1872_v37 = vpop.eup %1871 }
 0x241   :  { %1875 = vrcp.f32 %v536_v36  ;;  %v545_v38 = vadd.f32 1.0, %v1872_v37  ;;  %v1874_v45 = vpop.eup %1873  ;;  %v2372_v37 = vld [vmem:[#allocation4 + $0x8] sm:$0xff]  }
 0x242   :  { %1877 = vtanh.f32 %v548_v35  ;;  %v556_v44 = vadd.f32 1.0, %v1874_v45 }
 0x243   :  { %1879 = vrcp.f32 %v545_v38 }
 0x244   :  { %1881 = vrcp.f32 %v556_v44 }
 0x24b   :  { %v1876_v39 = vpop.eup %1875 }
 0x24c   :  { %v1878_v41 = vpop.eup %1877 }
 0x24d   :  { %v1880_v42 = vpop.eup %1879  ;;  %v560_v47 = vmul.f32 %v1878_v41, %v1876_v39 }
 0x24e   :  { %v559_v46 = vmul.f32 %v1880_v42, %v2280_v48  ;;  %v1882_v50 = vpop.eup %1881 }
 0x250   :  { %v2330_v49 = vadd.f32 %v560_v47, %v559_v46 }
 0x252   :  { %1883 = vtanh.f32 %v2330_v49 }
 0x25c   :  { %v1884_v51 = vpop.eup %1883 }
 0x25d   :  { %v563_v52 = vmul.f32 %v1884_v51, %v1882_v50  ;;  %v692_v50 = vunpack.c.l.bf16 %v2372_v37 }
 0x25f   :  { %v564_v53 = vpack.c.bf16 %v563_v52, %v563_v52 }
 0x261   :  { %v572_v54 = vrot.slane %v564_v53, %v2283_v56  ;;  %643 = vmatmul.mubr.bf16.vlgmr.msra.gmra.mrb[8].mxu0 %v564_v53  ;;  %684 = vmatmul.mubr.bf16.vlgmr.msra.gmra.mrb[8].mxu1 %v564_v53 }
 0x262   :  { %795 = vmatpush1.bf16.msra.mxu0 %v2146_v4  ;;  %836 = vmatpush1.bf16.msra.mxu1 %v2148_v5 }
 0x263   :  { %v579_v48 = vrot.slane %v572_v54, %v2283_v56  ;;  %796 = vmatprep.subr.bf16.mxu0 %v2151_v6  ;;  %837 = vmatprep.subr.bf16.mxu1 %v2155_v7 }
 0x264   :  { %826 = vmatprep.mubr.bf16.mxu0 %v2091_v0  ;;  %867 = vmatprep.mubr.bf16.mxu1 %v2091_v0 }
 0x265   :  { %v581_v55 = vunpack.i.h.s16 %v579_v48  ;;  %v1768_v57 = vpack.i.b16 %v579_v48, %v579_v48 }
 0x266   :  { %797 = vmatpush1.bf16.msra.mxu0 %v2157_v8  ;;  %838 = vmatpush1.bf16.msra.mxu1 %v2160_v9 }
 0x267   :  { %v583_v58 = vpack.i.b16 %v581_v55, %v581_v55  ;;  %v590_v59 = vrot.slane %v1768_v57, %v2288_v61  ;;  %798 = vmatprep.subr.bf16.mxu0 %v2163_v10  ;;  %839 = vmatprep.subr.bf16.mxu1 %v2165_v11 }
 0x269   :  { %v597_v62 = vrot.slane %v583_v58, %v2288_v61  ;;  %v603_v63 = vsel %vm601_vm4, %v590_v59, %v602_v60 }
 0x26a   :  { %604 = vst [vmem:[#allocation9] sm:$0x1] %v603_v63  ;;  %799 = vmatpush1.bf16.msra.mxu0 %v2167_v12  ;;  %840 = vmatpush1.bf16.msra.mxu1 %v2169_v13 }
 0x26b   :  { %v606_v34 = vsel %vm601_vm4, %v597_v62, %v605_v1  ;;  %800 = vmatprep.subr.bf16.mxu0 %v2173_v14  ;;  %841 = vmatprep.subr.bf16.mxu1 %v2177_v15 }
 0x26c   :  { %607 = vst [vmem:[#allocation9 + $0x4] sm:$0x1] %v606_v34 }
 0x26e   :  { %801 = vmatpush1.bf16.msra.mxu0 %v2179_v16  ;;  %842 = vmatpush1.bf16.msra.mxu1 %v2183_v17 }
 0x26f   :  { %802 = vmatprep.subr.bf16.mxu0 %v2185_v18  ;;  %843 = vmatprep.subr.bf16.mxu1 %v2189_v19 }
 0x272   :  { %803 = vmatpush1.bf16.msra.mxu0 %v2191_v20  ;;  %844 = vmatpush1.bf16.msra.mxu1 %v2193_v21 }
 0x273   :  { %804 = vmatprep.subr.bf16.mxu0 %v2197_v22  ;;  %845 = vmatprep.subr.bf16.mxu1 %v2201_v23 }
 0x276   :  { %805 = vmatpush1.bf16.msra.mxu0 %v2205_v24  ;;  %846 = vmatpush1.bf16.msra.mxu1 %v2207_v25 }
 0x277   :  { %806 = vmatprep.subr.bf16.mxu0 %v2211_v26  ;;  %847 = vmatprep.subr.bf16.mxu1 %v2213_v27 }
 0x27a   :  { %807 = vmatpush1.bf16.msra.mxu0 %v2217_v28  ;;  %848 = vmatpush1.bf16.msra.mxu1 %v2219_v29 }
 0x27b   :  { %808 = vmatprep.subr.bf16.mxu0 %v2223_v30  ;;  %849 = vmatprep.subr.bf16.mxu1 %v2225_v31 }
 0x27e   :  { %809 = vmatpush1.bf16.msra.mxu0 %v2229_v32  ;;  %850 = vmatpush1.bf16.msra.mxu1 %v2231_v33 }
 0x27f   :  { %977 = vmatprep.subr.bf16.mxu0 %v2141_v2  ;;  %1018 = vmatprep.subr.bf16.mxu1 %v2143_v3 }
 0x334   :  { %v644_v40 = vpop.f32.mrb[8].mxu0  ;;  %v685_v35 = vpop.f32.mrb[8].mxu1 }
 0x335   :  { %v646_v36 = vpop.f32.mrb[9].mxu0  ;;  %v687_v38 = vpop.f32.mrb[9].mxu1 }
 0x336   :  { %v697_v45 = vcombine.low %v644_v40, %v646_v36  ;;  %v698_v39 = vcombine.low %v685_v35, %v687_v38  ;;  %v648_v41 = vpop.f32.mrb[10].mxu0  ;;  %v689_v42 = vpop.f32.mrb[10].mxu1 }
 0x337   :  { %v649_v44 = vpop.f32.mrb[11].mxu0  ;;  %v690_v46 = vpop.f32.mrb[11].mxu1 }
 0x338   :  { %v705_v47 = vrot.slane %v697_v45, %v2273_v43  ;;  %v712_v51 = vrot.slane %v698_v39, %v2273_v43 }
 0x33a   :  { %v713_v52 = vcombine.low %v705_v47, %v712_v51 }
 0x33c   :  { %v715_v53 = vadd.f32 %v713_v52, %v692_v50 }
 0x33e   :  { %v1769_v54 = vmul.f32 -1.442695, %v715_v53  ;;  %v723_v48 = vrot.slane %v715_v53, 2  ;;  %v734_v57 = vrot.slane %v715_v53, 6  ;;  %v731_v60 = vrot.slane %v715_v53, 4 }
 0x33f   :  { %v786_v53 = vld [vmem:[#allocation9] sm:$0x2] }
 0x340   :  { %1885 = vpow2.f32 %v1769_v54  ;;  %v1770_v55 = vmul.f32 -1.442695, %v723_v48  ;;  %v1771_v58 = vmul.f32 -1.442695, %v734_v57 }
 0x342   :  { %1887 = vpow2.f32 %v1770_v55  ;;  %v789_v55 = vld [vmem:[#allocation9 + $0x4] sm:$0x2] }
 0x343   :  { %1889 = vpow2.f32 %v1771_v58 }
 0x34a   :  { %v1886_v59 = vpop.eup %1885 }
 0x34b   :  { %v719_v62 = vadd.f32 1.0, %v1886_v59 }
 0x34c   :  { %v1888_v63 = vpop.eup %1887 }
 0x34d   :  { %1891 = vrcp.f32 %v719_v62  ;;  %v728_v1 = vadd.f32 1.0, %v1888_v63  ;;  %v1890_v34 = vpop.eup %1889 }
 0x34e   :  { %1893 = vtanh.f32 %v731_v60  ;;  %v739_v38 = vadd.f32 1.0, %v1890_v34 }
 0x34f   :  { %1895 = vrcp.f32 %v728_v1 }
 0x350   :  { %1897 = vrcp.f32 %v739_v38 }
 0x357   :  { %v1892_v40 = vpop.eup %1891 }
 0x358   :  { %v1894_v35 = vpop.eup %1893 }
 0x359   :  { %v1896_v36 = vpop.eup %1895  ;;  %v743_v39 = vmul.f32 %v1894_v35, %v1892_v40 }
 0x35a   :  { %v742_v45 = vmul.f32 %v1896_v36, %v2330_v49  ;;  %v1898_v42 = vpop.eup %1897 }
 0x35c   :  { %v2378_v41 = vadd.f32 %v743_v39, %v742_v45 }
 0x35e   :  { %1899 = vtanh.f32 %v2378_v41 }
 0x368   :  { %v1900_v44 = vpop.eup %1899 }
 0x369   :  { %v746_v46 = vmul.f32 %v1900_v44, %v1898_v42  ;;  %v876_v42 = vunpack.c.h.bf16 %v2372_v37 }
 0x36b   :  { %v747_v47 = vpack.c.bf16 %v746_v46, %v746_v46 }
 0x36d   :  { %v755_v50 = vrot.slane %v747_v47, %v2283_v56  ;;  %827 = vmatmul.mubr.bf16.vlgmr.msra.gmra.mrb[12].mxu0 %v747_v47  ;;  %868 = vmatmul.mubr.bf16.vlgmr.msra.gmra.mrb[12].mxu1 %v747_v47 }
 0x36e   :  { %978 = vmatpush1.bf16.msra.mxu0 %v2146_v4  ;;  %1019 = vmatpush1.bf16.msra.mxu1 %v2148_v5 }
 0x36f   :  { %v762_v49 = vrot.slane %v755_v50, %v2283_v56  ;;  %979 = vmatprep.subr.bf16.mxu0 %v2151_v6  ;;  %1020 = vmatprep.subr.bf16.mxu1 %v2155_v7 }
 0x370   :  { %1009 = vmatprep.mubr.bf16.mxu0 %v2091_v0  ;;  %1050 = vmatprep.mubr.bf16.mxu1 %v2091_v0 }
 0x371   :  { %v764_v51 = vunpack.i.h.s16 %v762_v49  ;;  %v1772_v52 = vpack.i.b16 %v762_v49, %v762_v49 }
 0x372   :  { %980 = vmatpush1.bf16.msra.mxu0 %v2157_v8  ;;  %1021 = vmatpush1.bf16.msra.mxu1 %v2160_v9 }
 0x373   :  { %v766_v54 = vpack.i.b16 %v764_v51, %v764_v51  ;;  %v773_v48 = vrot.slane %v1772_v52, %v2288_v61  ;;  %981 = vmatprep.subr.bf16.mxu0 %v2163_v10  ;;  %1022 = vmatprep.subr.bf16.mxu1 %v2165_v11 }
 0x375   :  { %v780_v57 = vrot.slane %v766_v54, %v2288_v61  ;;  %v787_v58 = vsel %vm785_vm7, %v773_v48, %v786_v53 }
 0x376   :  { %788 = vst [vmem:[#allocation9] sm:$0x2] %v787_v58  ;;  %982 = vmatpush1.bf16.msra.mxu0 %v2167_v12  ;;  %1023 = vmatpush1.bf16.msra.mxu1 %v2169_v13 }
 0x377   :  { %v790_v59 = vsel %vm785_vm7, %v780_v57, %v789_v55  ;;  %983 = vmatprep.subr.bf16.mxu0 %v2173_v14  ;;  %1024 = vmatprep.subr.bf16.mxu1 %v2177_v15 }
 0x378   :  { %791 = vst [vmem:[#allocation9 + $0x4] sm:$0x2] %v790_v59 }
 0x37a   :  { %984 = vmatpush1.bf16.msra.mxu0 %v2179_v16  ;;  %1025 = vmatpush1.bf16.msra.mxu1 %v2183_v17 }
 0x37b   :  { %985 = vmatprep.subr.bf16.mxu0 %v2185_v18  ;;  %1026 = vmatprep.subr.bf16.mxu1 %v2189_v19 }
 0x37e   :  { %986 = vmatpush1.bf16.msra.mxu0 %v2191_v20  ;;  %1027 = vmatpush1.bf16.msra.mxu1 %v2193_v21 }
 0x37f   :  { %987 = vmatprep.subr.bf16.mxu0 %v2197_v22  ;;  %1028 = vmatprep.subr.bf16.mxu1 %v2201_v23 }
 0x382   :  { %988 = vmatpush1.bf16.msra.mxu0 %v2205_v24  ;;  %1029 = vmatpush1.bf16.msra.mxu1 %v2207_v25 }
 0x383   :  { %989 = vmatprep.subr.bf16.mxu0 %v2211_v26  ;;  %1030 = vmatprep.subr.bf16.mxu1 %v2213_v27 }
 0x386   :  { %990 = vmatpush1.bf16.msra.mxu0 %v2217_v28  ;;  %1031 = vmatpush1.bf16.msra.mxu1 %v2219_v29 }
 0x387   :  { %991 = vmatprep.subr.bf16.mxu0 %v2223_v30  ;;  %1032 = vmatprep.subr.bf16.mxu1 %v2225_v31 }
 0x38a   :  { %992 = vmatpush1.bf16.msra.mxu0 %v2229_v32  ;;  %1033 = vmatpush1.bf16.msra.mxu1 %v2231_v33 }
 0x38b   :  { %1161 = vmatprep.subr.bf16.mxu0 %v2141_v2  ;;  %1202 = vmatprep.subr.bf16.mxu1 %v2143_v3 }
 0x440   :  { %v828_v60 = vpop.f32.mrb[12].mxu0  ;;  %v869_v62 = vpop.f32.mrb[12].mxu1 }
 0x441   :  { %v830_v63 = vpop.f32.mrb[13].mxu0  ;;  %v871_v1 = vpop.f32.mrb[13].mxu1 }
 0x442   :  { %v881_v34 = vcombine.low %v828_v60, %v830_v63  ;;  %v882_v40 = vcombine.low %v869_v62, %v871_v1  ;;  %v832_v35 = vpop.f32.mrb[14].mxu0  ;;  %v873_v36 = vpop.f32.mrb[14].mxu1 }
 0x443   :  { %v833_v38 = vpop.f32.mrb[15].mxu0  ;;  %v874_v45 = vpop.f32.mrb[15].mxu1 }
 0x444   :  { %v889_v39 = vrot.slane %v881_v34, %v2273_v43  ;;  %v896_v44 = vrot.slane %v882_v40, %v2273_v43 }
 0x446   :  { %v897_v46 = vcombine.low %v889_v39, %v896_v44  ;;  %v972_v44 = vld [vmem:[#allocation9 + $0x4] sm:$0x2] }
 0x448   :  { %v899_v2 = vadd.f32 %v897_v46, %v876_v42 }
 0x44a   :  { %v1773_v47 = vmul.f32 -1.442695, %v899_v2  ;;  %v907_v3 = vrot.slane %v899_v2, 2  ;;  %v918_v49 = vrot.slane %v899_v2, 6  ;;  %v915_v53 = vrot.slane %v899_v2, 4 }
 0x44c   :  { %1901 = vpow2.f32 %v1773_v47  ;;  %v1774_v50 = vmul.f32 -1.442695, %v907_v3  ;;  %v1775_v51 = vmul.f32 -1.442695, %v918_v49 }
 0x44e   :  { %1903 = vpow2.f32 %v1774_v50 }
 0x44f   :  { %1905 = vpow2.f32 %v1775_v51 }
 0x456   :  { %v1902_v52 = vpop.eup %1901 }
 0x457   :  { %v903_v54 = vadd.f32 1.0, %v1902_v52 }
 0x458   :  { %v1904_v48 = vpop.eup %1903 }
 0x459   :  { %1907 = vrcp.f32 %v903_v54  ;;  %v912_v55 = vadd.f32 1.0, %v1904_v48  ;;  %v1906_v37 = vpop.eup %1905 }
 0x45a   :  { %1909 = vtanh.f32 %v915_v53  ;;  %v923_v60 = vadd.f32 1.0, %v1906_v37 }
 0x45b   :  { %1911 = vrcp.f32 %v912_v55 }
 0x45c   :  { %1913 = vrcp.f32 %v923_v60  ;;  %v2480_v60 = vld [vmem:[#allocation7] ss:$16 sps:$4 sm:$0xff]  }
 0x463   :  { %v1908_v57 = vpop.eup %1907 }
 0x464   :  { %v1910_v58 = vpop.eup %1909 }
 0x465   :  { %v1912_v59 = vpop.eup %1911  ;;  %v927_v63 = vmul.f32 %v1910_v58, %v1908_v57 }
 0x466   :  { %v926_v62 = vmul.f32 %v1912_v59, %v2378_v41  ;;  %v1914_v34 = vpop.eup %1913 }
 0x468   :  { %v2424_v1 = vadd.f32 %v927_v63, %v926_v62  ;;  %v2483_v62 = vld [vmem:[#allocation7 + $0x8] ss:$16 sps:$4 sm:$0xff]  }
 0x46a   :  { %1915 = vtanh.f32 %v2424_v1 }
 0x474   :  { %v1916_v40 = vpop.eup %1915 }
 0x475   :  { %v930_v35 = vmul.f32 %v1916_v40, %v1914_v34  ;;  %v2490_v34 = vld [vmem:[#allocation7 + $0x2c] ss:$16 sps:$4 sm:$0xff]  }
 0x477   :  { %v931_v36 = vpack.c.bf16 %v930_v35, %v930_v35 }
 0x479   :  { %v939_v38 = vrot.slane %v931_v36, %v2283_v56  ;;  %1010 = vmatmul.mubr.bf16.vlgmr.msra.gmra.mrb[16].mxu0 %v931_v36  ;;  %1051 = vmatmul.mubr.bf16.vlgmr.msra.gmra.mrb[16].mxu1 %v931_v36 }
 0x47a   :  { %1162 = vmatpush1.bf16.msra.mxu0 %v2146_v4  ;;  %1203 = vmatpush1.bf16.msra.mxu1 %v2148_v5 }
 0x47b   :  { %v946_v41 = vrot.slane %v939_v38, %v2283_v56  ;;  %1163 = vmatprep.subr.bf16.mxu0 %v2151_v6  ;;  %1204 = vmatprep.subr.bf16.mxu1 %v2155_v7  ;;  %v969_v6 = vld [vmem:[#allocation9] sm:$0x2]  ;;  %v1153_v38 = vld [vmem:[#allocation9] sm:$0x4] }
 0x47c   :  { %1193 = vmatprep.mubr.bf16.mxu0 %v2091_v0  ;;  %1234 = vmatprep.mubr.bf16.mxu1 %v2091_v0 }
 0x47d   :  { %v948_v45 = vunpack.i.h.s16 %v946_v41  ;;  %v1776_v39 = vpack.i.b16 %v946_v41, %v946_v41  ;;  %v2500_v41 = vld [vmem:[#allocation7 + $0x20] ss:$16 sps:$4 sm:$0xff]  }
 0x47e   :  { %1164 = vmatpush1.bf16.msra.mxu0 %v2157_v8  ;;  %1205 = vmatpush1.bf16.msra.mxu1 %v2160_v9  ;;  %v2464_v9 = vld [vmem:[#allocation7 + $0x4] ss:$16 sps:$4 sm:$0xff]  }
 0x47f   :  { %v950_v4 = vpack.i.b16 %v948_v45, %v948_v45  ;;  %v957_v5 = vrot.slane %v1776_v39, %v2288_v61  ;;  %1165 = vmatprep.subr.bf16.mxu0 %v2163_v10  ;;  %1206 = vmatprep.subr.bf16.mxu1 %v2165_v11  ;;  %v2467_v10 = vld [vmem:[#allocation7 + $0xc] ss:$16 sps:$4 sm:$0xff]   ;;  %v2503_v45 = vld [vmem:[#allocation7 + $0x28] ss:$16 sps:$4 sm:$0xff]  }
 0x481   :  { %v964_v7 = vrot.slane %v950_v4, %v2288_v61  ;;  %v970_v42 = vsel %vm968_vm9, %v957_v5, %v969_v6  ;;  %v2507_v5 = vld [vmem:[#allocation7 + $0x44] ss:$16 sps:$4 sm:$0xff]   ;;  %v2510_v6 = vld [vmem:[#allocation7 + $0x4c] ss:$16 sps:$4 sm:$0xff]  }
 0x482   :  { %971 = vst [vmem:[#allocation9] sm:$0x2] %v970_v42  ;;  %1166 = vmatpush1.bf16.msra.mxu0 %v2167_v12  ;;  %1207 = vmatpush1.bf16.msra.mxu1 %v2169_v13 }
 0x483   :  { %v973_v8 = vsel %vm968_vm9, %v964_v7, %v972_v44  ;;  %1167 = vmatprep.subr.bf16.mxu0 %v2173_v14  ;;  %1208 = vmatprep.subr.bf16.mxu1 %v2177_v15  ;;  %v2470_v14 = vld [vmem:[#allocation4 + $0x10] sm:$0xff]   ;;  %v1156_v7 = vld [vmem:[#allocation9 + $0x4] sm:$0x4] }
 0x484   :  { %974 = vst [vmem:[#allocation9 + $0x4] sm:$0x2] %v973_v8  ;;  %v2516_v8 = vld [vmem:[#allocation7 + $0x40] ss:$16 sps:$4 sm:$0xff]  }
 0x486   :  { %1168 = vmatpush1.bf16.msra.mxu0 %v2179_v16  ;;  %1209 = vmatpush1.bf16.msra.mxu1 %v2183_v17 }
 0x487   :  { %1169 = vmatprep.subr.bf16.mxu0 %v2185_v18  ;;  %1210 = vmatprep.subr.bf16.mxu1 %v2189_v19 }
 0x48a   :  { %1170 = vmatpush1.bf16.msra.mxu0 %v2191_v20  ;;  %1211 = vmatpush1.bf16.msra.mxu1 %v2193_v21 }
 0x48b   :  { %1171 = vmatprep.subr.bf16.mxu0 %v2197_v22  ;;  %1212 = vmatprep.subr.bf16.mxu1 %v2201_v23  ;;  %v1059_v23 = vunpack.c.l.bf16 %v2470_v14 }
 0x48e   :  { %1172 = vmatpush1.bf16.msra.mxu0 %v2205_v24  ;;  %1213 = vmatpush1.bf16.msra.mxu1 %v2207_v25 }
 0x48f   :  { %1173 = vmatprep.subr.bf16.mxu0 %v2211_v26  ;;  %1214 = vmatprep.subr.bf16.mxu1 %v2213_v27 }
 0x492   :  { %1174 = vmatpush1.bf16.msra.mxu0 %v2217_v28  ;;  %1215 = vmatpush1.bf16.msra.mxu1 %v2219_v29 }
 0x493   :  { %1175 = vmatprep.subr.bf16.mxu0 %v2223_v30  ;;  %1216 = vmatprep.subr.bf16.mxu1 %v2225_v31 }
 0x496   :  { %1176 = vmatpush1.bf16.msra.mxu0 %v2229_v32  ;;  %1217 = vmatpush1.bf16.msra.mxu1 %v2231_v33 }
 0x497   :  { %1344 = vmatprep.subr.bf16.mxu0 %v2464_v9  ;;  %1385 = vmatprep.subr.bf16.mxu1 %v2467_v10 }
 0x54c   :  { %v1011_v11 = vpop.f32.mrb[16].mxu0  ;;  %v1052_v12 = vpop.f32.mrb[16].mxu1 }
 0x54d   :  { %v1013_v13 = vpop.f32.mrb[17].mxu0  ;;  %v1054_v15 = vpop.f32.mrb[17].mxu1 }
 0x54e   :  { %v1064_v16 = vcombine.low %v1011_v11, %v1013_v13  ;;  %v1065_v17 = vcombine.low %v1052_v12, %v1054_v15  ;;  %v1015_v18 = vpop.f32.mrb[18].mxu0  ;;  %v1056_v19 = vpop.f32.mrb[18].mxu1  ;;  %v2519_v11 = vld [vmem:[#allocation7 + $0x48] ss:$16 sps:$4 sm:$0xff]   ;;  %v2524_v13 = vld [vmem:[#allocation7 + $0x64] ss:$16 sps:$4 sm:$0xff]  }
 0x54f   :  { %v1016_v20 = vpop.f32.mrb[19].mxu0  ;;  %v1057_v21 = vpop.f32.mrb[19].mxu1  ;;  %v2527_v15 = vld [vmem:[#allocation7 + $0x6c] ss:$16 sps:$4 sm:$0xff]   ;;  %v2536_v18 = vld [vmem:[#allocation7 + $0x84] ss:$16 sps:$4 sm:$0xff]  }
 0x550   :  { %v1072_v22 = vrot.slane %v1064_v16, %v2273_v43  ;;  %v1079_v24 = vrot.slane %v1065_v17, %v2273_v43  ;;  %v2530_v16 = vld [vmem:[#allocation7 + $0x60] ss:$16 sps:$4 sm:$0xff]   ;;  %v2533_v17 = vld [vmem:[#allocation7 + $0x68] ss:$16 sps:$4 sm:$0xff]   ;;  %v2539_v19 = vld [vmem:[#allocation7 + $0x8c] ss:$16 sps:$4 sm:$0xff]  }
 0x551   :  { %v2542_v20 = vld [vmem:[#allocation7 + $0x80] ss:$16 sps:$4 sm:$0xff]   ;;  %v2545_v21 = vld [vmem:[#allocation7 + $0x88] ss:$16 sps:$4 sm:$0xff]  }
 0x552   :  { %v1080_v25 = vcombine.low %v1072_v22, %v1079_v24  ;;  %v2548_v22 = vld [vmem:[#allocation7 + $0xa4] ss:$16 sps:$4 sm:$0xff]   ;;  %v2554_v24 = vld [vmem:[#allocation7 + $0xa0] ss:$16 sps:$4 sm:$0xff]  }
 0x554   :  { %v1082_v26 = vadd.f32 %v1080_v25, %v1059_v23  ;;  %v2551_v23 = vld [vmem:[#allocation7 + $0xac] ss:$16 sps:$4 sm:$0xff]   ;;  %v2557_v25 = vld [vmem:[#allocation7 + $0xa8] ss:$16 sps:$4 sm:$0xff]  }
 0x556   :  { %v1777_v27 = vmul.f32 -1.442695, %v1082_v26  ;;  %v1090_v28 = vrot.slane %v1082_v26, 2  ;;  %v1101_v30 = vrot.slane %v1082_v26, 6  ;;  %v1098_v33 = vrot.slane %v1082_v26, 4 }
 0x557   :  { %v2560_v26 = vld [vmem:[#allocation7 + $0xc4] ss:$16 sps:$4 sm:$0xff]  }
 0x558   :  { %1917 = vpow2.f32 %v1777_v27  ;;  %v1778_v29 = vmul.f32 -1.442695, %v1090_v28  ;;  %v1779_v31 = vmul.f32 -1.442695, %v1101_v30  ;;  %v2563_v27 = vld [vmem:[#allocation7 + $0xcc] ss:$16 sps:$4 sm:$0xff]  }
 0x559   :  { %v2566_v28 = vld [vmem:[#allocation7 + $0xc0] ss:$16 sps:$4 sm:$0xff]   ;;  %v2572_v30 = vld [vmem:[#allocation7 + $0xe4] ss:$16 sps:$4 sm:$0xff]  }
 0x55a   :  { %1919 = vpow2.f32 %v1778_v29  ;;  %v2569_v29 = vld [vmem:[#allocation7 + $0xc8] ss:$16 sps:$4 sm:$0xff]  }
 0x55b   :  { %1921 = vpow2.f32 %v1779_v31  ;;  %v2575_v31 = vld [vmem:[#allocation7 + $0xec] ss:$16 sps:$4 sm:$0xff]  }
 0x562   :  { %v1918_v32 = vpop.eup %1917 }
 0x563   :  { %v1086_v46 = vadd.f32 1.0, %v1918_v32  ;;  %v2578_v32 = vld [vmem:[#allocation7 + $0xe0] ss:$16 sps:$4 sm:$0xff]  }
 0x564   :  { %v1920_v2 = vpop.eup %1919 }
 0x565   :  { %1923 = vrcp.f32 %v1086_v46  ;;  %v1095_v47 = vadd.f32 1.0, %v1920_v2  ;;  %v1922_v3 = vpop.eup %1921 }
 0x566   :  { %1925 = vtanh.f32 %v1098_v33  ;;  %v1106_v52 = vadd.f32 1.0, %v1922_v3  ;;  %v2581_v33 = vld [vmem:[#allocation7 + $0xe8] ss:$16 sps:$4 sm:$0xff]  }
 0x567   :  { %1927 = vrcp.f32 %v1095_v47 }
 0x568   :  { %1929 = vrcp.f32 %v1106_v52 }
 0x56f   :  { %v1924_v50 = vpop.eup %1923 }
 0x570   :  { %v1926_v49 = vpop.eup %1925 }
 0x571   :  { %v1928_v51 = vpop.eup %1927  ;;  %v1110_v54 = vmul.f32 %v1926_v49, %v1924_v50 }
 0x572   :  { %v1109_v53 = vmul.f32 %v1928_v51, %v2424_v1  ;;  %v1930_v55 = vpop.eup %1929  ;;  %v2487_v1 = vld [vmem:[#allocation7 + $0x24] ss:$16 sps:$4 sm:$0xff]  }
 0x574   :  { %v2476_v48 = vadd.f32 %v1110_v54, %v1109_v53 }
 0x576   :  { %1931 = vtanh.f32 %v2476_v48 }
 0x580   :  { %v1932_v37 = vpop.eup %1931 }
 0x581   :  { %v1113_v57 = vmul.f32 %v1932_v37, %v1930_v55  ;;  %v1243_v37 = vunpack.c.h.bf16 %v2470_v14 }
 0x583   :  { %v1114_v58 = vpack.c.bf16 %v1113_v57, %v1113_v57 }
 0x585   :  { %v1122_v59 = vrot.slane %v1114_v58, %v2283_v56  ;;  %1194 = vmatmul.mubr.bf16.vlgmr.msra.gmra.mrb[20].mxu0 %v1114_v58  ;;  %1235 = vmatmul.mubr.bf16.vlgmr.msra.gmra.mrb[20].mxu1 %v1114_v58 }
 0x586   :  { %1345 = vmatpush1.bf16.msra.mxu0 %v2480_v60  ;;  %1386 = vmatpush1.bf16.msra.mxu1 %v2483_v62 }
 0x587   :  { %v1129_v63 = vrot.slane %v1122_v59, %v2283_v56  ;;  %1346 = vmatprep.subr.bf16.mxu0 %v2487_v1  ;;  %1387 = vmatprep.subr.bf16.mxu1 %v2490_v34 }
 0x588   :  { %1376 = vmatprep.mubr.bf16.mxu0 %v2091_v0  ;;  %1417 = vmatprep.mubr.bf16.mxu1 %v2091_v0 }
 0x589   :  { %v1131_v40 = vunpack.i.h.s16 %v1129_v63  ;;  %v1780_v35 = vpack.i.b16 %v1129_v63, %v1129_v63 }
 0x58a   :  { %1347 = vmatpush1.bf16.msra.mxu0 %v2500_v41  ;;  %1388 = vmatpush1.bf16.msra.mxu1 %v2503_v45 }
 0x58b   :  { %v1133_v39 = vpack.i.b16 %v1131_v40, %v1131_v40  ;;  %v1140_v4 = vrot.slane %v1780_v35, %v2288_v61  ;;  %1348 = vmatprep.subr.bf16.mxu0 %v2507_v5  ;;  %1389 = vmatprep.subr.bf16.mxu1 %v2510_v6 }
 0x58d   :  { %v1147_v42 = vrot.slane %v1133_v39, %v2288_v61  ;;  %v1154_v44 = vsel %vm2496_vm12, %v1140_v4, %v1153_v38 }
 0x58e   :  { %1155 = vst [vmem:[#allocation9] sm:$0x4] %v1154_v44  ;;  %1349 = vmatpush1.bf16.msra.mxu0 %v2516_v8  ;;  %1390 = vmatpush1.bf16.msra.mxu1 %v2519_v11 }
 0x58f   :  { %v1157_v12 = vsel %vm2496_vm12, %v1147_v42, %v1156_v7  ;;  %1350 = vmatprep.subr.bf16.mxu0 %v2524_v13  ;;  %1391 = vmatprep.subr.bf16.mxu1 %v2527_v15 }
 0x590   :  { %1158 = vst [vmem:[#allocation9 + $0x4] sm:$0x4] %v1157_v12 }
 0x592   :  { %1351 = vmatpush1.bf16.msra.mxu0 %v2530_v16  ;;  %1392 = vmatpush1.bf16.msra.mxu1 %v2533_v17 }
 0x593   :  { %1352 = vmatprep.subr.bf16.mxu0 %v2536_v18  ;;  %1393 = vmatprep.subr.bf16.mxu1 %v2539_v19 }
 0x596   :  { %1353 = vmatpush1.bf16.msra.mxu0 %v2542_v20  ;;  %1394 = vmatpush1.bf16.msra.mxu1 %v2545_v21 }
 0x597   :  { %1354 = vmatprep.subr.bf16.mxu0 %v2548_v22  ;;  %1395 = vmatprep.subr.bf16.mxu1 %v2551_v23 }
 0x59a   :  { %1355 = vmatpush1.bf16.msra.mxu0 %v2554_v24  ;;  %1396 = vmatpush1.bf16.msra.mxu1 %v2557_v25 }
 0x59b   :  { %1356 = vmatprep.subr.bf16.mxu0 %v2560_v26  ;;  %1397 = vmatprep.subr.bf16.mxu1 %v2563_v27 }
 0x59e   :  { %1357 = vmatpush1.bf16.msra.mxu0 %v2566_v28  ;;  %1398 = vmatpush1.bf16.msra.mxu1 %v2569_v29 }
 0x59f   :  { %1358 = vmatprep.subr.bf16.mxu0 %v2572_v30  ;;  %1399 = vmatprep.subr.bf16.mxu1 %v2575_v31 }
 0x5a2   :  { %1359 = vmatpush1.bf16.msra.mxu0 %v2578_v32  ;;  %1400 = vmatpush1.bf16.msra.mxu1 %v2581_v33 }
 0x5a3   :  { %1528 = vmatprep.subr.bf16.mxu0 %v2464_v9  ;;  %1569 = vmatprep.subr.bf16.mxu1 %v2467_v10 }
 0x658   :  { %v1195_v46 = vpop.f32.mrb[20].mxu0  ;;  %v1236_v2 = vpop.f32.mrb[20].mxu1 }
 0x659   :  { %v1197_v47 = vpop.f32.mrb[21].mxu0  ;;  %v1238_v3 = vpop.f32.mrb[21].mxu1 }
 0x65a   :  { %v1248_v50 = vcombine.low %v1195_v46, %v1197_v47  ;;  %v1249_v49 = vcombine.low %v1236_v2, %v1238_v3  ;;  %v1199_v51 = vpop.f32.mrb[22].mxu0  ;;  %v1240_v52 = vpop.f32.mrb[22].mxu1 }
 0x65b   :  { %v1200_v53 = vpop.f32.mrb[23].mxu0  ;;  %v1241_v54 = vpop.f32.mrb[23].mxu1 }
 0x65c   :  { %v1256_v55 = vrot.slane %v1248_v50, %v2273_v43  ;;  %v1263_v57 = vrot.slane %v1249_v49, %v2273_v43 }
 0x65e   :  { %v1264_v58 = vcombine.low %v1256_v55, %v1263_v57 }
 0x660   :  { %v1266_v9 = vadd.f32 %v1264_v58, %v1243_v37 }
 0x662   :  { %v1781_v59 = vmul.f32 -1.442695, %v1266_v9  ;;  %v1274_v10 = vrot.slane %v1266_v9, 2  ;;  %v1285_v40 = vrot.slane %v1266_v9, 6  ;;  %v1282_v38 = vrot.slane %v1266_v9, 4 }
 0x664   :  { %1933 = vpow2.f32 %v1781_v59  ;;  %v1782_v63 = vmul.f32 -1.442695, %v1274_v10  ;;  %v1783_v35 = vmul.f32 -1.442695, %v1285_v40 }
 0x666   :  { %1935 = vpow2.f32 %v1782_v63 }
 0x667   :  { %1937 = vpow2.f32 %v1783_v35 }
 0x66e   :  { %v1934_v36 = vpop.eup %1933 }
 0x66f   :  { %v1270_v39 = vadd.f32 1.0, %v1934_v36 }
 0x670   :  { %v1936_v4 = vpop.eup %1935 }
 0x671   :  { %1939 = vrcp.f32 %v1270_v39  ;;  %v1279_v7 = vadd.f32 1.0, %v1936_v4  ;;  %v1938_v14 = vpop.eup %1937 }
 0x672   :  { %1941 = vtanh.f32 %v1282_v38  ;;  %v1290_v46 = vadd.f32 1.0, %v1938_v14 }
 0x673   :  { %1943 = vrcp.f32 %v1279_v7 }
 0x674   :  { %1945 = vrcp.f32 %v1290_v46  ;;  %v1520_v46 = vld [vmem:[#allocation9] sm:$0x8] }
 0x67b   :  { %v1940_v42 = vpop.eup %1939 }
 0x67c   :  { %v1942_v44 = vpop.eup %1941 }
 0x67d   :  { %v1944_v12 = vpop.eup %1943  ;;  %v1294_v47 = vmul.f32 %v1942_v44, %v1940_v42 }
 0x67e   :  { %v1293_v2 = vmul.f32 %v1944_v12, %v2476_v48  ;;  %v1946_v50 = vpop.eup %1945 }
 0x680   :  { %v2590_v3 = vadd.f32 %v1294_v47, %v1293_v2 }
 0x682   :  { %1947 = vtanh.f32 %v2590_v3 }
 0x68c   :  { %v1948_v49 = vpop.eup %1947 }
 0x68d   :  { %v1297_v51 = vmul.f32 %v1948_v49, %v1946_v50 }
 0x68f   :  { %v1298_v52 = vpack.c.bf16 %v1297_v51, %v1297_v51 }
 0x691   :  { %v1306_v53 = vrot.slane %v1298_v52, %v2283_v56  ;;  %1377 = vmatmul.mubr.bf16.vlgmr.msra.gmra.mrb[24].mxu0 %v1298_v52  ;;  %1418 = vmatmul.mubr.bf16.vlgmr.msra.gmra.mrb[24].mxu1 %v1298_v52 }
 0x692   :  { %1529 = vmatpush1.bf16.msra.mxu0 %v2480_v60  ;;  %1570 = vmatpush1.bf16.msra.mxu1 %v2483_v62 }
 0x693   :  { %v1313_v48 = vrot.slane %v1306_v53, %v2283_v56  ;;  %1530 = vmatprep.subr.bf16.mxu0 %v2487_v1  ;;  %1571 = vmatprep.subr.bf16.mxu1 %v2490_v34  ;;  %v1336_v1 = vld [vmem:[#allocation9] sm:$0x4] }
 0x694   :  { %1560 = vmatprep.mubr.bf16.mxu0 %v2091_v0  ;;  %1601 = vmatprep.mubr.bf16.mxu1 %v2091_v0  ;;  %v1339_v0 = vld [vmem:[#allocation9 + $0x4] sm:$0x4] }
 0x695   :  { %v1315_v54 = vunpack.i.h.s16 %v1313_v48  ;;  %v1784_v55 = vpack.i.b16 %v1313_v48, %v1313_v48 }
 0x696   :  { %1531 = vmatpush1.bf16.msra.mxu0 %v2500_v41  ;;  %1572 = vmatpush1.bf16.msra.mxu1 %v2503_v45 }
 0x697   :  { %v1317_v60 = vpack.i.b16 %v1315_v54, %v1315_v54  ;;  %v1324_v62 = vrot.slane %v1784_v55, %v2288_v61  ;;  %1532 = vmatprep.subr.bf16.mxu0 %v2507_v5  ;;  %1573 = vmatprep.subr.bf16.mxu1 %v2510_v6 }
 0x699   :  { %v1331_v34 = vrot.slane %v1317_v60, %v2288_v61  ;;  %v1337_v37 = vsel %vm1335_vm14, %v1324_v62, %v1336_v1 }
 0x69a   :  { %1338 = vst [vmem:[#allocation9] sm:$0x4] %v1337_v37  ;;  %1533 = vmatpush1.bf16.msra.mxu0 %v2516_v8  ;;  %1574 = vmatpush1.bf16.msra.mxu1 %v2519_v11  ;;  %v2630_v8 = vld [vmem:[#allocation4 + $0x18] sm:$0xff]  }
 0x69b   :  { %v1340_v41 = vsel %vm1335_vm14, %v1331_v34, %v1339_v0  ;;  %1534 = vmatprep.subr.bf16.mxu0 %v2524_v13  ;;  %1575 = vmatprep.subr.bf16.mxu1 %v2527_v15 }
 0x69c   :  { %1341 = vst [vmem:[#allocation9 + $0x4] sm:$0x4] %v1340_v41  ;;  %v1610_v41 = vunpack.c.h.bf16 %v2630_v8 }
 0x69e   :  { %1535 = vmatpush1.bf16.msra.mxu0 %v2530_v16  ;;  %1576 = vmatpush1.bf16.msra.mxu1 %v2533_v17 }
 0x69f   :  { %1536 = vmatprep.subr.bf16.mxu0 %v2536_v18  ;;  %1577 = vmatprep.subr.bf16.mxu1 %v2539_v19 }
 0x6a2   :  { %1537 = vmatpush1.bf16.msra.mxu0 %v2542_v20  ;;  %1578 = vmatpush1.bf16.msra.mxu1 %v2545_v21  ;;  %v1426_v21 = vunpack.c.l.bf16 %v2630_v8 }
 0x6a3   :  { %1538 = vmatprep.subr.bf16.mxu0 %v2548_v22  ;;  %1579 = vmatprep.subr.bf16.mxu1 %v2551_v23 }
 0x6a6   :  { %1539 = vmatpush1.bf16.msra.mxu0 %v2554_v24  ;;  %1580 = vmatpush1.bf16.msra.mxu1 %v2557_v25 }
 0x6a7   :  { %1540 = vmatprep.subr.bf16.mxu0 %v2560_v26  ;;  %1581 = vmatprep.subr.bf16.mxu1 %v2563_v27 }
 0x6aa   :  { %1541 = vmatpush1.bf16.msra.mxu0 %v2566_v28  ;;  %1582 = vmatpush1.bf16.msra.mxu1 %v2569_v29 }
 0x6ab   :  { %1542 = vmatprep.subr.bf16.mxu0 %v2572_v30  ;;  %1583 = vmatprep.subr.bf16.mxu1 %v2575_v31 }
 0x6ae   :  { %1543 = vmatpush1.bf16.msra.mxu0 %v2578_v32  ;;  %1584 = vmatpush1.bf16.msra.mxu1 %v2581_v33 }
 0x764   :  { %v1378_v45 = vpop.f32.mrb[24].mxu0  ;;  %v1419_v5 = vpop.f32.mrb[24].mxu1 }
 0x765   :  { %v1380_v6 = vpop.f32.mrb[25].mxu0  ;;  %v1421_v11 = vpop.f32.mrb[25].mxu1 }
 0x766   :  { %v1431_v13 = vcombine.low %v1378_v45, %v1380_v6  ;;  %v1432_v15 = vcombine.low %v1419_v5, %v1421_v11  ;;  %v1382_v16 = vpop.f32.mrb[26].mxu0  ;;  %v1423_v17 = vpop.f32.mrb[26].mxu1 }
 0x767   :  { %v1383_v18 = vpop.f32.mrb[27].mxu0  ;;  %v1424_v19 = vpop.f32.mrb[27].mxu1 }
 0x768   :  { %v1439_v20 = vrot.slane %v1431_v13, %v2273_v43  ;;  %v1446_v22 = vrot.slane %v1432_v15, %v2273_v43 }
 0x76a   :  { %v1447_v23 = vcombine.low %v1439_v20, %v1446_v22 }
 0x76c   :  { %v1449_v24 = vadd.f32 %v1447_v23, %v1426_v21 }
 0x76e   :  { %v1785_v25 = vmul.f32 -1.442695, %v1449_v24  ;;  %v1457_v26 = vrot.slane %v1449_v24, 2  ;;  %v1468_v28 = vrot.slane %v1449_v24, 6  ;;  %v1465_v31 = vrot.slane %v1449_v24, 4 }
 0x770   :  { %1949 = vpow2.f32 %v1785_v25  ;;  %v1786_v27 = vmul.f32 -1.442695, %v1457_v26  ;;  %v1787_v29 = vmul.f32 -1.442695, %v1468_v28 }
 0x772   :  { %1951 = vpow2.f32 %v1786_v27 }
 0x773   :  { %1953 = vpow2.f32 %v1787_v29 }
 0x77a   :  { %v1950_v30 = vpop.eup %1949 }
 0x77b   :  { %v1453_v32 = vadd.f32 1.0, %v1950_v30 }
 0x77c   :  { %v1952_v33 = vpop.eup %1951 }
 0x77d   :  { %1955 = vrcp.f32 %v1453_v32  ;;  %v1462_v57 = vadd.f32 1.0, %v1952_v33  ;;  %v1954_v58 = vpop.eup %1953 }
 0x77e   :  { %1957 = vtanh.f32 %v1465_v31  ;;  %v1473_v63 = vadd.f32 1.0, %v1954_v58 }
 0x77f   :  { %1959 = vrcp.f32 %v1462_v57 }
 0x780   :  { %1961 = vrcp.f32 %v1473_v63 }
 0x787   :  { %v1956_v9 = vpop.eup %1955 }
 0x788   :  { %v1958_v59 = vpop.eup %1957 }
 0x789   :  { %v1960_v10 = vpop.eup %1959  ;;  %v1477_v35 = vmul.f32 %v1958_v59, %v1956_v9 }
 0x78a   :  { %v1476_v40 = vmul.f32 %v1960_v10, %v2590_v3  ;;  %v1962_v38 = vpop.eup %1961  ;;  %v1523_v3 = vld [vmem:[#allocation9 + $0x4] sm:$0x8] }
 0x78c   :  { %v1478_v36 = vadd.f32 %v1477_v35, %v1476_v40 }
 0x78e   :  { %1963 = vtanh.f32 %v1478_v36 }
 0x798   :  { %v1964_v39 = vpop.eup %1963 }
 0x799   :  { %v1480_v4 = vmul.f32 %v1964_v39, %v1962_v38 }
 0x79b   :  { %v1481_v7 = vpack.c.bf16 %v1480_v4, %v1480_v4 }
 0x79d   :  { %v1489_v14 = vrot.slane %v1481_v7, %v2283_v56  ;;  %1561 = vmatmul.mubr.bf16.vlgmr.msra.gmra.mrb[28].mxu0 %v1481_v7  ;;  %1602 = vmatmul.mubr.bf16.vlgmr.msra.gmra.mrb[28].mxu1 %v1481_v7 }
 0x79f   :  { %v1496_v42 = vrot.slane %v1489_v14, %v2283_v56 }
 0x7a1   :  { %v1498_v44 = vunpack.i.h.s16 %v1496_v42  ;;  %v1788_v12 = vpack.i.b16 %v1496_v42, %v1496_v42 }
 0x7a3   :  { %v1500_v2 = vpack.i.b16 %v1498_v44, %v1498_v44  ;;  %v1507_v47 = vrot.slane %v1788_v12, %v2288_v61 }
 0x7a5   :  { %v1514_v50 = vrot.slane %v1500_v2, %v2288_v61  ;;  %v1521_v49 = vsel %vm1519_vm1, %v1507_v47, %v1520_v46 }
 0x7a6   :  { %1522 = vst [vmem:[#allocation9] sm:$0x8] %v1521_v49 }
 0x7a7   :  { %v1524_v51 = vsel %vm1519_vm1, %v1514_v50, %v1523_v3 }
 0x7a8   :  { %1525 = vst [vmem:[#allocation9 + $0x4] sm:$0x8] %v1524_v51 }
 0x7ad   :  { %v1703_v63 = vld [vmem:[#allocation9] sm:$0x8] }
 0x870   :  { %v1562_v52 = vpop.f32.mrb[28].mxu0  ;;  %v1603_v53 = vpop.f32.mrb[28].mxu1 }
 0x871   :  { %v1564_v48 = vpop.f32.mrb[29].mxu0  ;;  %v1605_v54 = vpop.f32.mrb[29].mxu1 }
 0x872   :  { %v1615_v55 = vcombine.low %v1562_v52, %v1564_v48  ;;  %v1616_v60 = vcombine.low %v1603_v53, %v1605_v54  ;;  %v1566_v62 = vpop.f32.mrb[30].mxu0  ;;  %v1607_v1 = vpop.f32.mrb[30].mxu1 }
 0x873   :  { %v1567_v34 = vpop.f32.mrb[31].mxu0  ;;  %v1608_v37 = vpop.f32.mrb[31].mxu1 }
 0x874   :  { %v1623_v0 = vrot.slane %v1615_v55, %v2273_v43  ;;  %v1630_v45 = vrot.slane %v1616_v60, %v2273_v43 }
 0x876   :  { %v1631_v5 = vcombine.low %v1623_v0, %v1630_v45 }
 0x878   :  { %v1633_v6 = vadd.f32 %v1631_v5, %v1610_v41 }
 0x87a   :  { %v1789_v11 = vmul.f32 -1.442695, %v1633_v6  ;;  %v1641_v13 = vrot.slane %v1633_v6, 2  ;;  %v1652_v16 = vrot.slane %v1633_v6, 6  ;;  %v1649_v19 = vrot.slane %v1633_v6, 4 }
 0x87c   :  { %1965 = vpow2.f32 %v1789_v11  ;;  %v1790_v15 = vmul.f32 -1.442695, %v1641_v13  ;;  %v1791_v17 = vmul.f32 -1.442695, %v1652_v16 }
 0x87e   :  { %1967 = vpow2.f32 %v1790_v15 }
 0x87f   :  { %1969 = vpow2.f32 %v1791_v17 }
 0x886   :  { %v1966_v18 = vpop.eup %1965 }
 0x887   :  { %v1637_v20 = vadd.f32 1.0, %v1966_v18 }
 0x888   :  { %v1968_v21 = vpop.eup %1967 }
 0x889   :  { %1971 = vrcp.f32 %v1637_v20  ;;  %v1646_v22 = vadd.f32 1.0, %v1968_v21  ;;  %v1970_v8 = vpop.eup %1969 }
 0x88a   :  { %1973 = vtanh.f32 %v1649_v19  ;;  %v1657_v25 = vadd.f32 1.0, %v1970_v8 }
 0x88b   :  { %1975 = vrcp.f32 %v1646_v22 }
 0x88c   :  { %1977 = vrcp.f32 %v1657_v25 }
 0x893   :  { %v1972_v43 = vpop.eup %1971 }
 0x894   :  { %v1974_v23 = vpop.eup %1973 }
 0x895   :  { %v1976_v24 = vpop.eup %1975  ;;  %v1661_v27 = vmul.f32 %v1974_v23, %v1972_v43 }
 0x896   :  { %v1660_v26 = vmul.f32 %v1976_v24, %v1478_v36  ;;  %v1978_v29 = vpop.eup %1977  ;;  %v1706_v36 = vld [vmem:[#allocation9 + $0x4] sm:$0x8] }
 0x898   :  { %v1662_v28 = vadd.f32 %v1661_v27, %v1660_v26 }
 0x89a   :  { %1979 = vtanh.f32 %v1662_v28  ;;  %1710 = vst [vmem:[#allocation3] sm:$0x3] %v1662_v28 }
 0x8a4   :  { %v1980_v30 = vpop.eup %1979 }
 0x8a5   :  { %v1664_v31 = vmul.f32 %v1980_v30, %v1978_v29 }
 0x8a7   :  { %v1665_v32 = vpack.c.bf16 %v1664_v31, %v1664_v31  ;;  %1709 = vst [vmem:[#allocation2] sm:$0x3] %v1664_v31 }
 0x8a9   :  { %v1673_v33 = vrot.slane %v1665_v32, %v2283_v56 }
 0x8ab   :  { %v1680_v57 = vrot.slane %v1673_v33, %v2283_v56 }
 0x8ad   :  { %v1682_v58 = vunpack.i.h.s16 %v1680_v57  ;;  %v1792_v9 = vpack.i.b16 %v1680_v57, %v1680_v57 }
 0x8af   :  { %v1684_v59 = vpack.i.b16 %v1682_v58, %v1682_v58  ;;  %v1691_v10 = vrot.slane %v1792_v9, %v2288_v61 }
 0x8b1   :  { %v1698_v40 = vrot.slane %v1684_v59, %v2288_v61  ;;  %v1704_v35 = vsel %vm1702_vm3, %v1691_v10, %v1703_v63 }
 0x8b2   :  { %1705 = vst [vmem:[#allocation9] sm:$0x8] %v1704_v35 }
 0x8b3   :  { %v1707_v38 = vsel %vm1702_vm3, %v1698_v40, %v1706_v36 }
 0x8b4   :  { %1708 = vst [vmem:[#allocation9 + $0x4] sm:$0x8] %v1707_v38 }
 0x8b5   :  { %2068 = shalt.err (!%p2065_p6)
}
 0x8b6   :  { %s2069_s12 = scalar_lea.hbm %s2666_s2, 128 }
 0x8b7   :  { %p2070_p7 = scmp.ne.s32.totalorder %s2666_s2, %s2069_s12  ;;  %p2073_p8 = scmp.lt.u32.totalorder %s2069_s12, %s2666_s2 }
 0x8b9   :  { %p2075_p9 = pnand %p2073_p8, %p2070_p7 }
 0x8bb   :  { %2078 = shalt.err (!%p2075_p9)
}
 0x8bc   :  { %1722 = dma.vmem_to_hbm [thread:$0]  %s1717_s8, 128, %s2666_s2, [#allocation6], %s2086_s19, %s2086_s19, %s2087_s20  }
 0x8bd   :  { %2083 = dma.done.wait [#allocation6], 128  }
 0x8be   :  { %2084 = vsyncadd [#allocation6], 4294967168 }
 0x8bf   :  { %1726 = vsyncpa [#allocation5], 1 }
 0x8c0   :  { %1727 = vsyncpa [#allocation8], 1 }
 0x8c1   :  { %1728 = vsyncpa [#allocation6], 1 }

</bundles_post_ra>
